<compile_context>
chip_gen: v7x
topology: tpu7x:2x2x1
jax: 0.10.0
libtpu: 0.0.40
codegen_flags: <defaults>
</compile_context>

<pallas_src>
import math

import numpy as np
import jax
import jax.numpy as jnp
from jax.experimental import pallas as pl
from jax.experimental.pallas import tpu as pltpu


# ---------------------------------------------------------------------------
# Trace-time parameter packing (free at runtime)
# ---------------------------------------------------------------------------
def _round_up(x, m):
    return (x + m - 1) // m * m


def _fold_bn(gamma, beta, mean, var, eps):
    scale = gamma / jnp.sqrt(var + eps)
    return scale, beta - mean * scale


def _pack_conv3(w, scale):
    """(Cout, Cin, 3) -> lane-dense bf16 (Cout, 3*Cin_pad) with the BN scale
    folded in; columns ordered [tap(-1) chans | tap(0) chans | tap(+1) chans]."""
    cout, cin, k = w.shape
    assert k == 3
    w = w * scale[:, None, None]
    cin_p = _round_up(cin, 8)
    if cin_p != cin:
        w = jnp.pad(w, ((0, 0), (0, cin_p - cin), (0, 0)))
    return jnp.transpose(w, (0, 2, 1)).reshape(cout, 3 * cin_p).astype(jnp.bfloat16)


def _pack_conv1_as_center(wd, scale):
    """1x1 downsample weight (Cout, Cin, 1) placed at the centre tap of a 3-tap
    layout so it row-stacks with a conv3 weight and shares one MXU pass."""
    cout, cin, _ = wd.shape
    w3 = jnp.zeros((cout, cin, 3), wd.dtype).at[:, :, 1].set(wd[:, :, 0])
    return _pack_conv3(w3, scale)


def _bias_col(b):
    return jnp.reshape(b, (-1, 1)).astype(jnp.float32)


def _gather_matrix(bt, l_in, l_out):
    """0/1 matrix implementing the MaxPool stride-2 subsample per batch segment."""
    g = np.zeros((bt * l_in, bt * l_out), np.float32)
    for b in range(bt):
        for j in range(l_out):
            g[b * l_in + 2 * j, b * l_out + j] = 1.0
    return jnp.asarray(g)


def _avgpool_matrix(bt, l_in, n_bins=2):
    """Averaging matrix implementing AdaptiveAvgPool1d(n_bins) per batch segment."""
    p = np.zeros((bt * l_in, bt * n_bins), np.float32)
    for b in range(bt):
        for i in range(n_bins):
            lo = (i * l_in) // n_bins
            hi = -(-((i + 1) * l_in) // n_bins)
            p[b * l_in + lo:b * l_in + hi, b * n_bins + i] = 1.0 / (hi - lo)
    return jnp.asarray(p)


# ---------------------------------------------------------------------------
# Generation-aware sizing
# ---------------------------------------------------------------------------
def _vmem_capacity_bytes():
    try:
        return int(pltpu.get_tpu_info().vmem_capacity_bytes)
    except Exception:
        return 64 << 20                       # conservative (v7x floor)


def _grid_semantics(n_steps):
    kind = ""
    try:
        kind = jax.devices()[0].device_kind.lower()
    except Exception:
        pass
    # Only v7x has 2 TensorCores; CORE_PARALLEL actually shards the grid across
    # them (plain "parallel" does not change codegen on 1-TC chips).
    if "v7" in kind and n_steps >= 2 and hasattr(pltpu, "CORE_PARALLEL"):
        return (pltpu.CORE_PARALLEL,)
    return ("parallel",)


def _pick_batch_tile(nb, l_full, l_pool, c_max, weight_bytes, budget_bytes):
    """Largest divisor of nb whose fused-network footprint fits the VMEM budget;
    stops growing once the post-pool slab is already >= 1024 lanes wide."""
    def footprint(bt):
        acts = bt * (l_full * 64 * 10 + l_pool * c_max * 14) * 4   # generous
        mats = 4 * (bt * l_full) * (bt * l_pool) + 4 * (bt * l_pool) * 2 * bt
        return weight_bytes + acts + mats

    best = None
    for bt in range(1, nb + 1):
        if nb % bt:
            continue
        if best is not None and bt * l_pool > 1024:
            break
        if footprint(bt) <= budget_bytes:
            best = bt
    # TODO(synk): for very long sequences also tile the L axis with a 1-element
    # halo; at these sizes a single batch element always fits VMEM.
    return 1 if best is None else best


# ---------------------------------------------------------------------------
# The fused whole-network kernel
# ---------------------------------------------------------------------------
def _make_network_kernel(block_infos, l_full, l_pool, bt):
    n_full = bt * l_full
    n_half = bt * l_pool

    def kernel(x_ref, *refs):
        o_ref = refs[-1]
        prm = iter(refs[:-1])

        # Hoisted per-batch-segment boundary masks (computed once, reused by
        # every conv / pooling tap below).
        lane_f = jax.lax.broadcasted_iota(jnp.int32, (1, n_full), 1) % l_full
        first_f, last_f = lane_f == 0, lane_f == l_full - 1
        lane_h = jax.lax.broadcasted_iota(jnp.int32, (1, n_half), 1) % l_pool
        first_h, last_h = lane_h == 0, lane_h == l_pool - 1

        def taps(x, first, last):
            # x(l-1) / x(l+1) neighbours via XLU rolls; lanes that wrapped
            # across a batch-segment boundary are masked to the conv zero-pad.
            n = x.shape[1]
            xm1 = jnp.where(first, 0.0, pltpu.roll(x, shift=1, axis=1))
            xp1 = jnp.where(last, 0.0, pltpu.roll(x, shift=n - 1, axis=1))
            return xm1, xp1

        def conv3(x, w_ref, b_ref, first, last):
            # Fused k=3 conv + folded-BN bias as ONE MXU matmul.  Taps and
            # masking stay in f32; a single bf16 cast right before the dot.
            xm1, xp1 = taps(x, first, last)
            xcat = jnp.concatenate([xm1, x, xp1], axis=0).astype(jnp.bfloat16)
            return jnp.dot(w_ref[...], xcat,
                           preferred_element_type=jnp.float32) + b_ref[...]

        # ---- stem: conv3 + BN + ReLU + MaxPool1d(k=3, s=2, p=1) ------------
        w, b = next(prm), next(prm)
        h = jnp.maximum(conv3(x_ref[...], w, b, first_f, last_f), 0.0)
        hm1, hp1 = taps(h, first_f, last_f)      # h >= 0, so 0-mask == -inf pad
        h = jnp.maximum(jnp.maximum(hm1, h), hp1)
        # stride-2 subsample via a 0/1 gather matmul (block-diag over segments)
        h = jnp.dot(h, next(prm)[...], preferred_element_type=jnp.float32)

        # ---- BasicBlocks (stride 1; downsample folded into conv1's matmul) -
        for info in block_infos:
            w1, b1, w2, b2 = next(prm), next(prm), next(prm), next(prm)
            pre = conv3(h, w1, b1, first_h, last_h)
            if info["has_ds"]:
                cout = info["cout"]
                h1, res = jnp.maximum(pre[:cout], 0.0), pre[cout:]
            else:
                h1, res = jnp.maximum(pre, 0.0), h
            h = jnp.maximum(conv3(h1, w2, b2, first_h, last_h) + res, 0.0)

        # ---- AdaptiveAvgPool1d(2) as a per-segment averaging matmul --------
        o_ref[...] = jnp.dot(h, next(prm)[...], preferred_element_type=jnp.float32)

    return kernel


# ---------------------------------------------------------------------------
# Full forward pass (one pallas_call)
# ---------------------------------------------------------------------------
def resnet_forward(x, params, eps=1e-5):
    """Pallas forward matching ResNet.forward (eval-mode BN).  x: (B, Cin, L)."""
    B, cin, L = x.shape
    l_pool = (L - 1) // 2 + 1                 # MaxPool1d(k=3, s=2, p=1) length

    # --- fold BN into bf16 conv weights, pack lane-dense (trace time) -------
    s0, b0 = _fold_bn(*params["stem_bn"], eps)
    stem_w, stem_b = _pack_conv3(params["stem_w"], s0), _bias_col(b0)
    cin_p = stem_w.shape[1] // 3
    c_cur = stem_w.shape[0]

    block_params, block_infos = [], []
    for blk in params["blocks"]:
        s1, b1 = _fold_bn(*blk["bn1"], eps)
        s2, b2 = _fold_bn(*blk["bn2"], eps)
        cout = blk["w1"].shape[0]
        if blk["wd"] is not None:
            sd, bd = _fold_bn(*blk["bnd"], eps)
            w1 = jnp.concatenate(
                [_pack_conv3(blk["w1"], s1), _pack_conv1_as_center(blk["wd"], sd)],
                axis=0)                                   # (2*Cout, 3*Cin)
            bias1 = _bias_col(jnp.concatenate([b1, bd], axis=0))
        else:
            assert c_cur == cout, "identity residual requires Cin == Cout"
            w1, bias1 = _pack_conv3(blk["w1"], s1), _bias_col(b1)
        block_params += [w1, bias1, _pack_conv3(blk["w2"], s2), _bias_col(b2)]
        block_infos.append({"has_ds": blk["wd"] is not None, "cout": cout})
        c_cur = cout
    c_final = c_cur

    # --- generation-aware batch tiling ---------------------------------------
    cap = _vmem_capacity_bytes()
    vmem_limit = min(cap * 3 // 4, 96 << 20)
    weight_bytes = sum(int(p.size) * p.dtype.itemsize
                       for p in [stem_w, stem_b] + block_params)
    c_max = max(c_final, 64)
    bt = _pick_batch_tile(B, L, l_pool, c_max, weight_bytes, vmem_limit // 2)
    n_chunks = B // bt

    gather = _gather_matrix(bt, L, l_pool)
    pool = _avgpool_matrix(bt, l_pool, 2)
    flat = [stem_w, stem_b, gather] + block_params + [pool]

    # --- lane-dense (chunk, C, bt*L) activation slab, l fastest per batch ----
    if cin_p != cin:
        x = jnp.pad(x, ((0, 0), (0, cin_p - cin), (0, 0)))
    xs = x.reshape(n_chunks, bt, cin_p, L).transpose(0, 2, 1, 3)
    xs = xs.reshape(n_chunks, cin_p, bt * L)

    kernel = _make_network_kernel(block_infos, L, l_pool, bt)
    in_specs = [pl.BlockSpec((None, cin_p, bt * L), lambda i: (i, 0, 0))]
    in_specs += [pl.BlockSpec(p.shape, lambda i: (0, 0)) for p in flat]

    out = pl.pallas_call(
        kernel,
        out_shape=jax.ShapeDtypeStruct((n_chunks, c_final, 2 * bt), jnp.float32),
        grid_spec=pltpu.PrefetchScalarGridSpec(
            num_scalar_prefetch=0,
            grid=(n_chunks,),
            in_specs=in_specs,
            out_specs=pl.BlockSpec((None, c_final, 2 * bt), lambda i: (i, 0, 0)),
        ),
        compiler_params=pltpu.CompilerParams(
            dimension_semantics=_grid_semantics(n_chunks),
            vmem_limit_bytes=vmem_limit,
        ),
    )(xs, *flat)

    # (chunk, C, bt*2) -> (B, C*2), matching x.view(B, -1) of a (B, C, 2) tensor.
    out = out.reshape(n_chunks, c_final, bt, 2).transpose(0, 2, 1, 3)
    return out.reshape(B, 2 * c_final)


# ---------------------------------------------------------------------------
# Pure-JAX f32 reference mirroring the PyTorch module (eval-mode BN)
# ---------------------------------------------------------------------------
def ref_resnet(x, params, eps=1e-5):
    def conv(h, w, pad):
        return jax.lax.conv_general_dilated(
            h, w, window_strides=(1,), padding=((pad, pad),),
            dimension_numbers=("NCH", "OIH", "NCH"))

    def bn(h, p):
        g, b, m, v = (a[None, :, None] for a in p)
        return (h - m) / jnp.sqrt(v + eps) * g + b

    h = jax.nn.relu(bn(conv(x, params["stem_w"], 1), params["stem_bn"]))
    h = jax.lax.reduce_window(h, -jnp.inf, jax.lax.max,
                              (1, 1, 3), (1, 1, 2), ((0, 0), (0, 0), (1, 1)))
    for blk in params["blocks"]:
        identity = h
        o = jax.nn.relu(bn(conv(h, blk["w1"], 1), blk["bn1"]))
        o = bn(conv(o, blk["w2"], 1), blk["bn2"])
        if blk["wd"] is not None:
            identity = bn(conv(h, blk["wd"], 0), blk["bnd"])
        h = jax.nn.relu(o + identity)
    B, C, L = h.shape
    bins = []
    for i in range(2):
        lo = (i * L) // 2
        hi = -(-((i + 1) * L) // 2)
        bins.append(jnp.mean(h[:, :, lo:hi], axis=-1))
    return jnp.stack(bins, axis=-1).reshape(B, C * 2)


# ---------------------------------------------------------------------------
# Parameter construction mirroring ResNet.__init__ (BasicBlock, expansion=1)
# ---------------------------------------------------------------------------
def init_resnet_params(key, cin, layers, layer_planes):
    """The module uses planes=64 for the first layer regardless of
    layer_planes[0] and always builds blocks with stride=1 (downsample is a
    1x1 conv + BN whenever the channel count changes)."""
    if len(layers) != len(layer_planes):
        raise ValueError("layers and layer_planes must have the same length")

    def conv_w(k, cout, cin_, ksize):
        std = math.sqrt(2.0 / (ksize * cout))            # the module's init
        return jax.random.normal(k, (cout, cin_, ksize), jnp.float32) * std

    def bn_p(k, c):
        k1, k2, k3, k4 = jax.random.split(k, 4)
        return (jax.random.uniform(k1, (c,), minval=0.5, maxval=1.5),   # gamma
                jax.random.normal(k2, (c,)) * 0.1,                      # beta
                jax.random.normal(k3, (c,)) * 0.1,                      # running mean
                jax.random.uniform(k4, (c,), minval=0.5, maxval=1.5))   # running var

    keys = iter(jax.random.split(key, 4 + 6 * sum(layers)))
    params = {"stem_w": conv_w(next(keys), 64, cin, 3),
              "stem_bn": bn_p(next(keys), 64),
              "blocks": []}
    inplanes = 64
    for li, nblocks in enumerate(layers):
        planes = 64 if li == 0 else layer_planes[li]
        for _ in range(nblocks):
            blk = {"w1": conv_w(next(keys), planes, inplanes, 3),
                   "bn1": bn_p(next(keys), planes),
                   "w2": conv_w(next(keys), planes, planes, 3),
                   "bn2": bn_p(next(keys), planes),
                   "wd": None, "bnd": None}
            if inplanes != planes:                       # downsample path
                blk["wd"] = conv_w(next(keys), planes, inplanes, 1)
                blk["bnd"] = bn_p(next(keys), planes)
            params["blocks"].append(blk)
            inplanes = planes
    return params


if __name__ == "__main__":
    B, CIN, L = 2, 14, 16
    layers, layer_planes = [1, 1], [64, 128]

    key = jax.random.PRNGKey(0)
    k_params, k_x = jax.random.split(key)
    params = init_resnet_params(k_params, CIN, layers, layer_planes)
    x = jax.random.normal(k_x, (B, CIN, L), dtype=jnp.float32)

    out = jax.block_until_ready(resnet_forward(x, params))

    ref = ref_resnet(x, params)
    n_feats = 2 * params["blocks"][-1]["w1"].shape[0]
    assert out.shape == (B, n_feats), (out.shape, (B, n_feats))
    max_err = float(jnp.max(jnp.abs(out - ref)))
    assert jnp.allclose(out, ref, atol=5e-2, rtol=5e-2), (
        f"mismatch vs JAX reference (max abs err {max_err})")

    print("KERNEL_OK")
</pallas_src>

<mosaic_0001>
module attributes {stable_mosaic.version = 11 : i64} {
  func.func @kernel(%arg0: i32, %arg1: memref<1x16x32xf32, #tpu.memory_space<vmem>>, %arg2: memref<64x48xbf16, #tpu.memory_space<vmem>>, %arg3: memref<64x1xf32, #tpu.memory_space<vmem>>, %arg4: memref<32x16xf32, #tpu.memory_space<vmem>>, %arg5: memref<64x192xbf16, #tpu.memory_space<vmem>>, %arg6: memref<64x1xf32, #tpu.memory_space<vmem>>, %arg7: memref<64x192xbf16, #tpu.memory_space<vmem>>, %arg8: memref<64x1xf32, #tpu.memory_space<vmem>>, %arg9: memref<256x192xbf16, #tpu.memory_space<vmem>>, %arg10: memref<256x1xf32, #tpu.memory_space<vmem>>, %arg11: memref<128x384xbf16, #tpu.memory_space<vmem>>, %arg12: memref<128x1xf32, #tpu.memory_space<vmem>>, %arg13: memref<16x4xf32, #tpu.memory_space<vmem>>, %arg14: memref<1x128x4xf32, #tpu.memory_space<vmem>>) attributes {dimension_semantics = [#tpu.dimension_semantics<parallel>], iteration_bounds = array<i64: 1>, scalar_prefetch = 0 : i64, scratch_operands = 0 : i64, tpu.core_type = #tpu.core_type<tc>, window_params = [{transform_indices = @transform_0, window_bounds = array<i64: 1, 16, 32>}, {pipeline_mode = #tpu.pipeline_mode<synchronous>, transform_indices = @transform_1, window_bounds = array<i64: 64, 48>}, {pipeline_mode = #tpu.pipeline_mode<synchronous>, transform_indices = @transform_2, window_bounds = array<i64: 64, 1>}, {pipeline_mode = #tpu.pipeline_mode<synchronous>, transform_indices = @transform_3, window_bounds = array<i64: 32, 16>}, {pipeline_mode = #tpu.pipeline_mode<synchronous>, transform_indices = @transform_4, window_bounds = array<i64: 64, 192>}, {pipeline_mode = #tpu.pipeline_mode<synchronous>, transform_indices = @transform_5, window_bounds = array<i64: 64, 1>}, {pipeline_mode = #tpu.pipeline_mode<synchronous>, transform_indices = @transform_6, window_bounds = array<i64: 64, 192>}, {pipeline_mode = #tpu.pipeline_mode<synchronous>, transform_indices = @transform_7, window_bounds = array<i64: 64, 1>}, {pipeline_mode = #tpu.pipeline_mode<synchronous>, transform_indices = @transform_8, window_bounds = array<i64: 256, 192>}, {pipeline_mode = #tpu.pipeline_mode<synchronous>, transform_indices = @transform_9, window_bounds = array<i64: 256, 1>}, {pipeline_mode = #tpu.pipeline_mode<synchronous>, transform_indices = @transform_10, window_bounds = array<i64: 128, 384>}, {pipeline_mode = #tpu.pipeline_mode<synchronous>, transform_indices = @transform_11, window_bounds = array<i64: 128, 1>}, {pipeline_mode = #tpu.pipeline_mode<synchronous>, transform_indices = @transform_12, window_bounds = array<i64: 16, 4>}, {transform_indices = @transform_13, window_bounds = array<i64: 1, 128, 4>}]} {
    %0 = tpu.iota {dimensions = array<i32: 1>} : vector<1x32xi32>
    %c16_i32 = arith.constant 16 : i32
    %c0_i32 = arith.constant 0 : i32
    %1 = arith.cmpi eq, %c16_i32, %c0_i32 : i32
    %c1_i32 = arith.constant 1 : i32
    %2 = arith.select %1, %c1_i32, %c16_i32 : i32
    %3 = vector.broadcast %2 : i32 to vector<1x32xi32>
    %4 = arith.remsi %0, %3 : vector<1x32xi32>
    %c0_i32_0 = arith.constant 0 : i32
    %5 = vector.broadcast %c0_i32_0 : i32 to vector<1x32xi32>
    %6 = arith.cmpi ne, %4, %5 : vector<1x32xi32>
    %c0_i32_1 = arith.constant 0 : i32
    %7 = vector.broadcast %c0_i32_1 : i32 to vector<1x32xi32>
    %8 = arith.cmpi slt, %4, %7 : vector<1x32xi32>
    %c0_i32_2 = arith.constant 0 : i32
    %9 = arith.cmpi slt, %2, %c0_i32_2 : i32
    %10 = vector.broadcast %9 : i1 to vector<1x32xi1>
    %11 = vector.broadcast %10 : vector<1x32xi1> to vector<1x32xi1>
    %12 = arith.xori %8, %11 : vector<1x32xi1>
    %13 = arith.andi %12, %6 : vector<1x32xi1>
    %14 = vector.broadcast %2 : i32 to vector<1x32xi32>
    %15 = arith.addi %4, %14 : vector<1x32xi32>
    %16 = arith.select %13, %15, %4 : vector<1x32xi1>, vector<1x32xi32>
    %c0_i32_3 = arith.constant 0 : i32
    %17 = vector.broadcast %c0_i32_3 : i32 to vector<1x32xi32>
    %18 = arith.cmpi eq, %16, %17 : vector<1x32xi32>
    %c15_i32 = arith.constant 15 : i32
    %19 = vector.broadcast %c15_i32 : i32 to vector<1x32xi32>
    %20 = arith.cmpi eq, %16, %19 : vector<1x32xi32>
    %21 = tpu.iota {dimensions = array<i32: 1>} : vector<1x16xi32>
    %c8_i32 = arith.constant 8 : i32
    %c0_i32_4 = arith.constant 0 : i32
    %22 = arith.cmpi eq, %c8_i32, %c0_i32_4 : i32
    %c1_i32_5 = arith.constant 1 : i32
    %23 = arith.select %22, %c1_i32_5, %c8_i32 : i32
    %24 = vector.broadcast %23 : i32 to vector<1x16xi32>
    %25 = arith.remsi %21, %24 : vector<1x16xi32>
    %c0_i32_6 = arith.constant 0 : i32
    %26 = vector.broadcast %c0_i32_6 : i32 to vector<1x16xi32>
    %27 = arith.cmpi ne, %25, %26 : vector<1x16xi32>
    %c0_i32_7 = arith.constant 0 : i32
    %28 = vector.broadcast %c0_i32_7 : i32 to vector<1x16xi32>
    %29 = arith.cmpi slt, %25, %28 : vector<1x16xi32>
    %c0_i32_8 = arith.constant 0 : i32
    %30 = arith.cmpi slt, %23, %c0_i32_8 : i32
    %31 = vector.broadcast %30 : i1 to vector<1x16xi1>
    %32 = vector.broadcast %31 : vector<1x16xi1> to vector<1x16xi1>
    %33 = arith.xori %29, %32 : vector<1x16xi1>
    %34 = arith.andi %33, %27 : vector<1x16xi1>
    %35 = vector.broadcast %23 : i32 to vector<1x16xi32>
    %36 = arith.addi %25, %35 : vector<1x16xi32>
    %37 = arith.select %34, %36, %25 : vector<1x16xi1>, vector<1x16xi32>
    %c0_i32_9 = arith.constant 0 : i32
    %38 = vector.broadcast %c0_i32_9 : i32 to vector<1x16xi32>
    %39 = arith.cmpi eq, %37, %38 : vector<1x16xi32>
    %c7_i32 = arith.constant 7 : i32
    %40 = vector.broadcast %c7_i32 : i32 to vector<1x16xi32>
    %41 = arith.cmpi eq, %37, %40 : vector<1x16xi32>
    %c0 = arith.constant 0 : index
    %c0_10 = arith.constant 0 : index
    %c0_11 = arith.constant 0 : index
    %42 = vector.load %arg1[%c0, %c0_10, %c0_11] : memref<1x16x32xf32, #tpu.memory_space<vmem>>, vector<1x16x32xf32>
    %43 = vector.shape_cast %42 : vector<1x16x32xf32> to vector<16x32xf32>
    %c1_i32_12 = arith.constant 1 : i32
    %44 = tpu.dynamic_rotate %43 by %c1_i32_12 dim 1 : vector<16x32xf32>, i32 -> vector<16x32xf32>
    %cst = arith.constant 0.000000e+00 : f32
    %45 = vector.shape_cast %18 : vector<1x32xi1> to vector<1x32xi1>
    %46 = vector.broadcast %45 : vector<1x32xi1> to vector<16x32xi1>
    %47 = vector.broadcast %cst : f32 to vector<16x32xf32>
    %48 = arith.select %46, %47, %44 : vector<16x32xi1>, vector<16x32xf32>
    %c31_i32 = arith.constant 31 : i32
    %49 = tpu.dynamic_rotate %43 by %c31_i32 dim 1 : vector<16x32xf32>, i32 -> vector<16x32xf32>
    %cst_13 = arith.constant 0.000000e+00 : f32
    %50 = vector.shape_cast %20 : vector<1x32xi1> to vector<1x32xi1>
    %51 = vector.broadcast %50 : vector<1x32xi1> to vector<16x32xi1>
    %52 = vector.broadcast %cst_13 : f32 to vector<16x32xf32>
    %53 = arith.select %51, %52, %49 : vector<16x32xi1>, vector<16x32xf32>
    %54 = tpu.concatenate %48, %43, %53 in 0 : vector<16x32xf32>, vector<16x32xf32>, vector<16x32xf32> -> vector<48x32xf32>
    %55 = arith.truncf %54 : vector<48x32xf32> to vector<48x32xbf16>
    %c0_14 = arith.constant 0 : index
    %c0_15 = arith.constant 0 : index
    %56 = vector.load %arg2[%c0_14, %c0_15] : memref<64x48xbf16, #tpu.memory_space<vmem>>, vector<64x48xbf16>
    %cst_16 = arith.constant dense<0.000000e+00> : vector<64x32xf32>
    %57 = tpu.matmul %56, %55, %cst_16 {dimension_numbers = #tpu.dot_dimension_numbers<[1], [0], [0], [1], [0, 0, 1, 1], [], []>} : vector<64x48xbf16>, vector<48x32xbf16>, vector<64x32xf32> -> vector<64x32xf32>
    %c0_17 = arith.constant 0 : index
    %c0_18 = arith.constant 0 : index
    %58 = vector.load %arg3[%c0_17, %c0_18] : memref<64x1xf32, #tpu.memory_space<vmem>>, vector<64x1xf32>
    %59 = vector.broadcast %58 : vector<64x1xf32> to vector<64x32xf32>
    %60 = arith.addf %57, %59 : vector<64x32xf32>
    %cst_19 = arith.constant 0.000000e+00 : f32
    %61 = vector.broadcast %cst_19 : f32 to vector<64x32xf32>
    %62 = arith.maximumf %60, %61 : vector<64x32xf32>
    %c1_i32_20 = arith.constant 1 : i32
    %63 = tpu.dynamic_rotate %62 by %c1_i32_20 dim 1 : vector<64x32xf32>, i32 -> vector<64x32xf32>
    %cst_21 = arith.constant 0.000000e+00 : f32
    %64 = vector.shape_cast %18 : vector<1x32xi1> to vector<1x32xi1>
    %65 = vector.broadcast %64 : vector<1x32xi1> to vector<64x32xi1>
    %66 = vector.broadcast %cst_21 : f32 to vector<64x32xf32>
    %67 = arith.select %65, %66, %63 : vector<64x32xi1>, vector<64x32xf32>
    %c31_i32_22 = arith.constant 31 : i32
    %68 = tpu.dynamic_rotate %62 by %c31_i32_22 dim 1 : vector<64x32xf32>, i32 -> vector<64x32xf32>
    %cst_23 = arith.constant 0.000000e+00 : f32
    %69 = vector.shape_cast %20 : vector<1x32xi1> to vector<1x32xi1>
    %70 = vector.broadcast %69 : vector<1x32xi1> to vector<64x32xi1>
    %71 = vector.broadcast %cst_23 : f32 to vector<64x32xf32>
    %72 = arith.select %70, %71, %68 : vector<64x32xi1>, vector<64x32xf32>
    %73 = arith.maximumf %67, %62 : vector<64x32xf32>
    %74 = arith.maximumf %73, %72 : vector<64x32xf32>
    %c0_24 = arith.constant 0 : index
    %c0_25 = arith.constant 0 : index
    %75 = vector.load %arg4[%c0_24, %c0_25] : memref<32x16xf32, #tpu.memory_space<vmem>>, vector<32x16xf32>
    %cst_26 = arith.constant dense<0.000000e+00> : vector<64x16xf32>
    %76 = tpu.matmul %74, %75, %cst_26 {dimension_numbers = #tpu.dot_dimension_numbers<[1], [0], [0], [1], [0, 0, 1, 1], [], []>} : vector<64x32xf32>, vector<32x16xf32>, vector<64x16xf32> -> vector<64x16xf32>
    %c1_i32_27 = arith.constant 1 : i32
    %77 = tpu.dynamic_rotate %76 by %c1_i32_27 dim 1 : vector<64x16xf32>, i32 -> vector<64x16xf32>
    %cst_28 = arith.constant 0.000000e+00 : f32
    %78 = vector.shape_cast %39 : vector<1x16xi1> to vector<1x16xi1>
    %79 = vector.broadcast %78 : vector<1x16xi1> to vector<64x16xi1>
    %80 = vector.broadcast %cst_28 : f32 to vector<64x16xf32>
    %81 = arith.select %79, %80, %77 : vector<64x16xi1>, vector<64x16xf32>
    %c15_i32_29 = arith.constant 15 : i32
    %82 = tpu.dynamic_rotate %76 by %c15_i32_29 dim 1 : vector<64x16xf32>, i32 -> vector<64x16xf32>
    %cst_30 = arith.constant 0.000000e+00 : f32
    %83 = vector.shape_cast %41 : vector<1x16xi1> to vector<1x16xi1>
    %84 = vector.broadcast %83 : vector<1x16xi1> to vector<64x16xi1>
    %85 = vector.broadcast %cst_30 : f32 to vector<64x16xf32>
    %86 = arith.select %84, %85, %82 : vector<64x16xi1>, vector<64x16xf32>
    %87 = tpu.concatenate %81, %76, %86 in 0 : vector<64x16xf32>, vector<64x16xf32>, vector<64x16xf32> -> vector<192x16xf32>
    %88 = arith.truncf %87 : vector<192x16xf32> to vector<192x16xbf16>
    %c0_31 = arith.constant 0 : index
    %c0_32 = arith.constant 0 : index
    %89 = vector.load %arg5[%c0_31, %c0_32] : memref<64x192xbf16, #tpu.memory_space<vmem>>, vector<64x192xbf16>
    %cst_33 = arith.constant dense<0.000000e+00> : vector<64x16xf32>
    %90 = tpu.matmul %89, %88, %cst_33 {dimension_numbers = #tpu.dot_dimension_numbers<[1], [0], [0], [1], [0, 0, 1, 1], [], []>} : vector<64x192xbf16>, vector<192x16xbf16>, vector<64x16xf32> -> vector<64x16xf32>
    %c0_34 = arith.constant 0 : index
    %c0_35 = arith.constant 0 : index
    %91 = vector.load %arg6[%c0_34, %c0_35] : memref<64x1xf32, #tpu.memory_space<vmem>>, vector<64x1xf32>
    %92 = vector.broadcast %91 : vector<64x1xf32> to vector<64x16xf32>
    %93 = arith.addf %90, %92 : vector<64x16xf32>
    %cst_36 = arith.constant 0.000000e+00 : f32
    %94 = vector.broadcast %cst_36 : f32 to vector<64x16xf32>
    %95 = arith.maximumf %93, %94 : vector<64x16xf32>
    %c1_i32_37 = arith.constant 1 : i32
    %96 = tpu.dynamic_rotate %95 by %c1_i32_37 dim 1 : vector<64x16xf32>, i32 -> vector<64x16xf32>
    %cst_38 = arith.constant 0.000000e+00 : f32
    %97 = vector.shape_cast %39 : vector<1x16xi1> to vector<1x16xi1>
    %98 = vector.broadcast %97 : vector<1x16xi1> to vector<64x16xi1>
    %99 = vector.broadcast %cst_38 : f32 to vector<64x16xf32>
    %100 = arith.select %98, %99, %96 : vector<64x16xi1>, vector<64x16xf32>
    %c15_i32_39 = arith.constant 15 : i32
    %101 = tpu.dynamic_rotate %95 by %c15_i32_39 dim 1 : vector<64x16xf32>, i32 -> vector<64x16xf32>
    %cst_40 = arith.constant 0.000000e+00 : f32
    %102 = vector.shape_cast %41 : vector<1x16xi1> to vector<1x16xi1>
    %103 = vector.broadcast %102 : vector<1x16xi1> to vector<64x16xi1>
    %104 = vector.broadcast %cst_40 : f32 to vector<64x16xf32>
    %105 = arith.select %103, %104, %101 : vector<64x16xi1>, vector<64x16xf32>
    %106 = tpu.concatenate %100, %95, %105 in 0 : vector<64x16xf32>, vector<64x16xf32>, vector<64x16xf32> -> vector<192x16xf32>
    %107 = arith.truncf %106 : vector<192x16xf32> to vector<192x16xbf16>
    %c0_41 = arith.constant 0 : index
    %c0_42 = arith.constant 0 : index
    %108 = vector.load %arg7[%c0_41, %c0_42] : memref<64x192xbf16, #tpu.memory_space<vmem>>, vector<64x192xbf16>
    %cst_43 = arith.constant dense<0.000000e+00> : vector<64x16xf32>
    %109 = tpu.matmul %108, %107, %cst_43 {dimension_numbers = #tpu.dot_dimension_numbers<[1], [0], [0], [1], [0, 0, 1, 1], [], []>} : vector<64x192xbf16>, vector<192x16xbf16>, vector<64x16xf32> -> vector<64x16xf32>
    %c0_44 = arith.constant 0 : index
    %c0_45 = arith.constant 0 : index
    %110 = vector.load %arg8[%c0_44, %c0_45] : memref<64x1xf32, #tpu.memory_space<vmem>>, vector<64x1xf32>
    %111 = vector.broadcast %110 : vector<64x1xf32> to vector<64x16xf32>
    %112 = arith.addf %109, %111 : vector<64x16xf32>
    %113 = arith.addf %112, %76 : vector<64x16xf32>
    %cst_46 = arith.constant 0.000000e+00 : f32
    %114 = vector.broadcast %cst_46 : f32 to vector<64x16xf32>
    %115 = arith.maximumf %113, %114 : vector<64x16xf32>
    %c1_i32_47 = arith.constant 1 : i32
    %116 = tpu.dynamic_rotate %115 by %c1_i32_47 dim 1 : vector<64x16xf32>, i32 -> vector<64x16xf32>
    %cst_48 = arith.constant 0.000000e+00 : f32
    %117 = vector.shape_cast %39 : vector<1x16xi1> to vector<1x16xi1>
    %118 = vector.broadcast %117 : vector<1x16xi1> to vector<64x16xi1>
    %119 = vector.broadcast %cst_48 : f32 to vector<64x16xf32>
    %120 = arith.select %118, %119, %116 : vector<64x16xi1>, vector<64x16xf32>
    %c15_i32_49 = arith.constant 15 : i32
    %121 = tpu.dynamic_rotate %115 by %c15_i32_49 dim 1 : vector<64x16xf32>, i32 -> vector<64x16xf32>
    %cst_50 = arith.constant 0.000000e+00 : f32
    %122 = vector.shape_cast %41 : vector<1x16xi1> to vector<1x16xi1>
    %123 = vector.broadcast %122 : vector<1x16xi1> to vector<64x16xi1>
    %124 = vector.broadcast %cst_50 : f32 to vector<64x16xf32>
    %125 = arith.select %123, %124, %121 : vector<64x16xi1>, vector<64x16xf32>
    %126 = tpu.concatenate %120, %115, %125 in 0 : vector<64x16xf32>, vector<64x16xf32>, vector<64x16xf32> -> vector<192x16xf32>
    %127 = arith.truncf %126 : vector<192x16xf32> to vector<192x16xbf16>
    %c0_51 = arith.constant 0 : index
    %c0_52 = arith.constant 0 : index
    %128 = vector.load %arg9[%c0_51, %c0_52] : memref<256x192xbf16, #tpu.memory_space<vmem>>, vector<256x192xbf16>
    %cst_53 = arith.constant dense<0.000000e+00> : vector<256x16xf32>
    %129 = tpu.matmul %128, %127, %cst_53 {dimension_numbers = #tpu.dot_dimension_numbers<[1], [0], [0], [1], [0, 0, 1, 1], [], []>} : vector<256x192xbf16>, vector<192x16xbf16>, vector<256x16xf32> -> vector<256x16xf32>
    %c0_54 = arith.constant 0 : index
    %c0_55 = arith.constant 0 : index
    %130 = vector.load %arg10[%c0_54, %c0_55] : memref<256x1xf32, #tpu.memory_space<vmem>>, vector<256x1xf32>
    %131 = vector.broadcast %130 : vector<256x1xf32> to vector<256x16xf32>
    %132 = arith.addf %129, %131 : vector<256x16xf32>
    %133 = vector.extract_strided_slice %132 {offsets = [0, 0], sizes = [128, 16], strides = [1, 1]} : vector<256x16xf32> to vector<128x16xf32>
    %cst_56 = arith.constant 0.000000e+00 : f32
    %134 = vector.broadcast %cst_56 : f32 to vector<128x16xf32>
    %135 = arith.maximumf %133, %134 : vector<128x16xf32>
    %136 = vector.extract_strided_slice %132 {offsets = [128, 0], sizes = [128, 16], strides = [1, 1]} : vector<256x16xf32> to vector<128x16xf32>
    %c1_i32_57 = arith.constant 1 : i32
    %137 = tpu.dynamic_rotate %135 by %c1_i32_57 dim 1 : vector<128x16xf32>, i32 -> vector<128x16xf32>
    %cst_58 = arith.constant 0.000000e+00 : f32
    %138 = vector.shape_cast %39 : vector<1x16xi1> to vector<1x16xi1>
    %139 = vector.broadcast %138 : vector<1x16xi1> to vector<128x16xi1>
    %140 = vector.broadcast %cst_58 : f32 to vector<128x16xf32>
    %141 = arith.select %139, %140, %137 : vector<128x16xi1>, vector<128x16xf32>
    %c15_i32_59 = arith.constant 15 : i32
    %142 = tpu.dynamic_rotate %135 by %c15_i32_59 dim 1 : vector<128x16xf32>, i32 -> vector<128x16xf32>
    %cst_60 = arith.constant 0.000000e+00 : f32
    %143 = vector.shape_cast %41 : vector<1x16xi1> to vector<1x16xi1>
    %144 = vector.broadcast %143 : vector<1x16xi1> to vector<128x16xi1>
    %145 = vector.broadcast %cst_60 : f32 to vector<128x16xf32>
    %146 = arith.select %144, %145, %142 : vector<128x16xi1>, vector<128x16xf32>
    %147 = tpu.concatenate %141, %135, %146 in 0 : vector<128x16xf32>, vector<128x16xf32>, vector<128x16xf32> -> vector<384x16xf32>
    %148 = arith.truncf %147 : vector<384x16xf32> to vector<384x16xbf16>
    %c0_61 = arith.constant 0 : index
    %c0_62 = arith.constant 0 : index
    %149 = vector.load %arg11[%c0_61, %c0_62] : memref<128x384xbf16, #tpu.memory_space<vmem>>, vector<128x384xbf16>
    %cst_63 = arith.constant dense<0.000000e+00> : vector<128x16xf32>
    %150 = tpu.matmul %149, %148, %cst_63 {dimension_numbers = #tpu.dot_dimension_numbers<[1], [0], [0], [1], [0, 0, 1, 1], [], []>} : vector<128x384xbf16>, vector<384x16xbf16>, vector<128x16xf32> -> vector<128x16xf32>
    %c0_64 = arith.constant 0 : index
    %c0_65 = arith.constant 0 : index
    %151 = vector.load %arg12[%c0_64, %c0_65] : memref<128x1xf32, #tpu.memory_space<vmem>>, vector<128x1xf32>
    %152 = vector.broadcast %151 : vector<128x1xf32> to vector<128x16xf32>
    %153 = arith.addf %150, %152 : vector<128x16xf32>
    %154 = arith.addf %153, %136 : vector<128x16xf32>
    %cst_66 = arith.constant 0.000000e+00 : f32
    %155 = vector.broadcast %cst_66 : f32 to vector<128x16xf32>
    %156 = arith.maximumf %154, %155 : vector<128x16xf32>
    %c0_67 = arith.constant 0 : index
    %c0_68 = arith.constant 0 : index
    %157 = vector.load %arg13[%c0_67, %c0_68] : memref<16x4xf32, #tpu.memory_space<vmem>>, vector<16x4xf32>
    %cst_69 = arith.constant dense<0.000000e+00> : vector<128x4xf32>
    %158 = tpu.matmul %156, %157, %cst_69 {dimension_numbers = #tpu.dot_dimension_numbers<[1], [0], [0], [1], [0, 0, 1, 1], [], []>} : vector<128x16xf32>, vector<16x4xf32>, vector<128x4xf32> -> vector<128x4xf32>
    %c0_70 = arith.constant 0 : index
    %c0_71 = arith.constant 0 : index
    %c0_72 = arith.constant 0 : index
    %159 = vector.load %arg14[%c0_70, %c0_71, %c0_72] : memref<1x128x4xf32, #tpu.memory_space<vmem>>, vector<1x128x4xf32>
    %160 = vector.shape_cast %159 : vector<1x128x4xf32> to vector<128x4xf32>
    %161 = vector.shape_cast %158 : vector<128x4xf32> to vector<1x128x4xf32>
    tpu.vector_store %arg14[%c0_70, %c0_71, %c0_72], %161 {strides = array<i32>} : memref<1x128x4xf32, #tpu.memory_space<vmem>>, vector<1x128x4xf32>,
    return
  }
  func.func @transform_0(%arg0: i32) -> (i32, i32, i32) {
    %c0_i32 = arith.constant 0 : i32
    %c0_i32_0 = arith.constant 0 : i32
    %c0_i32_1 = arith.constant 0 : i32
    return %arg0, %c0_i32, %c0_i32_0 : i32, i32, i32
  }
  func.func @transform_1(%arg0: i32) -> (i32, i32) {
    %c0_i32 = arith.constant 0 : i32
    %c0_i32_0 = arith.constant 0 : i32
    %c0_i32_1 = arith.constant 0 : i32
    return %c0_i32, %c0_i32_0 : i32, i32
  }
  func.func @transform_2(%arg0: i32) -> (i32, i32) {
    %c0_i32 = arith.constant 0 : i32
    %c0_i32_0 = arith.constant 0 : i32
    %c0_i32_1 = arith.constant 0 : i32
    return %c0_i32, %c0_i32_0 : i32, i32
  }
  func.func @transform_3(%arg0: i32) -> (i32, i32) {
    %c0_i32 = arith.constant 0 : i32
    %c0_i32_0 = arith.constant 0 : i32
    %c0_i32_1 = arith.constant 0 : i32
    return %c0_i32, %c0_i32_0 : i32, i32
  }
  func.func @transform_4(%arg0: i32) -> (i32, i32) {
    %c0_i32 = arith.constant 0 : i32
    %c0_i32_0 = arith.constant 0 : i32
    %c0_i32_1 = arith.constant 0 : i32
    return %c0_i32, %c0_i32_0 : i32, i32
  }
  func.func @transform_5(%arg0: i32) -> (i32, i32) {
    %c0_i32 = arith.constant 0 : i32
    %c0_i32_0 = arith.constant 0 : i32
    %c0_i32_1 = arith.constant 0 : i32
    return %c0_i32, %c0_i32_0 : i32, i32
  }
  func.func @transform_6(%arg0: i32) -> (i32, i32) {
    %c0_i32 = arith.constant 0 : i32
    %c0_i32_0 = arith.constant 0 : i32
    %c0_i32_1 = arith.constant 0 : i32
    return %c0_i32, %c0_i32_0 : i32, i32
  }
  func.func @transform_7(%arg0: i32) -> (i32, i32) {
    %c0_i32 = arith.constant 0 : i32
    %c0_i32_0 = arith.constant 0 : i32
    %c0_i32_1 = arith.constant 0 : i32
    return %c0_i32, %c0_i32_0 : i32, i32
  }
  func.func @transform_8(%arg0: i32) -> (i32, i32) {
    %c0_i32 = arith.constant 0 : i32
    %c0_i32_0 = arith.constant 0 : i32
    %c0_i32_1 = arith.constant 0 : i32
    return %c0_i32, %c0_i32_0 : i32, i32
  }
  func.func @transform_9(%arg0: i32) -> (i32, i32) {
    %c0_i32 = arith.constant 0 : i32
    %c0_i32_0 = arith.constant 0 : i32
    %c0_i32_1 = arith.constant 0 : i32
    return %c0_i32, %c0_i32_0 : i32, i32
  }
  func.func @transform_10(%arg0: i32) -> (i32, i32) {
    %c0_i32 = arith.constant 0 : i32
    %c0_i32_0 = arith.constant 0 : i32
    %c0_i32_1 = arith.constant 0 : i32
    return %c0_i32, %c0_i32_0 : i32, i32
  }
  func.func @transform_11(%arg0: i32) -> (i32, i32) {
    %c0_i32 = arith.constant 0 : i32
    %c0_i32_0 = arith.constant 0 : i32
    %c0_i32_1 = arith.constant 0 : i32
    return %c0_i32, %c0_i32_0 : i32, i32
  }
  func.func @transform_12(%arg0: i32) -> (i32, i32) {
    %c0_i32 = arith.constant 0 : i32
    %c0_i32_0 = arith.constant 0 : i32
    %c0_i32_1 = arith.constant 0 : i32
    return %c0_i32, %c0_i32_0 : i32, i32
  }
  func.func @transform_13(%arg0: i32) -> (i32, i32, i32) {
    %c0_i32 = arith.constant 0 : i32
    %c0_i32_0 = arith.constant 0 : i32
    %c0_i32_1 = arith.constant 0 : i32
    return %arg0, %c0_i32, %c0_i32_0 : i32, i32, i32
  }
}

</mosaic_0001>

<bundles_post_ra>
// kernel: tpu_custom_call.1
= control target key start
LH: loop header
LB: loop body
LE: loop exit
PB: predicated region body
PF: predicated region fallthrough
CT: control target
= control target key end

     0   :  { %s3966_s29 = smov 32   ;;  %vm77_vm0 = vcmask 1047808   ;;  %vm191_vm1 = vcmask 392192   ;;  %s3968_s15 = smov 127   ;;  %v3969_v16 = vmov 0   ;;  %v45_v25 = vlaneseq  ;;  %s5493_s0 = inlined_call_operand.vmem [shape: f32[1,16,32], index: 0, kind: input, shape index: {}]   ;;  %s5494_s1 = inlined_call_operand.vmem [shape: bf16[64,48], index: 1, kind: input, shape index: {}]   ;;  %s5495_s2 = inlined_call_operand.vmem [shape: f32[64,1], index: 2, kind: input, shape index: {}]   ;;  %s5496_s3 = inlined_call_operand.vmem [shape: f32[32,16], index: 3, kind: input, shape index: {}]   ;;  %s5497_s5 = inlined_call_operand.vmem [shape: f32[64,1], index: 5, kind: input, shape index: {}]   ;;  %s5498_s4 = inlined_call_operand.vmem [shape: bf16[64,192], index: 4, kind: input, shape index: {}]   ;;  %s5499_s7 = inlined_call_operand.vmem [shape: f32[64,1], index: 7, kind: input, shape index: {}]   ;;  %s5500_s6 = inlined_call_operand.vmem [shape: bf16[64,192], index: 6, kind: input, shape index: {}]   ;;  %s5501_s9 = inlined_call_operand.vmem [shape: f32[256,1], index: 9, kind: input, shape index: {}]   ;;  %s5502_s8 = inlined_call_operand.vmem [shape: bf16[256,192], index: 8, kind: input, shape index: {}]   ;;  %s5503_s10 = inlined_call_operand.vmem [shape: bf16[128,384], index: 10, kind: input, shape index: {}]   ;;  %s5504_s11 = inlined_call_operand.vmem [shape: f32[128,1], index: 11, kind: input, shape index: {}]   ;;  %s5505_s12 = inlined_call_operand.vmem [shape: f32[16,4], index: 12, kind: input, shape index: {}]   ;;  %s5506_s13 = inlined_call_operand.vmem [shape: f32[1,128,4], index: 13, kind: output, shape index: {}]  }
   0x1   :  { %v75_v0 = vld [vmem:[%s5493_s0] sm:$0xff]  ;;  %v76_v1 = vld [vmem:[%s5493_s0 + $0x8] sm:$0xff]  ;;  %s3967_s0 = smov 97   ;;  %3457 = vset.pattern.permute.xlu1 %v3969_v16  ;;  %3456 = vset.pattern.permute.xlu0 %v3969_v16  ;;  %v126_v19 = vld [vmem:[%s5495_s2 + $0x18] sm:$0xff]  ;;  %vm417_vm8 = vcmask 261120   ;;  %vm547_vm9 = vcmask 1047680  }
   0x2   :  { %v3436_v2 = vpack.i.bf16 %v76_v1, %v75_v0  ;;  %v3858_v15 = vld [vmem:[%s5494_s1] sm:$0xff]   ;;  %v124_v18 = vld [vmem:[%s5495_s2 + $0x8] sm:$0xff]  ;;  %v125_v20 = vld [vmem:[%s5495_s2 + $0x10] sm:$0xff]  ;;  %v4086_v26 = vand.u32 127, %v45_v25  ;;  %v113_v34 = vpack.c.bf16 %v76_v1, %v75_v0  ;;  %vm776_vm10 = vcmask 523264  }
   0x3   :  { %3330 = vmatprep.mubr.msk.bf16.mxu0 %vm191_vm1, %v3858_v15  ;;  %v123_v17 = vld [vmem:[%s5495_s2] sm:$0xff]  ;;  %v128_v21 = vld [vmem:[%s5495_s2 + $0x28] sm:$0xff]  ;;  %v130_v23 = vld [vmem:[%s5495_s2 + $0x38] sm:$0xff]  ;;  %vm2652_vm15 = vcmask 130048  }
   0x4   :  { %3437 = vrot.lane.b32.xlu0 %v3436_v2, %s3966_s29  ;;  %v127_v22 = vld [vmem:[%s5495_s2 + $0x20] sm:$0xff]  ;;  %v129_v24 = vld [vmem:[%s5495_s2 + $0x30] sm:$0xff]  ;;  %v51_v27 = vand.u32 15, %v4086_v26  ;;  %v3859_v39 = vld [vmem:[%s5494_s1 + $0x8] sm:$0xff]  }
   0x5   :  { %v3860_v40 = vld [vmem:[%s5494_s1 + $0x10] sm:$0xff]   ;;  %v3861_v41 = vld [vmem:[%s5494_s1 + $0x18] sm:$0xff]  }
   0x6   :  { %vm4089_vm2 = vcmp.eq.s32.totalorder %v51_v27, 0  ;;  %vm4095_vm5 = vcmp.eq.s32.totalorder %v51_v27, 15 }
   0x7   :  { %vm2871_vm3 = vmneg %vm4089_vm2 }
   0x8   :  { %vm2873_vm4 = vmpackc.low %vm2871_vm3, %vm2871_vm3 }
   0x9   :  { %vm2876_vm6 = vmneg %vm4095_vm5 }
   0xa   :  { %vm2878_vm7 = vmpackc.low %vm2876_vm6, %vm2876_vm6 }
  0x76   :  { %v3438_v3 = vpop.permute.xlu0 %3437 }
  0x77   :  { %v3440_v4 = vunpack.i.h.bf16 %v3438_v3  ;;  %v3439_v5 = vunpack.i.l.bf16 %v3438_v3 }
  0x79   :  { %v80_v6 = vsel %vm77_vm0, %v3439_v5, %v75_v0  ;;  %v83_v7 = vsel %vm77_vm0, %v3440_v4, %v76_v1 }
  0x7a   :  { %v3441_v8 = vpack.i.bf16 %v83_v7, %v80_v6 }
  0x7c   :  { %3442 = vrot.lane.b32.xlu0 %v3441_v8, %s3966_s29 }
  0x80   :  { %133 = vperm.xlu0 %3456, %v123_v17  }
  0x84   :  { %148 = vperm.xlu0 %3456, %v126_v19  }
  0x88   :  { %158 = vperm.xlu0 %3456, %v128_v21  }
  0x8c   :  { %168 = vperm.xlu0 %3456, %v130_v23  }
  0xee   :  { %v3443_v9 = vpop.permute.xlu0 %3442 }
  0xef   :  { %v3445_v10 = vunpack.i.h.bf16 %v3443_v9  ;;  %v3444_v11 = vunpack.i.l.bf16 %v3443_v9 }
  0xf1   :  { %v88_v12 = vsel %vm77_vm0, %v3444_v11, %v75_v0  ;;  %v89_v13 = vsel %vm77_vm0, %v3445_v10, %v76_v1 }
  0xf2   :  { %v3446_v14 = vpack.i.bf16 %v89_v13, %v88_v12 }
  0xf4   :  { %3447 = vrot.lane.b32.xlu1 %v3446_v14, %s3967_s0 }
  0xf8   :  { %3452 = vrot.lane.b32.xlu1 %v3446_v14, %s3968_s15 }
  0xfc   :  { %138 = vperm.xlu1 %3457, %v124_v18  }
  0xff   :  { %v134_v43 = vpop.permute.xlu0 %133 }
 0x100   :  { %143 = vperm.xlu1 %3457, %v125_v20  }
 0x103   :  { %v149_v46 = vpop.permute.xlu0 %148 }
 0x104   :  { %153 = vperm.xlu1 %3457, %v127_v22  }
 0x107   :  { %v159_v57 = vpop.permute.xlu0 %158 }
 0x108   :  { %163 = vperm.xlu1 %3457, %v129_v24  }
 0x10b   :  { %v169_v5 = vpop.permute.xlu0 %168 }
 0x166   :  { %v3448_v29 = vpop.permute.xlu1 %3447 }
 0x167   :  { %v3450_v30 = vunpack.i.h.bf16 %v3448_v29  ;;  %v3449_v31 = vunpack.i.l.bf16 %v3448_v29  ;;  %v413_v29 = vld [vmem:[%s5496_s3] sm:$0xff] }
 0x169   :  { %v2874_v33 = vpack.c.bf16 %v3450_v30, %v3449_v31  ;;  %v414_v30 = vld [vmem:[%s5496_s3 + $0x8] sm:$0xff] }
 0x16a   :  { %v3453_v35 = vpop.permute.xlu1 %3452 }
 0x16b   :  { %v3455_v36 = vunpack.i.h.bf16 %v3453_v35  ;;  %v3454_v37 = vunpack.i.l.bf16 %v3453_v35  ;;  %3324 = vmatprep.subr.msk.bf16.mxu0 %vm2873_vm4, %v2874_v33  ;;  %v415_v35 = vld [vmem:[%s5496_s3 + $0x10] sm:$0xff] }
 0x16c   :  { %3325 = vmatpush3.bf16.msk.msra.mxu0 %vm2873_vm4, %v2874_v33  ;;  %v3418_v33 = vpack.c.bf16 %v414_v30, %v413_v29 }
 0x16d   :  { %3326 = vmatprep.subr.bf16.mxu0 %v113_v34  ;;  %v2879_v38 = vpack.c.bf16 %v3455_v36, %v3454_v37  ;;  %v416_v36 = vld [vmem:[%s5496_s3 + $0x18] sm:$0xff]  ;;  %s3970_s3 = smov 16  }
 0x16e   :  { %3419 = vmatprep.subr.bf16.mxu1 %v3418_v33 }
 0x16f   :  { %3421 = vmatpush3.bf16.msra.mxu1 %v3418_v33 }
 0x170   :  { %3327 = vmatpush3.bf16.msra.mxu0 %v113_v34 }
 0x171   :  { %3328 = vmatprep.subr.msk.bf16.mxu0 %vm2878_vm7, %v2879_v38 }
 0x174   :  { %3329 = vmatpush3.bf16.msk.msra.mxu0 %vm2878_vm7, %v2879_v38  ;;  %v3422_v38 = vpack.c.bf16 %v416_v36, %v415_v35 }
 0x175   :  { %1098 = vmatprep.subr.bf16.mxu0 %v3969_v16 }
 0x176   :  { %3423 = vmatprep.subr.bf16.mxu1 %v3422_v38 }
 0x177   :  { %3331 = vmatmul.mubr.msk.bf16.vlgmr.msra.gmra.mrb[0].mxu0 %vm191_vm1, %v3859_v39  ;;  %3425 = vmatpush3.bf16.msra.mxu1 %v3422_v38 }
 0x178   :  { %3334 = vmatprep.mubr.msk.bf16.mxu0 %vm191_vm1, %v3860_v40  ;;  %789 = vmatprep.subr.bf16.mxu1 %v3969_v16 }
 0x17b   :  { %v139_v42 = vpop.permute.xlu1 %138 }
 0x17f   :  { %3335 = vmatmul.mubr.msk.bf16.gmra.mrb[4].mxu0 %vm191_vm1, %v3861_v41  ;;  %v144_v44 = vpop.permute.xlu1 %143 }
 0x183   :  { %v154_v54 = vpop.permute.xlu1 %153 }
 0x187   :  { %v164_v0 = vpop.permute.xlu1 %163 }
 0x24a   :  { %v3332_v45 = vpop.f32.mrb[0].mxu0 }
 0x24b   :  { %v238_v47 = vpop.f32.mrb[1].mxu0  ;;  %v247_v51 = vadd.f32 %v3332_v45, %v144_v44 }
 0x24c   :  { %v239_v48 = vadd.f32 %v238_v47, %v134_v43  ;;  %v3333_v49 = vpop.f32.mrb[2].mxu0 }
 0x24d   :  { %v241_v50 = vpop.f32.mrb[3].mxu0  ;;  %v250_v55 = vadd.f32 %v3333_v49, %v149_v46  ;;  %v4120_v58 = vmax.f32 %v247_v51, 0.0 }
 0x24e   :  { %v4114_v52 = vmax.f32 %v239_v48, 0.0  ;;  %v242_v53 = vadd.f32 %v241_v50, %v139_v42 }
 0x24f   :  { %v4124_v61 = vmax.f32 %v250_v55, 0.0 }
 0x250   :  { %v4116_v56 = vmax.f32 %v242_v53, 0.0  ;;  %277 = vrot.lane.b32.xlu1 %v4114_v52, %s3966_s29 }
 0x252   :  { %v3336_v59 = vpop.f32.mrb[4].mxu0  ;;  %280 = vrot.lane.b32.xlu0 %v4116_v56, %s3966_s29 }
 0x253   :  { %v254_v60 = vpop.f32.mrb[5].mxu0  ;;  %v263_v2 = vadd.f32 %v3336_v59, %v164_v0 }
 0x254   :  { %v255_v62 = vadd.f32 %v254_v60, %v154_v54  ;;  %v3337_v63 = vpop.f32.mrb[6].mxu0  ;;  %283 = vrot.lane.b32.xlu1 %v4120_v58, %s3966_s29 }
 0x255   :  { %v257_v1 = vpop.f32.mrb[7].mxu0  ;;  %v266_v6 = vadd.f32 %v3337_v63, %v169_v5  ;;  %v4136_v8 = vmax.f32 %v263_v2, 0.0 }
 0x256   :  { %v4128_v3 = vmax.f32 %v255_v62, 0.0  ;;  %v258_v4 = vadd.f32 %v257_v1, %v159_v57  ;;  %286 = vrot.lane.b32.xlu0 %v4124_v61, %s3966_s29 }
 0x257   :  { %v4140_v9 = vmax.f32 %v266_v6, 0.0 }
 0x258   :  { %v4132_v7 = vmax.f32 %v258_v4, 0.0  ;;  %289 = vrot.lane.b32.xlu1 %v4128_v3, %s3966_s29 }
 0x25a   :  { %292 = vrot.lane.b32.xlu0 %v4132_v7, %s3966_s29 }
 0x25c   :  { %295 = vrot.lane.b32.xlu1 %v4136_v8, %s3966_s29 }
 0x25e   :  { %298 = vrot.lane.b32.xlu0 %v4140_v9, %s3966_s29 }
 0x2c2   :  { %v278_v10 = vpop.permute.xlu1 %277 }
 0x2c3   :  { %v279_v11 = vsel %vm77_vm0, %v278_v10, %v4114_v52 }
 0x2c4   :  { %v281_v12 = vpop.permute.xlu0 %280  ;;  %301 = vrot.lane.b32.xlu1 %v279_v11, %s3966_s29 }
 0x2c5   :  { %v282_v13 = vsel %vm77_vm0, %v281_v12, %v4116_v56 }
 0x2c6   :  { %303 = vrot.lane.b32.xlu0 %v282_v13, %s3966_s29  ;;  %v284_v14 = vpop.permute.xlu1 %283 }
 0x2c7   :  { %v285_v15 = vsel %vm77_vm0, %v284_v14, %v4120_v58 }
 0x2c8   :  { %v287_v17 = vpop.permute.xlu0 %286  ;;  %305 = vrot.lane.b32.xlu1 %v285_v15, %s3966_s29 }
 0x2c9   :  { %v288_v18 = vsel %vm77_vm0, %v287_v17, %v4124_v61 }
 0x2ca   :  { %307 = vrot.lane.b32.xlu0 %v288_v18, %s3966_s29  ;;  %v290_v19 = vpop.permute.xlu1 %289 }
 0x2cb   :  { %v291_v20 = vsel %vm77_vm0, %v290_v19, %v4128_v3 }
 0x2cc   :  { %v293_v21 = vpop.permute.xlu0 %292  ;;  %309 = vrot.lane.b32.xlu1 %v291_v20, %s3966_s29 }
 0x2cd   :  { %v294_v22 = vsel %vm77_vm0, %v293_v21, %v4132_v7 }
 0x2ce   :  { %311 = vrot.lane.b32.xlu0 %v294_v22, %s3966_s29  ;;  %v296_v23 = vpop.permute.xlu1 %295 }
 0x2cf   :  { %v297_v24 = vsel %vm77_vm0, %v296_v23, %v4136_v8 }
 0x2d0   :  { %v299_v25 = vpop.permute.xlu0 %298  ;;  %313 = vrot.lane.b32.xlu1 %v297_v24, %s3966_s29 }
 0x2d1   :  { %v300_v27 = vsel %vm77_vm0, %v299_v25, %v4140_v9 }
 0x2d2   :  { %315 = vrot.lane.b32.xlu0 %v300_v27, %s3966_s29  ;;  %s3971_s29 = smov 113  }
 0x336   :  { %v302_v31 = vpop.permute.xlu1 %301 }
 0x337   :  { %v317_v43 = vsel %vm77_vm0, %v302_v31, %v4114_v52 }
 0x338   :  { %v304_v34 = vpop.permute.xlu0 %303 }
 0x339   :  { %v318_v45 = vsel %vm77_vm0, %v304_v34, %v4116_v56 }
 0x33a   :  { %v306_v37 = vpop.permute.xlu1 %305 }
 0x33b   :  { %v319_v39 = vsel %vm77_vm0, %v306_v37, %v4120_v58 }
 0x33c   :  { %v308_v40 = vpop.permute.xlu0 %307  ;;  %337 = vrot.lane.b32.xlu1 %v319_v39, %s3967_s0 }
 0x33d   :  { %v320_v41 = vsel %vm77_vm0, %v308_v40, %v4124_v61 }
 0x33e   :  { %339 = vrot.lane.b32.xlu0 %v320_v41, %s3967_s0  ;;  %v310_v42 = vpop.permute.xlu1 %309 }
 0x33f   :  { %v321_v50 = vsel %vm77_vm0, %v310_v42, %v4128_v3 }
 0x340   :  { %369 = vrot.lane.b32.xlu1 %v319_v39, %s3968_s15  ;;  %v312_v44 = vpop.permute.xlu0 %311 }
 0x341   :  { %v322_v51 = vsel %vm77_vm0, %v312_v44, %v4132_v7 }
 0x342   :  { %371 = vrot.lane.b32.xlu0 %v320_v41, %s3968_s15  ;;  %v314_v46 = vpop.permute.xlu1 %313 }
 0x343   :  { %v323_v48 = vsel %vm77_vm0, %v314_v46, %v4136_v8 }
 0x344   :  { %333 = vrot.lane.b32.xlu1 %v317_v43, %s3967_s0  ;;  %v316_v47 = vpop.permute.xlu0 %315 }
 0x345   :  { %v324_v49 = vsel %vm77_vm0, %v316_v47, %v4140_v9  ;;  %vm2846_vm0 = vcmask 31744  }
 0x346   :  { %335 = vrot.lane.b32.xlu0 %v318_v45, %s3967_s0 }
 0x348   :  { %365 = vrot.lane.b32.xlu1 %v317_v43, %s3968_s15 }
 0x34a   :  { %367 = vrot.lane.b32.xlu0 %v318_v45, %s3968_s15 }
 0x34c   :  { %345 = vrot.lane.b32.xlu1 %v323_v48, %s3967_s0 }
 0x34e   :  { %347 = vrot.lane.b32.xlu0 %v324_v49, %s3967_s0 }
 0x350   :  { %341 = vrot.lane.b32.xlu1 %v321_v50, %s3967_s0 }
 0x352   :  { %343 = vrot.lane.b32.xlu0 %v322_v51, %s3967_s0 }
 0x354   :  { %373 = vrot.lane.b32.xlu1 %v321_v50, %s3968_s15 }
 0x356   :  { %375 = vrot.lane.b32.xlu0 %v322_v51, %s3968_s15 }
 0x358   :  { %377 = vrot.lane.b32.xlu1 %v323_v48, %s3968_s15 }
 0x35a   :  { %379 = vrot.lane.b32.xlu0 %v324_v49, %s3968_s15 }
 0x3ae   :  { %v338_v53 = vpop.permute.xlu1 %337 }
 0x3af   :  { %v359_v0 = vsel %vm4089_vm2, 0.0, %v338_v53 }
 0x3b0   :  { %v340_v54 = vpop.permute.xlu0 %339  ;;  %v399_v12 = vmax.f32 %v359_v0, %v4120_v58 }
 0x3b1   :  { %v360_v13 = vsel %vm4089_vm2, 0.0, %v340_v54 }
 0x3b2   :  { %v370_v55 = vpop.permute.xlu1 %369 }
 0x3b3   :  { %v391_v5 = vsel %vm4095_vm5, 0.0, %v370_v55 }
 0x3b4   :  { %v372_v57 = vpop.permute.xlu0 %371  ;;  %v407_v17 = vmax.f32 %v399_v12, %v391_v5 }
 0x3b5   :  { %v392_v18 = vsel %vm4095_vm5, 0.0, %v372_v57 }
 0x3b6   :  { %v334_v59 = vpop.permute.xlu1 %333 }
 0x3b7   :  { %v357_v60 = vsel %vm4089_vm2, 0.0, %v334_v59 }
 0x3b8   :  { %v336_v62 = vpop.permute.xlu0 %335  ;;  %v397_v1 = vmax.f32 %v357_v60, %v4114_v52 }
 0x3b9   :  { %v358_v63 = vsel %vm4089_vm2, 0.0, %v336_v62 }
 0x3ba   :  { %v366_v2 = vpop.permute.xlu1 %365  ;;  %v398_v6 = vmax.f32 %v358_v63, %v4116_v56  ;;  %v400_v56 = vmax.f32 %v360_v13, %v4124_v61 }
 0x3bb   :  { %v389_v4 = vsel %vm4095_vm5, 0.0, %v366_v2 }
 0x3bc   :  { %v368_v10 = vpop.permute.xlu0 %367  ;;  %v405_v11 = vmax.f32 %v397_v1, %v389_v4  ;;  %v408_v58 = vmax.f32 %v400_v56, %v392_v18 }
 0x3bd   :  { %v390_v52 = vsel %vm4095_vm5, 0.0, %v368_v10 }
 0x3be   :  { %v406_v14 = vmax.f32 %v398_v6, %v390_v52  ;;  %3346 = vmatprep.mubr.msk.f32.mxu1 %vm417_vm8, %v405_v11  ;;  %v346_v15 = vpop.permute.xlu1 %345 }
 0x3bf   :  { %v363_v61 = vsel %vm4089_vm2, 0.0, %v346_v15 }
 0x3c0   :  { %v348_v19 = vpop.permute.xlu0 %347  ;;  %3347 = vmatmul.mubr.msk.f32.vlgmr.msra.gmra.mrb[0].mxu1 %vm417_vm8, %v406_v14  ;;  %v403_v35 = vmax.f32 %v363_v61, %v4136_v8 }
 0x3c1   :  { %3349 = vmatprep.mubr.msk.f32.mxu1 %vm417_vm8, %v407_v17  ;;  %v364_v33 = vsel %vm4089_vm2, 0.0, %v348_v19 }
 0x3c2   :  { %v342_v20 = vpop.permute.xlu1 %341  ;;  %v404_v38 = vmax.f32 %v364_v33, %v4140_v9 }
 0x3c3   :  { %v361_v21 = vsel %vm4089_vm2, 0.0, %v342_v20 }
 0x3c4   :  { %v344_v22 = vpop.permute.xlu0 %343  ;;  %3350 = vmatmul.mubr.msk.f32.gmra.mrb[2].mxu1 %vm417_vm8, %v408_v58  ;;  %v401_v24 = vmax.f32 %v361_v21, %v4128_v3 }
 0x3c5   :  { %v362_v23 = vsel %vm4089_vm2, 0.0, %v344_v22 }
 0x3c6   :  { %v374_v25 = vpop.permute.xlu1 %373  ;;  %v402_v29 = vmax.f32 %v362_v23, %v4132_v7 }
 0x3c7   :  { %v393_v27 = vsel %vm4095_vm5, 0.0, %v374_v25 }
 0x3c8   :  { %v409_v30 = vmax.f32 %v401_v24, %v393_v27  ;;  %v376_v31 = vpop.permute.xlu0 %375 }
 0x3c9   :  { %v394_v34 = vsel %vm4095_vm5, 0.0, %v376_v31 }
 0x3ca   :  { %v410_v3 = vmax.f32 %v402_v29, %v394_v34  ;;  %3352 = vmatprep.mubr.msk.f32.mxu1 %vm417_vm8, %v409_v30  ;;  %v378_v36 = vpop.permute.xlu1 %377 }
 0x3cb   :  { %v395_v37 = vsel %vm4095_vm5, 0.0, %v378_v36 }
 0x3cc   :  { %v411_v7 = vmax.f32 %v403_v35, %v395_v37  ;;  %v380_v39 = vpop.permute.xlu0 %379  ;;  %3353 = vmatmul.mubr.msk.f32.gmra.mrb[4].mxu1 %vm417_vm8, %v410_v3 }
 0x3cd   :  { %v396_v28 = vsel %vm4095_vm5, 0.0, %v380_v39 }
 0x3ce   :  { %v412_v40 = vmax.f32 %v404_v38, %v396_v28  ;;  %3355 = vmatprep.mubr.msk.f32.mxu1 %vm417_vm8, %v411_v7 }
 0x3d0   :  { %3356 = vmatmul.mubr.msk.f32.gmra.mrb[6].mxu1 %vm417_vm8, %v412_v40 }
 0x493   :  { %v4263_v8 = vpop.f32.mrb[0].mxu1 }
 0x494   :  { %v4265_v41 = vpop.f32.mrb[1].mxu1 }
 0x495   :  { %v3458_v42 = vpack.i.bf16 %v4263_v8, %v4265_v41  ;;  %v676_v9 = vpack.c.bf16 %v4263_v8, %v4265_v41 }
 0x497   :  { %3459 = vrot.lane.b32.xlu1 %v3458_v42, %s3970_s3  ;;  %v4272_v32 = vpop.f32.mrb[2].mxu1 }
 0x498   :  { %v4274_v43 = vpop.f32.mrb[3].mxu1 }
 0x499   :  { %v3463_v44 = vpack.i.bf16 %v4272_v32, %v4274_v43  ;;  %v677_v45 = vpack.c.bf16 %v4272_v32, %v4274_v43 }
 0x49b   :  { %3464 = vrot.lane.b32.xlu0 %v3463_v44, %s3970_s3 }
 0x49f   :  { %v4281_v46 = vpop.f32.mrb[4].mxu1 }
 0x4a0   :  { %v4283_v47 = vpop.f32.mrb[5].mxu1 }
 0x4a1   :  { %v3468_v48 = vpack.i.bf16 %v4281_v46, %v4283_v47  ;;  %v678_v49 = vpack.c.bf16 %v4281_v46, %v4283_v47 }
 0x4a3   :  { %3469 = vrot.lane.b32.xlu1 %v3468_v48, %s3970_s3  ;;  %v4290_v50 = vpop.f32.mrb[6].mxu1  ;;  %v692_v48 = vld [vmem:[%s5497_s5] sm:$0xff] }
 0x4a4   :  { %v4292_v51 = vpop.f32.mrb[7].mxu1 }
 0x4a5   :  { %v3473_v53 = vpack.i.bf16 %v4290_v50, %v4292_v51  ;;  %v679_v54 = vpack.c.bf16 %v4290_v50, %v4292_v51 }
 0x4a7   :  { %3474 = vrot.lane.b32.xlu0 %v3473_v53, %s3970_s3  ;;  %v693_v53 = vld [vmem:[%s5497_s5 + $0x8] sm:$0xff] }
 0x509   :  { %v3460_v55 = vpop.permute.xlu1 %3459 }
 0x50a   :  { %v3462_v57 = vunpack.i.h.bf16 %v3460_v55  ;;  %v3461_v59 = vunpack.i.l.bf16 %v3460_v55  ;;  %v694_v55 = vld [vmem:[%s5497_s5 + $0x10] sm:$0xff] }
 0x50c   :  { %v550_v60 = vsel %vm547_vm9, %v3461_v59, %v4265_v41  ;;  %v553_v62 = vsel %vm547_vm9, %v3462_v57, %v4263_v8  ;;  %v695_v57 = vld [vmem:[%s5497_s5 + $0x18] sm:$0xff]  ;;  %v696_v59 = vld [vmem:[%s5497_s5 + $0x20] sm:$0xff] }
 0x50d   :  { %v3465_v63 = vpop.permute.xlu0 %3464  ;;  %v3478_v0 = vpack.i.bf16 %v553_v62, %v550_v60  ;;  %v697_v60 = vld [vmem:[%s5497_s5 + $0x28] sm:$0xff]  ;;  %v698_v62 = vld [vmem:[%s5497_s5 + $0x30] sm:$0xff] }
 0x50e   :  { %v3467_v1 = vunpack.i.h.bf16 %v3465_v63  ;;  %v3466_v2 = vunpack.i.l.bf16 %v3465_v63  ;;  %v699_v63 = vld [vmem:[%s5497_s5 + $0x38] sm:$0xff] }
 0x50f   :  { %3479 = vrot.lane.b32.xlu1 %v3478_v0, %s3970_s3  ;;  %v3864_v0 = vld [vmem:[%s5498_s4 + $0x4] ss:$8 sps:$4 sm:$0xff]  }
 0x510   :  { %v556_v4 = vsel %vm547_vm9, %v3466_v2, %v4274_v43  ;;  %v559_v5 = vsel %vm547_vm9, %v3467_v1, %v4272_v32  ;;  %2941 = vmatprep.mubr.msk.bf16.mxu1 %vm776_vm10, %v3864_v0  ;;  %v65_v1 = vand.u32 7, %v4086_v26 }
 0x511   :  { %v3483_v6 = vpack.i.bf16 %v559_v5, %v556_v4 }
 0x512   :  { %vm3205_vm11 = vcmp.ne.s32.totalorder %v65_v1, 0  ;;  %vm3206_vm13 = vcmp.ne.s32.totalorder %v65_v1, 7 }
 0x513   :  { %3484 = vrot.lane.b32.xlu0 %v3483_v6, %s3970_s3  ;;  %vm4372_vm12 = vmpackc.low %vm3205_vm11, %vm3205_vm11 }
 0x514   :  { %vm4403_vm14 = vmpackc.low %vm3206_vm13, %vm3206_vm13 }
 0x515   :  { %v3470_v10 = vpop.permute.xlu1 %3469 }
 0x516   :  { %v3472_v11 = vunpack.i.h.bf16 %v3470_v10  ;;  %v3471_v12 = vunpack.i.l.bf16 %v3470_v10 }
 0x518   :  { %v562_v13 = vsel %vm547_vm9, %v3471_v12, %v4283_v47  ;;  %v565_v52 = vsel %vm547_vm9, %v3472_v11, %v4281_v46 }
 0x519   :  { %v3475_v14 = vpop.permute.xlu0 %3474  ;;  %v3488_v15 = vpack.i.bf16 %v565_v52, %v562_v13 }
 0x51a   :  { %v3477_v17 = vunpack.i.h.bf16 %v3475_v14  ;;  %v3476_v18 = vunpack.i.l.bf16 %v3475_v14 }
 0x51b   :  { %3489 = vrot.lane.b32.xlu1 %v3488_v15, %s3970_s3 }
 0x51c   :  { %v568_v56 = vsel %vm547_vm9, %v3476_v18, %v4292_v51  ;;  %v571_v19 = vsel %vm547_vm9, %v3477_v17, %v4290_v50 }
 0x51d   :  { %v3493_v58 = vpack.i.bf16 %v571_v19, %v568_v56 }
 0x51f   :  { %3494 = vrot.lane.b32.xlu0 %v3493_v58, %s3970_s3 }
 0x581   :  { %v3480_v20 = vpop.permute.xlu1 %3479 }
 0x582   :  { %v3482_v21 = vunpack.i.h.bf16 %v3480_v20  ;;  %v3481_v22 = vunpack.i.l.bf16 %v3480_v20 }
 0x584   :  { %v588_v23 = vsel %vm547_vm9, %v3481_v22, %v4265_v41  ;;  %v589_v24 = vsel %vm547_vm9, %v3482_v21, %v4263_v8 }
 0x585   :  { %v3485_v25 = vpop.permute.xlu0 %3484  ;;  %v3498_v61 = vpack.i.bf16 %v589_v24, %v588_v23 }
 0x586   :  { %v3487_v27 = vunpack.i.h.bf16 %v3485_v25  ;;  %v3486_v29 = vunpack.i.l.bf16 %v3485_v25 }
 0x587   :  { %3499 = vrot.lane.b32.xlu1 %v3498_v61, %s3971_s29 }
 0x588   :  { %v590_v30 = vsel %vm547_vm9, %v3486_v29, %v4274_v43  ;;  %v591_v31 = vsel %vm547_vm9, %v3487_v27, %v4272_v32 }
 0x589   :  { %v3503_v33 = vpack.i.bf16 %v591_v31, %v590_v30 }
 0x58b   :  { %3504 = vrot.lane.b32.xlu0 %v3503_v33, %s3971_s29 }
 0x58d   :  { %v3490_v34 = vpop.permute.xlu1 %3489 }
 0x58e   :  { %v3492_v35 = vunpack.i.h.bf16 %v3490_v34  ;;  %v3491_v3 = vunpack.i.l.bf16 %v3490_v34 }
 0x590   :  { %v592_v36 = vsel %vm547_vm9, %v3491_v3, %v4283_v47  ;;  %v593_v37 = vsel %vm547_vm9, %v3492_v35, %v4281_v46  ;;  %v3862_v35 = vld [vmem:[%s5498_s4] ss:$8 sps:$4 sm:$0xff]   ;;  %v3865_v3 = vld [vmem:[%s5498_s4 + $0x14] ss:$8 sps:$4 sm:$0xff]  }
 0x591   :  { %v3495_v38 = vpop.permute.xlu0 %3494  ;;  %v3508_v7 = vpack.i.bf16 %v593_v37, %v592_v36  ;;  %v3867_v36 = vld [vmem:[%s5498_s4 + $0x10] ss:$8 sps:$4 sm:$0xff]   ;;  %v3868_v37 = vld [vmem:[%s5498_s4 + $0x24] ss:$8 sps:$4 sm:$0xff]  }
 0x592   :  { %v3497_v39 = vunpack.i.h.bf16 %v3495_v38  ;;  %v3496_v28 = vunpack.i.l.bf16 %v3495_v38  ;;  %v3870_v38 = vld [vmem:[%s5498_s4 + $0x20] ss:$8 sps:$4 sm:$0xff]  }
 0x593   :  { %3509 = vrot.lane.b32.xlu1 %v3508_v7, %s3971_s29 }
 0x594   :  { %v594_v40 = vsel %vm547_vm9, %v3496_v28, %v4292_v51  ;;  %v595_v42 = vsel %vm547_vm9, %v3497_v39, %v4290_v50  ;;  %v3873_v39 = vld [vmem:[%s5498_s4 + $0x30] ss:$8 sps:$4 sm:$0xff]  }
 0x595   :  { %v3513_v44 = vpack.i.bf16 %v595_v42, %v594_v40 }
 0x597   :  { %3514 = vrot.lane.b32.xlu0 %v3513_v44, %s3971_s29  ;;  %3519 = vrot.lane.b32.xlu1 %v3498_v61, %s3968_s15 }
 0x59b   :  { %3524 = vrot.lane.b32.xlu0 %v3503_v33, %s3968_s15  ;;  %3529 = vrot.lane.b32.xlu1 %v3508_v7, %s3968_s15  ;;  %v3871_v7 = vld [vmem:[%s5498_s4 + $0x34] ss:$8 sps:$4 sm:$0xff]  }
 0x59f   :  { %3534 = vrot.lane.b32.xlu0 %v3513_v44, %s3968_s15  ;;  %702 = vperm.xlu1 %3457, %v692_v48  }
 0x5a3   :  { %707 = vperm.xlu0 %3456, %v693_v53   ;;  %712 = vperm.xlu1 %3457, %v694_v55  }
 0x5a7   :  { %717 = vperm.xlu0 %3456, %v695_v57   ;;  %722 = vperm.xlu1 %3457, %v696_v59  }
 0x5ab   :  { %727 = vperm.xlu0 %3456, %v697_v60   ;;  %732 = vperm.xlu1 %3457, %v698_v62  }
 0x5af   :  { %737 = vperm.xlu0 %3456, %v699_v63  }
 0x5f9   :  { %v3500_v2 = vpop.permute.xlu1 %3499 }
 0x5fa   :  { %v3502_v4 = vunpack.i.h.bf16 %v3500_v2  ;;  %v3501_v5 = vunpack.i.l.bf16 %v3500_v2 }
 0x5fc   :  { %v2904_v10 = vpack.c.bf16 %v3502_v4, %v3501_v5 }
 0x5fd   :  { %v3505_v11 = vpop.permute.xlu0 %3504 }
 0x5fe   :  { %v3507_v12 = vunpack.i.h.bf16 %v3505_v11  ;;  %v3506_v13 = vunpack.i.l.bf16 %v3505_v11  ;;  %2905 = vmatpush1.bf16.msk.msra.mxu1 %vm4372_vm12, %v2904_v10 }
 0x5ff   :  { %791 = vmatprep.subr.bf16.mxu1 %v3969_v16 }
 0x600   :  { %v2909_v52 = vpack.c.bf16 %v3507_v12, %v3506_v13 }
 0x602   :  { %2910 = vmatpush1.bf16.msk.msra.mxu1 %vm4372_vm12, %v2909_v52 }
 0x603   :  { %793 = vmatprep.subr.bf16.mxu1 %v3969_v16 }
 0x605   :  { %v3510_v26 = vpop.permute.xlu1 %3509 }
 0x606   :  { %v3512_v14 = vunpack.i.h.bf16 %v3510_v26  ;;  %v3511_v15 = vunpack.i.l.bf16 %v3510_v26 }
 0x608   :  { %v2914_v17 = vpack.c.bf16 %v3512_v14, %v3511_v15 }
 0x609   :  { %v3515_v18 = vpop.permute.xlu0 %3514  ;;  %v3520_v20 = vpop.permute.xlu1 %3519 }
 0x60a   :  { %v3517_v56 = vunpack.i.h.bf16 %v3515_v18  ;;  %v3516_v19 = vunpack.i.l.bf16 %v3515_v18  ;;  %2915 = vmatpush1.bf16.msk.msra.mxu1 %vm4372_vm12, %v2914_v17  ;;  %v3522_v21 = vunpack.i.h.bf16 %v3520_v20  ;;  %v3521_v22 = vunpack.i.l.bf16 %v3520_v20 }
 0x60b   :  { %795 = vmatprep.subr.bf16.mxu1 %v3969_v16 }
 0x60c   :  { %v2919_v58 = vpack.c.bf16 %v3517_v56, %v3516_v19 }
 0x60d   :  { %v3525_v23 = vpop.permute.xlu0 %3524 }
 0x60e   :  { %2920 = vmatpush1.bf16.msk.msra.mxu1 %vm4372_vm12, %v2919_v58  ;;  %v3527_v24 = vunpack.i.h.bf16 %v3525_v23  ;;  %v3526_v25 = vunpack.i.l.bf16 %v3525_v23 }
 0x60f   :  { %797 = vmatprep.subr.bf16.mxu1 %v3969_v16 }
 0x610   :  { %v2929_v61 = vpack.c.bf16 %v3527_v24, %v3526_v25 }
 0x611   :  { %v3535_v30 = vpop.permute.xlu0 %3534 }
 0x612   :  { %798 = vmatpush1.bf16.msra.mxu1 %v676_v9  ;;  %v3537_v31 = vunpack.i.h.bf16 %v3535_v30  ;;  %v3536_v33 = vunpack.i.l.bf16 %v3535_v30  ;;  %v3954_v9 = vld [vmem:[%s5503_s10 + $0x90] ss:$12 sps:$4 sm:$0xff]  }
 0x613   :  { %799 = vmatprep.subr.bf16.mxu1 %v3969_v16 }
 0x614   :  { %v2939_v34 = vpack.c.bf16 %v3537_v31, %v3536_v33 }
 0x616   :  { %800 = vmatpush1.bf16.msra.mxu1 %v677_v45  ;;  %v2924_v45 = vpack.c.bf16 %v3522_v21, %v3521_v22 }
 0x617   :  { %801 = vmatprep.subr.bf16.mxu1 %v3969_v16 }
 0x61a   :  { %802 = vmatpush1.bf16.msra.mxu1 %v678_v49  ;;  %v3530_v49 = vpop.permute.xlu1 %3529 }
 0x61b   :  { %803 = vmatprep.subr.bf16.mxu1 %v3969_v16  ;;  %v3532_v27 = vunpack.i.h.bf16 %v3530_v49  ;;  %v3531_v29 = vunpack.i.l.bf16 %v3530_v49 }
 0x61e   :  { %804 = vmatpush1.bf16.msra.mxu1 %v679_v54  ;;  %v2934_v54 = vpack.c.bf16 %v3532_v27, %v3531_v29  ;;  %v703_v28 = vpop.permute.xlu1 %702 }
 0x61f   :  { %805 = vmatprep.subr.bf16.mxu1 %v3969_v16 }
 0x622   :  { %2925 = vmatpush1.bf16.msk.msra.mxu1 %vm4403_vm14, %v2924_v45  ;;  %v708_v48 = vpop.permute.xlu0 %707  ;;  %v713_v63 = vpop.permute.xlu1 %712 }
 0x623   :  { %807 = vmatprep.subr.bf16.mxu1 %v3969_v16 }
 0x626   :  { %2930 = vmatpush1.bf16.msk.msra.mxu1 %vm4403_vm14, %v2929_v61  ;;  %v718_v4 = vpop.permute.xlu0 %717  ;;  %v723_v26 = vpop.permute.xlu1 %722 }
 0x627   :  { %809 = vmatprep.subr.bf16.mxu1 %v3969_v16 }
 0x62a   :  { %2935 = vmatpush1.bf16.msk.msra.mxu1 %vm4403_vm14, %v2934_v54  ;;  %v728_v18 = vpop.permute.xlu0 %727  ;;  %v733_v23 = vpop.permute.xlu1 %732 }
 0x62b   :  { %811 = vmatprep.subr.bf16.mxu1 %v3969_v16 }
 0x62e   :  { %2940 = vmatpush1.bf16.msk.msra.mxu1 %vm4403_vm14, %v2939_v34  ;;  %v738_v49 = vpop.permute.xlu0 %737 }
 0x62f   :  { %1727 = vmatprep.subr.bf16.mxu1 %v3969_v16 }
 0x631   :  { %822 = vmatmul.mubr.bf16.vlgmr.msra.gmra.mrb[8].mxu1 %v3862_v35 }
 0x632   :  { %2942 = vmatprep.mubr.msk.bf16.mxu1 %vm776_vm10, %v3865_v3 }
 0x639   :  { %830 = vmatmul.mubr.bf16.gmra.mrb[12].mxu1 %v3867_v36 }
 0x63a   :  { %2943 = vmatprep.mubr.msk.bf16.mxu1 %vm776_vm10, %v3868_v37 }
 0x641   :  { %838 = vmatmul.mubr.bf16.gmra.mrb[16].mxu1 %v3870_v38 }
 0x642   :  { %2944 = vmatprep.mubr.msk.bf16.mxu1 %vm776_vm10, %v3871_v7 }
 0x649   :  { %846 = vmatmul.mubr.bf16.gmra.mrb[20].mxu1 %v3873_v39 }
 0x704   :  { %v823_v40 = vpop.f32.mrb[8].mxu1 }
 0x705   :  { %v824_v42 = vadd.f32 %v823_v40, %v703_v28  ;;  %v825_v44 = vpop.f32.mrb[9].mxu1 }
 0x706   :  { %v826_v53 = vpop.f32.mrb[10].mxu1 }
 0x707   :  { %v827_v55 = vadd.f32 %v826_v53, %v708_v48  ;;  %v828_v57 = vpop.f32.mrb[11].mxu1  ;;  %v4444_v59 = vmax.f32 %v824_v42, 0.0 }
 0x709   :  { %v4446_v60 = vmax.f32 %v827_v55, 0.0 }
 0x70b   :  { %v3538_v62 = vpack.i.bf16 %v4446_v60, %v4444_v59 }
 0x70c   :  { %v831_v0 = vpop.f32.mrb[12].mxu1 }
 0x70d   :  { %v832_v1 = vadd.f32 %v831_v0, %v713_v63  ;;  %v833_v2 = vpop.f32.mrb[13].mxu1  ;;  %3539 = vrot.lane.b32.xlu1 %v3538_v62, %s3970_s3 }
 0x70e   :  { %v834_v5 = vpop.f32.mrb[14].mxu1 }
 0x70f   :  { %v835_v10 = vadd.f32 %v834_v5, %v718_v4  ;;  %v836_v11 = vpop.f32.mrb[15].mxu1  ;;  %v4451_v12 = vmax.f32 %v832_v1, 0.0 }
 0x711   :  { %v4453_v13 = vmax.f32 %v835_v10, 0.0 }
 0x713   :  { %v3543_v52 = vpack.i.bf16 %v4453_v13, %v4451_v12 }
 0x714   :  { %v839_v14 = vpop.f32.mrb[16].mxu1 }
 0x715   :  { %v840_v15 = vadd.f32 %v839_v14, %v723_v26  ;;  %v841_v17 = vpop.f32.mrb[17].mxu1  ;;  %3544 = vrot.lane.b32.xlu0 %v3543_v52, %s3970_s3 }
 0x716   :  { %v842_v56 = vpop.f32.mrb[18].mxu1 }
 0x717   :  { %v843_v19 = vadd.f32 %v842_v56, %v728_v18  ;;  %v844_v58 = vpop.f32.mrb[19].mxu1  ;;  %v4458_v20 = vmax.f32 %v840_v15, 0.0 }
 0x719   :  { %v4460_v21 = vmax.f32 %v843_v19, 0.0 }
 0x71b   :  { %v3548_v22 = vpack.i.bf16 %v4460_v21, %v4458_v20 }
 0x71c   :  { %v847_v45 = vpop.f32.mrb[20].mxu1 }
 0x71d   :  { %v848_v24 = vadd.f32 %v847_v45, %v733_v23  ;;  %v849_v25 = vpop.f32.mrb[21].mxu1  ;;  %3549 = vrot.lane.b32.xlu1 %v3548_v22, %s3970_s3 }
 0x71e   :  { %v850_v61 = vpop.f32.mrb[22].mxu1 }
 0x71f   :  { %v851_v27 = vadd.f32 %v850_v61, %v738_v49  ;;  %v852_v29 = vpop.f32.mrb[23].mxu1  ;;  %v4465_v30 = vmax.f32 %v848_v24, 0.0 }
 0x721   :  { %v4467_v54 = vmax.f32 %v851_v27, 0.0 }
 0x723   :  { %v3553_v31 = vpack.i.bf16 %v4467_v54, %v4465_v30 }
 0x725   :  { %3554 = vrot.lane.b32.xlu0 %v3553_v31, %s3970_s3 }
 0x77f   :  { %v3540_v33 = vpop.permute.xlu1 %3539 }
 0x780   :  { %v3542_v34 = vunpack.i.h.bf16 %v3540_v33  ;;  %v3541_v35 = vunpack.i.l.bf16 %v3540_v33 }
 0x782   :  { %v864_v3 = vsel %vm547_vm9, %v3541_v35, %v4444_v59  ;;  %v867_v36 = vsel %vm547_vm9, %v3542_v34, %v4446_v60 }
 0x783   :  { %v3558_v37 = vpack.i.bf16 %v867_v36, %v864_v3  ;;  %v1002_v3 = vld [vmem:[%s5499_s7] sm:$0xff]  ;;  %v1004_v36 = vld [vmem:[%s5499_s7 + $0x10] sm:$0xff] }
 0x785   :  { %3559 = vrot.lane.b32.xlu1 %v3558_v37, %s3970_s3  ;;  %v1003_v37 = vld [vmem:[%s5499_s7 + $0x8] sm:$0xff] }
 0x787   :  { %v3545_v38 = vpop.permute.xlu0 %3544 }
 0x788   :  { %v3547_v7 = vunpack.i.h.bf16 %v3545_v38  ;;  %v3546_v39 = vunpack.i.l.bf16 %v3545_v38  ;;  %v1006_v38 = vld [vmem:[%s5499_s7 + $0x20] sm:$0xff] }
 0x78a   :  { %v870_v28 = vsel %vm547_vm9, %v3546_v39, %v4451_v12  ;;  %v873_v40 = vsel %vm547_vm9, %v3547_v7, %v4453_v13  ;;  %v1005_v7 = vld [vmem:[%s5499_s7 + $0x18] sm:$0xff]  ;;  %v1008_v39 = vld [vmem:[%s5499_s7 + $0x30] sm:$0xff] }
 0x78b   :  { %v3563_v42 = vpack.i.bf16 %v873_v40, %v870_v28  ;;  %v1007_v28 = vld [vmem:[%s5499_s7 + $0x28] sm:$0xff]  ;;  %v1009_v40 = vld [vmem:[%s5499_s7 + $0x38] sm:$0xff] }
 0x78d   :  { %3564 = vrot.lane.b32.xlu0 %v3563_v42, %s3970_s3  ;;  %v3876_v42 = vld [vmem:[%s5500_s6 + $0x4] ss:$8 sps:$4 sm:$0xff]  }
 0x78e   :  { %2993 = vmatprep.mubr.msk.bf16.mxu0 %vm776_vm10, %v3876_v42 }
 0x78f   :  { %v3550_v44 = vpop.permute.xlu1 %3549 }
 0x790   :  { %v3552_v48 = vunpack.i.h.bf16 %v3550_v44  ;;  %v3551_v53 = vunpack.i.l.bf16 %v3550_v44 }
 0x792   :  { %v876_v55 = vsel %vm547_vm9, %v3551_v53, %v4458_v20  ;;  %v879_v57 = vsel %vm547_vm9, %v3552_v48, %v4460_v21 }
 0x793   :  { %v3568_v62 = vpack.i.bf16 %v879_v57, %v876_v55 }
 0x795   :  { %3569 = vrot.lane.b32.xlu1 %v3568_v62, %s3970_s3 }
 0x797   :  { %v3555_v63 = vpop.permute.xlu0 %3554 }
 0x798   :  { %v3557_v0 = vunpack.i.h.bf16 %v3555_v63  ;;  %v3556_v1 = vunpack.i.l.bf16 %v3555_v63 }
 0x79a   :  { %v882_v2 = vsel %vm547_vm9, %v3556_v1, %v4465_v30  ;;  %v885_v4 = vsel %vm547_vm9, %v3557_v0, %v4467_v54 }
 0x79b   :  { %v3573_v5 = vpack.i.bf16 %v885_v4, %v882_v2 }
 0x79d   :  { %3574 = vrot.lane.b32.xlu0 %v3573_v5, %s3970_s3 }
 0x7f7   :  { %v3560_v10 = vpop.permute.xlu1 %3559 }
 0x7f8   :  { %v3562_v11 = vunpack.i.h.bf16 %v3560_v10  ;;  %v3561_v52 = vunpack.i.l.bf16 %v3560_v10 }
 0x7fa   :  { %v902_v26 = vsel %vm547_vm9, %v3561_v52, %v4444_v59  ;;  %v903_v14 = vsel %vm547_vm9, %v3562_v11, %v4446_v60 }
 0x7fb   :  { %v3578_v15 = vpack.i.bf16 %v903_v14, %v902_v26  ;;  %v986_v14 = vpack.c.bf16 %v4446_v60, %v4444_v59  ;;  %v989_v59 = vpack.c.bf16 %v4467_v54, %v4465_v30 }
 0x7fd   :  { %3579 = vrot.lane.b32.xlu1 %v3578_v15, %s3971_s29 }
 0x7ff   :  { %v3565_v17 = vpop.permute.xlu0 %3564 }
 0x800   :  { %v3567_v18 = vunpack.i.h.bf16 %v3565_v17  ;;  %v3566_v56 = vunpack.i.l.bf16 %v3565_v17  ;;  %v988_v17 = vpack.c.bf16 %v4460_v21, %v4458_v20 }
 0x802   :  { %v904_v19 = vsel %vm547_vm9, %v3566_v56, %v4451_v12  ;;  %v905_v58 = vsel %vm547_vm9, %v3567_v18, %v4453_v13 }
 0x803   :  { %v3583_v22 = vpack.i.bf16 %v905_v58, %v904_v19 }
 0x805   :  { %3584 = vrot.lane.b32.xlu0 %v3583_v22, %s3971_s29 }
 0x807   :  { %v3570_v23 = vpop.permute.xlu1 %3569 }
 0x808   :  { %v3572_v45 = vunpack.i.h.bf16 %v3570_v23  ;;  %v3571_v24 = vunpack.i.l.bf16 %v3570_v23 }
 0x80a   :  { %v906_v25 = vsel %vm547_vm9, %v3571_v24, %v4458_v20  ;;  %v907_v49 = vsel %vm547_vm9, %v3572_v45, %v4460_v21 }
 0x80b   :  { %v3588_v61 = vpack.i.bf16 %v907_v49, %v906_v25  ;;  %v3874_v49 = vld [vmem:[%s5500_s6] ss:$8 sps:$4 sm:$0xff]  }
 0x80d   :  { %3589 = vrot.lane.b32.xlu1 %v3588_v61, %s3971_s29 }
 0x80f   :  { %v3575_v27 = vpop.permute.xlu0 %3574 }
 0x810   :  { %v3577_v29 = vunpack.i.h.bf16 %v3575_v27  ;;  %v3576_v31 = vunpack.i.l.bf16 %v3575_v27  ;;  %v3879_v27 = vld [vmem:[%s5500_s6 + $0x10] ss:$8 sps:$4 sm:$0xff]  }
 0x811   :  { %3599 = vrot.lane.b32.xlu1 %v3578_v15, %s3968_s15  ;;  %v987_v15 = vpack.c.bf16 %v4453_v13, %v4451_v12 }
 0x812   :  { %v908_v33 = vsel %vm547_vm9, %v3576_v31, %v4465_v30  ;;  %v909_v34 = vsel %vm547_vm9, %v3577_v29, %v4467_v54  ;;  %v3880_v29 = vld [vmem:[%s5500_s6 + $0x24] ss:$8 sps:$4 sm:$0xff]   ;;  %v3882_v31 = vld [vmem:[%s5500_s6 + $0x20] ss:$8 sps:$4 sm:$0xff]  }
 0x813   :  { %v3593_v35 = vpack.i.bf16 %v909_v34, %v908_v33  ;;  %v3883_v33 = vld [vmem:[%s5500_s6 + $0x34] ss:$8 sps:$4 sm:$0xff]   ;;  %v3885_v34 = vld [vmem:[%s5500_s6 + $0x30] ss:$8 sps:$4 sm:$0xff]  }
 0x815   :  { %3594 = vrot.lane.b32.xlu0 %v3593_v35, %s3971_s29  ;;  %3609 = vrot.lane.b32.xlu1 %v3588_v61, %s3968_s15  ;;  %v3877_v61 = vld [vmem:[%s5500_s6 + $0x14] ss:$8 sps:$4 sm:$0xff]  }
 0x819   :  { %3604 = vrot.lane.b32.xlu0 %v3583_v22, %s3968_s15  ;;  %1012 = vperm.xlu1 %3457, %v1002_v3  }
 0x81d   :  { %3614 = vrot.lane.b32.xlu0 %v3593_v35, %s3968_s15  ;;  %1022 = vperm.xlu1 %3457, %v1004_v36  }
 0x821   :  { %1017 = vperm.xlu0 %3456, %v1003_v37   ;;  %1032 = vperm.xlu1 %3457, %v1006_v38  }
 0x825   :  { %1027 = vperm.xlu0 %3456, %v1005_v7   ;;  %1042 = vperm.xlu1 %3457, %v1008_v39  }
 0x829   :  { %1037 = vperm.xlu0 %3456, %v1007_v28  }
 0x82d   :  { %1047 = vperm.xlu0 %3456, %v1009_v40  }
 0x86f   :  { %v3580_v44 = vpop.permute.xlu1 %3579 }
 0x870   :  { %v3582_v48 = vunpack.i.h.bf16 %v3580_v44  ;;  %v3581_v53 = vunpack.i.l.bf16 %v3580_v44 }
 0x872   :  { %v2956_v55 = vpack.c.bf16 %v3582_v48, %v3581_v53 }
 0x874   :  { %2957 = vmatpush1.bf16.msk.msra.mxu0 %vm4372_vm12, %v2956_v55 }
 0x875   :  { %1100 = vmatprep.subr.bf16.mxu0 %v3969_v16 }
 0x877   :  { %v3585_v57 = vpop.permute.xlu0 %3584 }
 0x878   :  { %v3587_v62 = vunpack.i.h.bf16 %v3585_v57  ;;  %v3586_v63 = vunpack.i.l.bf16 %v3585_v57 }
 0x87a   :  { %v2961_v0 = vpack.c.bf16 %v3587_v62, %v3586_v63 }
 0x87c   :  { %2962 = vmatpush1.bf16.msk.msra.mxu0 %vm4372_vm12, %v2961_v0 }
 0x87d   :  { %1102 = vmatprep.subr.bf16.mxu0 %v3969_v16 }
 0x87f   :  { %v3590_v1 = vpop.permute.xlu1 %3589 }
 0x880   :  { %v3592_v2 = vunpack.i.h.bf16 %v3590_v1  ;;  %v3591_v4 = vunpack.i.l.bf16 %v3590_v1 }
 0x882   :  { %v2966_v5 = vpack.c.bf16 %v3592_v2, %v3591_v4 }
 0x883   :  { %v3600_v18 = vpop.permute.xlu1 %3599 }
 0x884   :  { %2967 = vmatpush1.bf16.msk.msra.mxu0 %vm4372_vm12, %v2966_v5  ;;  %v3602_v56 = vunpack.i.h.bf16 %v3600_v18  ;;  %v3601_v19 = vunpack.i.l.bf16 %v3600_v18 }
 0x885   :  { %1104 = vmatprep.subr.bf16.mxu0 %v3969_v16 }
 0x886   :  { %v2976_v12 = vpack.c.bf16 %v3602_v56, %v3601_v19 }
 0x887   :  { %v3595_v10 = vpop.permute.xlu0 %3594  ;;  %v3610_v22 = vpop.permute.xlu1 %3609 }
 0x888   :  { %v3597_v11 = vunpack.i.h.bf16 %v3595_v10  ;;  %v3596_v52 = vunpack.i.l.bf16 %v3595_v10  ;;  %v3612_v20 = vunpack.i.h.bf16 %v3610_v22  ;;  %v3611_v21 = vunpack.i.l.bf16 %v3610_v22 }
 0x88a   :  { %v2971_v26 = vpack.c.bf16 %v3597_v11, %v3596_v52  ;;  %v2986_v30 = vpack.c.bf16 %v3612_v20, %v3611_v21 }
 0x88b   :  { %v3605_v60 = vpop.permute.xlu0 %3604 }
 0x88c   :  { %2972 = vmatpush1.bf16.msk.msra.mxu0 %vm4372_vm12, %v2971_v26  ;;  %v3607_v13 = vunpack.i.h.bf16 %v3605_v60  ;;  %v3606_v58 = vunpack.i.l.bf16 %v3605_v60 }
 0x88d   :  { %1106 = vmatprep.subr.bf16.mxu0 %v3969_v16 }
 0x88e   :  { %v2981_v23 = vpack.c.bf16 %v3607_v13, %v3606_v58 }
 0x88f   :  { %v3615_v45 = vpop.permute.xlu0 %3614 }
 0x890   :  { %1107 = vmatpush1.bf16.msra.mxu0 %v986_v14  ;;  %v3617_v54 = vunpack.i.h.bf16 %v3615_v45  ;;  %v3616_v24 = vunpack.i.l.bf16 %v3615_v45 }
 0x891   :  { %1108 = vmatprep.subr.bf16.mxu0 %v3969_v16 }
 0x892   :  { %v2991_v25 = vpack.c.bf16 %v3617_v54, %v3616_v24 }
 0x894   :  { %1109 = vmatpush1.bf16.msra.mxu0 %v987_v15 }
 0x895   :  { %1110 = vmatprep.subr.bf16.mxu0 %v3969_v16 }
 0x898   :  { %1111 = vmatpush1.bf16.msra.mxu0 %v988_v17  ;;  %v1013_v35 = vpop.permute.xlu1 %1012 }
 0x899   :  { %1112 = vmatprep.subr.bf16.mxu0 %v3969_v16 }
 0x89c   :  { %1113 = vmatpush1.bf16.msra.mxu0 %v989_v59  ;;  %v1023_v53 = vpop.permute.xlu1 %1022 }
 0x89d   :  { %1114 = vmatprep.subr.bf16.mxu0 %v3969_v16 }
 0x8a0   :  { %2977 = vmatpush1.bf16.msk.msra.mxu0 %vm4403_vm14, %v2976_v12  ;;  %v1018_v38 = vpop.permute.xlu0 %1017  ;;  %v1033_v11 = vpop.permute.xlu1 %1032 }
 0x8a1   :  { %1116 = vmatprep.subr.bf16.mxu0 %v3969_v16 }
 0x8a4   :  { %2982 = vmatpush1.bf16.msk.msra.mxu0 %vm4403_vm14, %v2981_v23  ;;  %v1028_v0 = vpop.permute.xlu0 %1027  ;;  %v1043_v12 = vpop.permute.xlu1 %1042 }
 0x8a5   :  { %1118 = vmatprep.subr.bf16.mxu0 %v3969_v16 }
 0x8a8   :  { %2987 = vmatpush1.bf16.msk.msra.mxu0 %vm4403_vm14, %v2986_v30  ;;  %v1038_v17 = vpop.permute.xlu0 %1037 }
 0x8a9   :  { %1120 = vmatprep.subr.bf16.mxu0 %v3969_v16 }
 0x8ac   :  { %2992 = vmatpush1.bf16.msk.msra.mxu0 %vm4403_vm14, %v2991_v25  ;;  %v1048_v21 = vpop.permute.xlu0 %1047 }
 0x8af   :  { %1131 = vmatmul.mubr.bf16.vlgmr.msra.gmra.mrb[8].mxu0 %v3874_v49 }
 0x8b0   :  { %2994 = vmatprep.mubr.msk.bf16.mxu0 %vm776_vm10, %v3877_v61 }
 0x8b7   :  { %1139 = vmatmul.mubr.bf16.gmra.mrb[12].mxu0 %v3879_v27 }
 0x8b8   :  { %2995 = vmatprep.mubr.msk.bf16.mxu0 %vm776_vm10, %v3880_v29 }
 0x8bf   :  { %1147 = vmatmul.mubr.bf16.gmra.mrb[16].mxu0 %v3882_v31 }
 0x8c0   :  { %2996 = vmatprep.mubr.msk.bf16.mxu0 %vm776_vm10, %v3883_v33 }
 0x8c7   :  { %1155 = vmatmul.mubr.bf16.gmra.mrb[20].mxu0 %v3885_v34 }
 0x982   :  { %v1132_v3 = vpop.f32.mrb[8].mxu0 }
 0x983   :  { %v1133_v36 = vadd.f32 %v1132_v3, %v1013_v35  ;;  %v1134_v37 = vpop.f32.mrb[9].mxu0 }
 0x984   :  { %v1135_v7 = vpop.f32.mrb[10].mxu0 }
 0x985   :  { %v1163_v39 = vadd.f32 %v1133_v36, %v4265_v41  ;;  %v1136_v28 = vadd.f32 %v1135_v7, %v1018_v38  ;;  %v1137_v40 = vpop.f32.mrb[11].mxu0 }
 0x987   :  { %v1164_v42 = vadd.f32 %v4263_v8, %v1136_v28  ;;  %v4605_v44 = vmax.f32 %v1163_v39, 0.0 }
 0x989   :  { %v4607_v48 = vmax.f32 %v1164_v42, 0.0 }
 0x98a   :  { %v1140_v55 = vpop.f32.mrb[12].mxu0 }
 0x98b   :  { %v1141_v57 = vadd.f32 %v1140_v55, %v1023_v53  ;;  %v1142_v62 = vpop.f32.mrb[13].mxu0  ;;  %v3618_v63 = vpack.i.bf16 %v4607_v48, %v4605_v44 }
 0x98c   :  { %v1143_v1 = vpop.f32.mrb[14].mxu0 }
 0x98d   :  { %v1165_v2 = vadd.f32 %v1141_v57, %v4274_v43  ;;  %v1144_v41 = vadd.f32 %v1143_v1, %v1028_v0  ;;  %v1145_v4 = vpop.f32.mrb[15].mxu0  ;;  %3619 = vrot.lane.b32.xlu1 %v3618_v63, %s3970_s3 }
 0x98f   :  { %v1166_v8 = vadd.f32 %v4272_v32, %v1144_v41  ;;  %v4614_v5 = vmax.f32 %v1165_v2, 0.0 }
 0x991   :  { %v4616_v10 = vmax.f32 %v1166_v8, 0.0 }
 0x992   :  { %v1148_v52 = vpop.f32.mrb[16].mxu0 }
 0x993   :  { %v1149_v26 = vadd.f32 %v1148_v52, %v1033_v11  ;;  %v1150_v14 = vpop.f32.mrb[17].mxu0  ;;  %v3623_v15 = vpack.i.bf16 %v4616_v10, %v4614_v5 }
 0x994   :  { %v1151_v18 = vpop.f32.mrb[18].mxu0 }
 0x995   :  { %v1167_v43 = vadd.f32 %v1149_v26, %v4283_v47  ;;  %v1152_v56 = vadd.f32 %v1151_v18, %v1038_v17  ;;  %v1153_v19 = vpop.f32.mrb[19].mxu0  ;;  %3624 = vrot.lane.b32.xlu0 %v3623_v15, %s3970_s3 }
 0x997   :  { %v1168_v32 = vadd.f32 %v4281_v46, %v1152_v56  ;;  %v4623_v59 = vmax.f32 %v1167_v43, 0.0 }
 0x999   :  { %v4625_v60 = vmax.f32 %v1168_v32, 0.0 }
 0x99a   :  { %v1156_v13 = vpop.f32.mrb[20].mxu0 }
 0x99b   :  { %v1157_v58 = vadd.f32 %v1156_v13, %v1043_v12  ;;  %v1158_v22 = vpop.f32.mrb[21].mxu0  ;;  %v3628_v20 = vpack.i.bf16 %v4625_v60, %v4623_v59 }
 0x99c   :  { %v1159_v23 = vpop.f32.mrb[22].mxu0 }
 0x99d   :  { %v1169_v47 = vadd.f32 %v1157_v58, %v4292_v51  ;;  %v1160_v45 = vadd.f32 %v1159_v23, %v1048_v21  ;;  %v1161_v30 = vpop.f32.mrb[23].mxu0  ;;  %3629 = vrot.lane.b32.xlu1 %v3628_v20, %s3970_s3 }
 0x99e   :  { %v1344_v30 = vld [vmem:[%s5501_s9 + $0x8] sm:$0xff] }
 0x99f   :  { %v1170_v46 = vadd.f32 %v4290_v50, %v1160_v45  ;;  %v4632_v54 = vmax.f32 %v1169_v47, 0.0  ;;  %v1343_v47 = vld [vmem:[%s5501_s9] sm:$0xff]  ;;  %v1345_v45 = vld [vmem:[%s5501_s9 + $0x10] sm:$0xff] }
 0x9a1   :  { %v4634_v24 = vmax.f32 %v1170_v46, 0.0  ;;  %v1347_v46 = vld [vmem:[%s5501_s9 + $0x20] sm:$0xff] }
 0x9a3   :  { %v3633_v25 = vpack.i.bf16 %v4634_v24, %v4632_v54 }
 0x9a5   :  { %3634 = vrot.lane.b32.xlu0 %v3633_v25, %s3970_s3  ;;  %v1346_v25 = vld [vmem:[%s5501_s9 + $0x18] sm:$0xff] }
 0x9ff   :  { %v3620_v49 = vpop.permute.xlu1 %3619 }
 0xa00   :  { %v3622_v61 = vunpack.i.h.bf16 %v3620_v49  ;;  %v3621_v27 = vunpack.i.l.bf16 %v3620_v49  ;;  %v1349_v49 = vld [vmem:[%s5501_s9 + $0x30] sm:$0xff] }
 0xa02   :  { %v1181_v51 = vsel %vm547_vm9, %v3621_v27, %v4605_v44  ;;  %v1184_v29 = vsel %vm547_vm9, %v3622_v61, %v4607_v48  ;;  %v1348_v61 = vld [vmem:[%s5501_s9 + $0x28] sm:$0xff]  ;;  %v1351_v27 = vld [vmem:[%s5501_s9 + $0x40] sm:$0xff] }
 0xa03   :  { %v3638_v31 = vpack.i.bf16 %v1184_v29, %v1181_v51  ;;  %v1350_v51 = vld [vmem:[%s5501_s9 + $0x38] sm:$0xff]  ;;  %v1353_v29 = vld [vmem:[%s5501_s9 + $0x50] sm:$0xff] }
 0xa05   :  { %3639 = vrot.lane.b32.xlu1 %v3638_v31, %s3970_s3  ;;  %v1352_v31 = vld [vmem:[%s5501_s9 + $0x48] sm:$0xff] }
 0xa07   :  { %v3625_v50 = vpop.permute.xlu0 %3624 }
 0xa08   :  { %v3627_v33 = vunpack.i.h.bf16 %v3625_v50  ;;  %v3626_v34 = vunpack.i.l.bf16 %v3625_v50  ;;  %v1355_v50 = vld [vmem:[%s5501_s9 + $0x60] sm:$0xff] }
 0xa0a   :  { %v1187_v35 = vsel %vm547_vm9, %v3626_v34, %v4614_v5  ;;  %v1190_v3 = vsel %vm547_vm9, %v3627_v33, %v4616_v10  ;;  %v3888_v33 = vld [vmem:[%s5502_s8 + $0x4] ss:$8 sps:$4 sm:$0xff]   ;;  %v1354_v34 = vld [vmem:[%s5501_s9 + $0x58] sm:$0xff] }
 0xa0b   :  { %v3643_v36 = vpack.i.bf16 %v1190_v3, %v1187_v35  ;;  %3069 = vmatprep.mubr.msk.bf16.mxu1 %vm776_vm10, %v3888_v33  ;;  %v1357_v35 = vld [vmem:[%s5501_s9 + $0x70] sm:$0xff]  ;;  %v1356_v3 = vld [vmem:[%s5501_s9 + $0x68] sm:$0xff] }
 0xa0d   :  { %3644 = vrot.lane.b32.xlu0 %v3643_v36, %s3970_s3  ;;  %v1358_v36 = vld [vmem:[%s5501_s9 + $0x78] sm:$0xff] }
 0xa0f   :  { %v3630_v37 = vpop.permute.xlu1 %3629 }
 0xa10   :  { %v3632_v38 = vunpack.i.h.bf16 %v3630_v37  ;;  %v3631_v7 = vunpack.i.l.bf16 %v3630_v37 }
 0xa12   :  { %v1196_v39 = vsel %vm547_vm9, %v3632_v38, %v4625_v60  ;;  %v1193_v28 = vsel %vm547_vm9, %v3631_v7, %v4623_v59 }
 0xa13   :  { %v3648_v40 = vpack.i.bf16 %v1196_v39, %v1193_v28 }
 0xa15   :  { %3649 = vrot.lane.b32.xlu1 %v3648_v40, %s3970_s3 }
 0xa17   :  { %v3635_v42 = vpop.permute.xlu0 %3634 }
 0xa18   :  { %v3637_v53 = vunpack.i.h.bf16 %v3635_v42  ;;  %v3636_v55 = vunpack.i.l.bf16 %v3635_v42 }
 0xa1a   :  { %v1202_v57 = vsel %vm547_vm9, %v3637_v53, %v4634_v24  ;;  %v1199_v62 = vsel %vm547_vm9, %v3636_v55, %v4632_v54 }
 0xa1b   :  { %v3653_v63 = vpack.i.bf16 %v1202_v57, %v1199_v62 }
 0xa1d   :  { %3654 = vrot.lane.b32.xlu0 %v3653_v63, %s3970_s3 }
 0xa77   :  { %v3640_v0 = vpop.permute.xlu1 %3639 }
 0xa78   :  { %v3642_v1 = vunpack.i.h.bf16 %v3640_v0  ;;  %v3641_v2 = vunpack.i.l.bf16 %v3640_v0 }
 0xa7a   :  { %v1220_v41 = vsel %vm547_vm9, %v3642_v1, %v4607_v48  ;;  %v1219_v4 = vsel %vm547_vm9, %v3641_v2, %v4605_v44 }
 0xa7b   :  { %v3658_v8 = vpack.i.bf16 %v1220_v41, %v1219_v4  ;;  %v1303_v4 = vpack.c.bf16 %v4607_v48, %v4605_v44  ;;  %v1306_v44 = vpack.c.bf16 %v4634_v24, %v4632_v54 }
 0xa7d   :  { %3659 = vrot.lane.b32.xlu1 %v3658_v8, %s3971_s29 }
 0xa7f   :  { %v3645_v11 = vpop.permute.xlu0 %3644 }
 0xa80   :  { %v3647_v52 = vunpack.i.h.bf16 %v3645_v11  ;;  %v3646_v26 = vunpack.i.l.bf16 %v3645_v11  ;;  %v1305_v11 = vpack.c.bf16 %v4625_v60, %v4623_v59 }
 0xa82   :  { %v1222_v14 = vsel %vm547_vm9, %v3647_v52, %v4616_v10  ;;  %v1221_v15 = vsel %vm547_vm9, %v3646_v26, %v4614_v5 }
 0xa83   :  { %v3663_v17 = vpack.i.bf16 %v1222_v14, %v1221_v15 }
 0xa85   :  { %3664 = vrot.lane.b32.xlu0 %v3663_v17, %s3971_s29 }
 0xa87   :  { %v3650_v18 = vpop.permute.xlu1 %3649 }
 0xa88   :  { %v3652_v43 = vunpack.i.h.bf16 %v3650_v18  ;;  %v3651_v56 = vunpack.i.l.bf16 %v3650_v18 }
 0xa8a   :  { %v1224_v19 = vsel %vm547_vm9, %v3652_v43, %v4625_v60  ;;  %v1223_v32 = vsel %vm547_vm9, %v3651_v56, %v4623_v59 }
 0xa8b   :  { %v3668_v12 = vpack.i.bf16 %v1224_v19, %v1223_v32  ;;  %v3886_v32 = vld [vmem:[%s5502_s8] ss:$8 sps:$4 sm:$0xff]  }
 0xa8d   :  { %3669 = vrot.lane.b32.xlu1 %v3668_v12, %s3971_s29 }
 0xa8f   :  { %v3655_v13 = vpop.permute.xlu0 %3654 }
 0xa90   :  { %v3657_v58 = vunpack.i.h.bf16 %v3655_v13  ;;  %v3656_v22 = vunpack.i.l.bf16 %v3655_v13  ;;  %v3891_v13 = vld [vmem:[%s5502_s8 + $0x10] ss:$8 sps:$4 sm:$0xff]  }
 0xa91   :  { %3679 = vrot.lane.b32.xlu1 %v3658_v8, %s3968_s15  ;;  %v1304_v8 = vpack.c.bf16 %v4616_v10, %v4614_v5 }
 0xa92   :  { %v1226_v20 = vsel %vm547_vm9, %v3657_v58, %v4634_v24  ;;  %v1225_v21 = vsel %vm547_vm9, %v3656_v22, %v4632_v54  ;;  %v3894_v58 = vld [vmem:[%s5502_s8 + $0x20] ss:$8 sps:$4 sm:$0xff]   ;;  %v3895_v22 = vld [vmem:[%s5502_s8 + $0x34] ss:$8 sps:$4 sm:$0xff]  }
 0xa93   :  { %v3673_v23 = vpack.i.bf16 %v1226_v20, %v1225_v21  ;;  %v3897_v20 = vld [vmem:[%s5502_s8 + $0x30] ss:$8 sps:$4 sm:$0xff]   ;;  %v3898_v21 = vld [vmem:[%s5502_s8 + $0x44] ss:$8 sps:$4 sm:$0xff]  }
 0xa95   :  { %3674 = vrot.lane.b32.xlu0 %v3673_v23, %s3971_s29  ;;  %3689 = vrot.lane.b32.xlu1 %v3668_v12, %s3968_s15  ;;  %v3889_v12 = vld [vmem:[%s5502_s8 + $0x14] ss:$8 sps:$4 sm:$0xff]  }
 0xa99   :  { %3684 = vrot.lane.b32.xlu0 %v3663_v17, %s3968_s15  ;;  %1377 = vperm.xlu1 %3457, %v1343_v47   ;;  %v3901_v47 = vld [vmem:[%s5502_s8 + $0x54] ss:$8 sps:$4 sm:$0xff]  }
 0xa9d   :  { %3694 = vrot.lane.b32.xlu0 %v3673_v23, %s3968_s15  ;;  %1387 = vperm.xlu1 %3457, %v1345_v45   ;;  %v3900_v23 = vld [vmem:[%s5502_s8 + $0x40] ss:$8 sps:$4 sm:$0xff]   ;;  %v3903_v45 = vld [vmem:[%s5502_s8 + $0x50] ss:$8 sps:$4 sm:$0xff]  }
 0xaa1   :  { %1382 = vperm.xlu0 %3456, %v1344_v30   ;;  %1397 = vperm.xlu1 %3457, %v1347_v46   ;;  %v3904_v30 = vld [vmem:[%s5502_s8 + $0x64] ss:$8 sps:$4 sm:$0xff]   ;;  %v3906_v46 = vld [vmem:[%s5502_s8 + $0x60] ss:$8 sps:$4 sm:$0xff]  }
 0xaa5   :  { %1392 = vperm.xlu0 %3456, %v1346_v25   ;;  %1407 = vperm.xlu1 %3457, %v1349_v49   ;;  %v3907_v25 = vld [vmem:[%s5502_s8 + $0x74] ss:$8 sps:$4 sm:$0xff]   ;;  %v3909_v49 = vld [vmem:[%s5502_s8 + $0x70] ss:$8 sps:$4 sm:$0xff]  }
 0xaa9   :  { %1402 = vperm.xlu0 %3456, %v1348_v61   ;;  %1417 = vperm.xlu1 %3457, %v1351_v27  }
 0xaad   :  { %1412 = vperm.xlu0 %3456, %v1350_v51   ;;  %1427 = vperm.xlu1 %3457, %v1353_v29  }
 0xab1   :  { %1422 = vperm.xlu0 %3456, %v1352_v31   ;;  %1437 = vperm.xlu1 %3457, %v1355_v50  }
 0xab5   :  { %1432 = vperm.xlu0 %3456, %v1354_v34   ;;  %1447 = vperm.xlu1 %3457, %v1357_v35  }
 0xab9   :  { %1442 = vperm.xlu0 %3456, %v1356_v3  }
 0xabd   :  { %1452 = vperm.xlu0 %3456, %v1358_v36  }
 0xaef   :  { %v3660_v37 = vpop.permute.xlu1 %3659 }
 0xaf0   :  { %v3662_v38 = vunpack.i.h.bf16 %v3660_v37  ;;  %v3661_v7 = vunpack.i.l.bf16 %v3660_v37 }
 0xaf2   :  { %v3032_v39 = vpack.c.bf16 %v3662_v38, %v3661_v7 }
 0xaf4   :  { %3033 = vmatpush1.bf16.msk.msra.mxu1 %vm4372_vm12, %v3032_v39 }
 0xaf5   :  { %1729 = vmatprep.subr.bf16.mxu1 %v3969_v16 }
 0xaf7   :  { %v3665_v28 = vpop.permute.xlu0 %3664 }
 0xaf8   :  { %v3667_v40 = vunpack.i.h.bf16 %v3665_v28  ;;  %v3666_v42 = vunpack.i.l.bf16 %v3665_v28 }
 0xafa   :  { %v3037_v53 = vpack.c.bf16 %v3667_v40, %v3666_v42 }
 0xafc   :  { %3038 = vmatpush1.bf16.msk.msra.mxu1 %vm4372_vm12, %v3037_v53 }
 0xafd   :  { %1731 = vmatprep.subr.bf16.mxu1 %v3969_v16 }
 0xaff   :  { %v3670_v55 = vpop.permute.xlu1 %3669 }
 0xb00   :  { %v3672_v57 = vunpack.i.h.bf16 %v3670_v55  ;;  %v3671_v62 = vunpack.i.l.bf16 %v3670_v55 }
 0xb02   :  { %v3042_v63 = vpack.c.bf16 %v3672_v57, %v3671_v62 }
 0xb03   :  { %v3680_v52 = vpop.permute.xlu1 %3679 }
 0xb04   :  { %3043 = vmatpush1.bf16.msk.msra.mxu1 %vm4372_vm12, %v3042_v63  ;;  %v3682_v26 = vunpack.i.h.bf16 %v3680_v52  ;;  %v3681_v14 = vunpack.i.l.bf16 %v3680_v52 }
 0xb05   :  { %1733 = vmatprep.subr.bf16.mxu1 %v3969_v16 }
 0xb06   :  { %v3052_v5 = vpack.c.bf16 %v3682_v26, %v3681_v14 }
 0xb07   :  { %v3675_v0 = vpop.permute.xlu0 %3674  ;;  %v3690_v17 = vpop.permute.xlu1 %3689 }
 0xb08   :  { %v3677_v1 = vunpack.i.h.bf16 %v3675_v0  ;;  %v3676_v2 = vunpack.i.l.bf16 %v3675_v0  ;;  %v3692_v59 = vunpack.i.h.bf16 %v3690_v17  ;;  %v3691_v60 = vunpack.i.l.bf16 %v3690_v17 }
 0xb0a   :  { %v3047_v41 = vpack.c.bf16 %v3677_v1, %v3676_v2  ;;  %v3062_v54 = vpack.c.bf16 %v3692_v59, %v3691_v60 }
 0xb0b   :  { %v3685_v48 = vpop.permute.xlu0 %3684 }
 0xb0c   :  { %3048 = vmatpush1.bf16.msk.msra.mxu1 %vm4372_vm12, %v3047_v41  ;;  %v3687_v10 = vunpack.i.h.bf16 %v3685_v48  ;;  %v3686_v15 = vunpack.i.l.bf16 %v3685_v48 }
 0xb0d   :  { %1735 = vmatprep.subr.bf16.mxu1 %v3969_v16 }
 0xb0e   :  { %v3057_v18 = vpack.c.bf16 %v3687_v10, %v3686_v15 }
 0xb0f   :  { %v3695_v43 = vpop.permute.xlu0 %3694 }
 0xb10   :  { %1736 = vmatpush1.bf16.msra.mxu1 %v1303_v4  ;;  %v3697_v24 = vunpack.i.h.bf16 %v3695_v43  ;;  %v3696_v56 = vunpack.i.l.bf16 %v3695_v43 }
 0xb11   :  { %1737 = vmatprep.subr.bf16.mxu1 %v3969_v16 }
 0xb12   :  { %v3067_v19 = vpack.c.bf16 %v3697_v24, %v3696_v56 }
 0xb14   :  { %1738 = vmatpush1.bf16.msra.mxu1 %v1304_v8 }
 0xb15   :  { %1739 = vmatprep.subr.bf16.mxu1 %v3969_v16 }
 0xb18   :  { %1740 = vmatpush1.bf16.msra.mxu1 %v1305_v11  ;;  %v1378_v61 = vpop.permute.xlu1 %1377 }
 0xb19   :  { %1741 = vmatprep.subr.bf16.mxu1 %v3969_v16 }
 0xb1c   :  { %1742 = vmatpush1.bf16.msra.mxu1 %v1306_v44  ;;  %v1388_v38 = vpop.permute.xlu1 %1387 }
 0xb1d   :  { %1743 = vmatprep.subr.bf16.mxu1 %v3969_v16 }
 0xb20   :  { %3053 = vmatpush1.bf16.msk.msra.mxu1 %vm4403_vm14, %v3052_v5  ;;  %v1383_v31 = vpop.permute.xlu0 %1382  ;;  %v1398_v0 = vpop.permute.xlu1 %1397 }
 0xb21   :  { %1745 = vmatprep.subr.bf16.mxu1 %v3969_v16 }
 0xb24   :  { %3058 = vmatpush1.bf16.msk.msra.mxu1 %vm4403_vm14, %v3057_v18  ;;  %v1393_v40 = vpop.permute.xlu0 %1392  ;;  %v1408_v48 = vpop.permute.xlu1 %1407 }
 0xb25   :  { %1747 = vmatprep.subr.bf16.mxu1 %v3969_v16 }
 0xb28   :  { %3063 = vmatpush1.bf16.msk.msra.mxu1 %vm4403_vm14, %v3062_v54  ;;  %v1403_v4 = vpop.permute.xlu0 %1402  ;;  %v1418_v56 = vpop.permute.xlu1 %1417 }
 0xb29   :  { %1749 = vmatprep.subr.bf16.mxu1 %v3969_v16  ;;  %v3892_v16 = vld [vmem:[%s5502_s8 + $0x24] ss:$8 sps:$4 sm:$0xff]  }
 0xb2c   :  { %3068 = vmatpush1.bf16.msk.msra.mxu1 %vm4403_vm14, %v3067_v19  ;;  %v1413_v17 = vpop.permute.xlu0 %1412 }
 0xb2f   :  { %1760 = vmatmul.mubr.bf16.vlgmr.msra.gmra.mrb[24].mxu1 %v3886_v32 }
 0xb30   :  { %3070 = vmatprep.mubr.msk.bf16.mxu1 %vm776_vm10, %v3889_v12 }
 0xb37   :  { %1768 = vmatmul.mubr.bf16.gmra.mrb[28].mxu1 %v3891_v13  ;;  %v1423_v13 = vpop.permute.xlu0 %1422 }
 0xb38   :  { %3071 = vmatprep.mubr.msk.bf16.mxu1 %vm776_vm10, %v3892_v16 }
 0xb3f   :  { %1776 = vmatmul.mubr.bf16.gmra.mrb[32].mxu1 %v3894_v58 }
 0xb40   :  { %3072 = vmatprep.mubr.msk.bf16.mxu1 %vm776_vm10, %v3895_v22 }
 0xb47   :  { %1784 = vmatmul.mubr.bf16.gmra.mrb[36].mxu1 %v3897_v20 }
 0xb48   :  { %3073 = vmatprep.mubr.msk.bf16.mxu1 %vm776_vm10, %v3898_v21 }
 0xb4f   :  { %1792 = vmatmul.mubr.bf16.gmra.mrb[40].mxu1 %v3900_v23 }
 0xb50   :  { %3074 = vmatprep.mubr.msk.bf16.mxu1 %vm776_vm10, %v3901_v47  ;;  %v1428_v47 = vpop.permute.xlu1 %1427 }
 0xb57   :  { %1800 = vmatmul.mubr.bf16.gmra.mrb[44].mxu1 %v3903_v45 }
 0xb58   :  { %3075 = vmatprep.mubr.msk.bf16.mxu1 %vm776_vm10, %v3904_v30 }
 0xb5f   :  { %1808 = vmatmul.mubr.bf16.gmra.mrb[48].mxu1 %v3906_v46 }
 0xb60   :  { %3076 = vmatprep.mubr.msk.bf16.mxu1 %vm776_vm10, %v3907_v25  ;;  %v1433_v25 = vpop.permute.xlu0 %1432 }
 0xb67   :  { %1816 = vmatmul.mubr.bf16.gmra.mrb[52].mxu1 %v3909_v49 }
 0xc02   :  { %v1761_v27 = vpop.f32.mrb[24].mxu1 }
 0xc03   :  { %v1762_v51 = vadd.f32 %v1761_v27, %v1378_v61  ;;  %v1763_v29 = vpop.f32.mrb[25].mxu1 }
 0xc04   :  { %v1764_v50 = vpop.f32.mrb[26].mxu1 }
 0xc05   :  { %v1765_v33 = vadd.f32 %v1764_v50, %v1383_v31  ;;  %v1766_v34 = vpop.f32.mrb[27].mxu1  ;;  %v4822_v35 = vmax.f32 %v1762_v51, 0.0  ;;  %v1438_v50 = vpop.permute.xlu1 %1437 }
 0xc07   :  { %v4824_v3 = vmax.f32 %v1765_v33, 0.0 }
 0xc09   :  { %v3698_v36 = vpack.i.bf16 %v4824_v3, %v4822_v35  ;;  %v2152_v37 = vpack.c.bf16 %v4824_v3, %v4822_v35 }
 0xc0a   :  { %v1769_v7 = vpop.f32.mrb[28].mxu1 }
 0xc0b   :  { %v1770_v39 = vadd.f32 %v1769_v7, %v1388_v38  ;;  %v1771_v28 = vpop.f32.mrb[29].mxu1  ;;  %3699 = vrot.lane.b32.xlu1 %v3698_v36, %s3970_s3  ;;  %3226 = vmatprep.subr.bf16.mxu0 %v2152_v37  ;;  %v1443_v37 = vpop.permute.xlu0 %1442 }
 0xc0c   :  { %v1772_v42 = vpop.f32.mrb[30].mxu1 }
 0xc0d   :  { %v1773_v53 = vadd.f32 %v1772_v42, %v1393_v40  ;;  %v1774_v55 = vpop.f32.mrb[31].mxu1  ;;  %v4831_v57 = vmax.f32 %v1770_v39, 0.0 }
 0xc0f   :  { %v4833_v62 = vmax.f32 %v1773_v53, 0.0  ;;  %v1448_v53 = vpop.permute.xlu1 %1447 }
 0xc11   :  { %v3703_v63 = vpack.i.bf16 %v4833_v62, %v4831_v57 }
 0xc12   :  { %v1777_v1 = vpop.f32.mrb[32].mxu1 }
 0xc13   :  { %v1778_v2 = vadd.f32 %v1777_v1, %v1398_v0  ;;  %v1779_v41 = vpop.f32.mrb[33].mxu1  ;;  %3704 = vrot.lane.b32.xlu0 %v3703_v63, %s3970_s3  ;;  %v3910_v1 = vld [vmem:[%s5502_s8 + $0x84] ss:$8 sps:$4 sm:$0xff]  }
 0xc14   :  { %v1780_v8 = vpop.f32.mrb[34].mxu1  ;;  %v1453_v41 = vpop.permute.xlu0 %1452  ;;  %3077 = vmatprep.mubr.msk.bf16.mxu1 %vm776_vm10, %v3910_v1 }
 0xc15   :  { %v1781_v11 = vadd.f32 %v1780_v8, %v1403_v4  ;;  %v1782_v52 = vpop.f32.mrb[35].mxu1  ;;  %v4838_v26 = vmax.f32 %v1778_v2, 0.0  ;;  %v3912_v2 = vld [vmem:[%s5502_s8 + $0x80] ss:$8 sps:$4 sm:$0xff]  }
 0xc16   :  { %1824 = vmatmul.mubr.bf16.gmra.mrb[56].mxu1 %v3912_v2 }
 0xc17   :  { %v4840_v14 = vmax.f32 %v1781_v11, 0.0 }
 0xc19   :  { %v3708_v44 = vpack.i.bf16 %v4840_v14, %v4838_v26 }
 0xc1a   :  { %v1785_v5 = vpop.f32.mrb[36].mxu1 }
 0xc1b   :  { %v1786_v10 = vadd.f32 %v1785_v5, %v1408_v48  ;;  %v1787_v15 = vpop.f32.mrb[37].mxu1  ;;  %3709 = vrot.lane.b32.xlu1 %v3708_v44, %s3970_s3  ;;  %v3913_v5 = vld [vmem:[%s5502_s8 + $0x94] ss:$8 sps:$4 sm:$0xff]  }
 0xc1c   :  { %v1788_v59 = vpop.f32.mrb[38].mxu1  ;;  %3078 = vmatprep.mubr.msk.bf16.mxu1 %vm776_vm10, %v3913_v5  ;;  %v3916_v15 = vld [vmem:[%s5502_s8 + $0xa4] ss:$8 sps:$4 sm:$0xff]  }
 0xc1d   :  { %v1789_v60 = vadd.f32 %v1788_v59, %v1413_v17  ;;  %v1790_v18 = vpop.f32.mrb[39].mxu1  ;;  %v4845_v43 = vmax.f32 %v1786_v10, 0.0  ;;  %v3915_v10 = vld [vmem:[%s5502_s8 + $0x90] ss:$8 sps:$4 sm:$0xff]   ;;  %v3918_v59 = vld [vmem:[%s5502_s8 + $0xa0] ss:$8 sps:$4 sm:$0xff]  }
 0xc1e   :  { %1832 = vmatmul.mubr.bf16.gmra.mrb[60].mxu1 %v3915_v10 }
 0xc1f   :  { %v4847_v54 = vmax.f32 %v1789_v60, 0.0  ;;  %3079 = vmatprep.mubr.msk.bf16.mxu1 %vm776_vm10, %v3916_v15 }
 0xc21   :  { %v3713_v24 = vpack.i.bf16 %v4847_v54, %v4845_v43 }
 0xc22   :  { %v1793_v19 = vpop.f32.mrb[40].mxu1 }
 0xc23   :  { %v1794_v32 = vadd.f32 %v1793_v19, %v1418_v56  ;;  %v1795_v12 = vpop.f32.mrb[41].mxu1  ;;  %3714 = vrot.lane.b32.xlu0 %v3713_v24, %s3970_s3 }
 0xc24   :  { %v1796_v16 = vpop.f32.mrb[42].mxu1 }
 0xc25   :  { %v1797_v58 = vadd.f32 %v1796_v16, %v1423_v13  ;;  %v1798_v22 = vpop.f32.mrb[43].mxu1  ;;  %v4852_v20 = vmax.f32 %v1794_v32, 0.0  ;;  %v3919_v32 = vld [vmem:[%s5502_s8 + $0xb4] ss:$8 sps:$4 sm:$0xff]   ;;  %v3921_v13 = vld [vmem:[%s5502_s8 + $0xb0] ss:$8 sps:$4 sm:$0xff]  }
 0xc26   :  { %1840 = vmatmul.mubr.bf16.gmra.mrb[64].mxu1 %v3918_v59 }
 0xc27   :  { %v4854_v21 = vmax.f32 %v1797_v58, 0.0  ;;  %3080 = vmatprep.mubr.msk.bf16.mxu1 %vm776_vm10, %v3919_v32 }
 0xc29   :  { %v3718_v23 = vpack.i.bf16 %v4854_v21, %v4852_v20 }
 0xc2a   :  { %v1801_v45 = vpop.f32.mrb[44].mxu1 }
 0xc2b   :  { %v1802_v30 = vadd.f32 %v1801_v45, %v1428_v47  ;;  %v1803_v46 = vpop.f32.mrb[45].mxu1  ;;  %3719 = vrot.lane.b32.xlu1 %v3718_v23, %s3970_s3  ;;  %v3922_v45 = vld [vmem:[%s5502_s8 + $0xc4] ss:$8 sps:$4 sm:$0xff]  }
 0xc2c   :  { %v1804_v49 = vpop.f32.mrb[46].mxu1  ;;  %v3924_v46 = vld [vmem:[%s5502_s8 + $0xc0] ss:$8 sps:$4 sm:$0xff]  }
 0xc2d   :  { %v1805_v61 = vadd.f32 %v1804_v49, %v1433_v25  ;;  %v1806_v27 = vpop.f32.mrb[47].mxu1  ;;  %v4859_v51 = vmax.f32 %v1802_v30, 0.0 }
 0xc2e   :  { %1848 = vmatmul.mubr.bf16.gmra.mrb[68].mxu1 %v3921_v13 }
 0xc2f   :  { %v4861_v29 = vmax.f32 %v1805_v61, 0.0  ;;  %3081 = vmatprep.mubr.msk.bf16.mxu1 %vm776_vm10, %v3922_v45 }
 0xc31   :  { %v3723_v31 = vpack.i.bf16 %v4861_v29, %v4859_v51 }
 0xc32   :  { %v1809_v33 = vpop.f32.mrb[48].mxu1 }
 0xc33   :  { %v1810_v34 = vadd.f32 %v1809_v33, %v1438_v50  ;;  %v1811_v36 = vpop.f32.mrb[49].mxu1  ;;  %3724 = vrot.lane.b32.xlu0 %v3723_v31, %s3970_s3  ;;  %v3925_v50 = vld [vmem:[%s5502_s8 + $0xd4] ss:$8 sps:$4 sm:$0xff]  }
 0xc34   :  { %v1812_v38 = vpop.f32.mrb[50].mxu1 }
 0xc35   :  { %v1813_v7 = vadd.f32 %v1812_v38, %v1443_v37  ;;  %v1814_v39 = vpop.f32.mrb[51].mxu1  ;;  %v4866_v28 = vmax.f32 %v1810_v34, 0.0  ;;  %v3927_v34 = vld [vmem:[%s5502_s8 + $0xd0] ss:$8 sps:$4 sm:$0xff]  }
 0xc36   :  { %1856 = vmatmul.mubr.bf16.gmra.mrb[72].mxu1 %v3924_v46 }
 0xc37   :  { %v4868_v40 = vmax.f32 %v1813_v7, 0.0  ;;  %3082 = vmatprep.mubr.msk.bf16.mxu1 %vm776_vm10, %v3925_v50 }
 0xc39   :  { %v3728_v42 = vpack.i.bf16 %v4868_v40, %v4866_v28 }
 0xc3a   :  { %v1817_v55 = vpop.f32.mrb[52].mxu1 }
 0xc3b   :  { %v1818_v63 = vadd.f32 %v1817_v55, %v1448_v53  ;;  %v1819_v0 = vpop.f32.mrb[53].mxu1  ;;  %3729 = vrot.lane.b32.xlu1 %v3728_v42, %s3970_s3  ;;  %v3928_v42 = vld [vmem:[%s5502_s8 + $0xe4] ss:$8 sps:$4 sm:$0xff]   ;;  %v3930_v55 = vld [vmem:[%s5502_s8 + $0xe0] ss:$8 sps:$4 sm:$0xff]  }
 0xc3c   :  { %v1820_v4 = vpop.f32.mrb[54].mxu1 }
 0xc3d   :  { %v1821_v8 = vadd.f32 %v1820_v4, %v1453_v41  ;;  %v1822_v11 = vpop.f32.mrb[55].mxu1  ;;  %v4880_v52 = vmax.f32 %v1818_v63, 0.0  ;;  %v3931_v4 = vld [vmem:[%s5502_s8 + $0xf4] ss:$8 sps:$4 sm:$0xff]  }
 0xc3e   :  { %1864 = vmatmul.mubr.bf16.gmra.mrb[76].mxu1 %v3927_v34  ;;  %v3933_v11 = vld [vmem:[%s5502_s8 + $0xf0] ss:$8 sps:$4 sm:$0xff]  }
 0xc3f   :  { %v4882_v44 = vmax.f32 %v1821_v8, 0.0  ;;  %3083 = vmatprep.mubr.msk.bf16.mxu1 %vm776_vm10, %v3928_v42 }
 0xc41   :  { %v3733_v48 = vpack.i.bf16 %v4882_v44, %v4880_v52 }
 0xc43   :  { %3734 = vrot.lane.b32.xlu0 %v3733_v48, %s3970_s3 }
 0xc46   :  { %1872 = vmatmul.mubr.bf16.gmra.mrb[80].mxu1 %v3930_v55 }
 0xc47   :  { %3084 = vmatprep.mubr.msk.bf16.mxu1 %vm776_vm10, %v3931_v4 }
 0xc4e   :  { %1880 = vmatmul.mubr.bf16.gmra.mrb[84].mxu1 %v3933_v11 }
 0xc7d   :  { %v3700_v17 = vpop.permute.xlu1 %3699 }
 0xc7e   :  { %v3702_v60 = vunpack.i.h.bf16 %v3700_v17  ;;  %v3701_v18 = vunpack.i.l.bf16 %v3700_v17 }
 0xc80   :  { %v1909_v24 = vsel %vm547_vm9, %v3702_v60, %v4824_v3  ;;  %v1906_v56 = vsel %vm547_vm9, %v3701_v18, %v4822_v35 }
 0xc81   :  { %v3738_v19 = vpack.i.bf16 %v1909_v24, %v1906_v56 }
 0xc83   :  { %3739 = vrot.lane.b32.xlu1 %v3738_v19, %s3970_s3 }
 0xc85   :  { %v3705_v12 = vpop.permute.xlu0 %3704 }
 0xc86   :  { %v3707_v16 = vunpack.i.h.bf16 %v3705_v12  ;;  %v3706_v58 = vunpack.i.l.bf16 %v3705_v12 }
 0xc88   :  { %v1915_v22 = vsel %vm547_vm9, %v3707_v16, %v4833_v62  ;;  %v1912_v23 = vsel %vm547_vm9, %v3706_v58, %v4831_v57 }
 0xc89   :  { %v3743_v47 = vpack.i.bf16 %v1915_v22, %v1912_v23 }
 0xc8b   :  { %3744 = vrot.lane.b32.xlu0 %v3743_v47, %s3970_s3 }
 0xc8d   :  { %v3710_v30 = vpop.permute.xlu1 %3709 }
 0xc8e   :  { %v3712_v25 = vunpack.i.h.bf16 %v3710_v30  ;;  %v3711_v49 = vunpack.i.l.bf16 %v3710_v30 }
 0xc90   :  { %v1921_v61 = vsel %vm547_vm9, %v3712_v25, %v4840_v14  ;;  %v1918_v27 = vsel %vm547_vm9, %v3711_v49, %v4838_v26 }
 0xc91   :  { %v3748_v31 = vpack.i.bf16 %v1921_v61, %v1918_v27 }
 0xc93   :  { %3749 = vrot.lane.b32.xlu1 %v3748_v31, %s3970_s3 }
 0xc95   :  { %v3715_v33 = vpop.permute.xlu0 %3714 }
 0xc96   :  { %v3717_v36 = vunpack.i.h.bf16 %v3715_v33  ;;  %v3716_v37 = vunpack.i.l.bf16 %v3715_v33 }
 0xc98   :  { %v1927_v38 = vsel %vm547_vm9, %v3717_v36, %v4847_v54  ;;  %v1924_v7 = vsel %vm547_vm9, %v3716_v37, %v4845_v43 }
 0xc99   :  { %v3753_v39 = vpack.i.bf16 %v1927_v38, %v1924_v7 }
 0xc9b   :  { %3754 = vrot.lane.b32.xlu0 %v3753_v39, %s3970_s3 }
 0xc9d   :  { %v3720_v53 = vpop.permute.xlu1 %3719 }
 0xc9e   :  { %v3722_v63 = vunpack.i.h.bf16 %v3720_v53  ;;  %v3721_v0 = vunpack.i.l.bf16 %v3720_v53 }
 0xca0   :  { %v1933_v1 = vsel %vm547_vm9, %v3722_v63, %v4854_v21  ;;  %v1930_v2 = vsel %vm547_vm9, %v3721_v0, %v4852_v20 }
 0xca1   :  { %v3758_v41 = vpack.i.bf16 %v1933_v1, %v1930_v2 }
 0xca3   :  { %3759 = vrot.lane.b32.xlu1 %v3758_v41, %s3970_s3 }
 0xca5   :  { %v3725_v8 = vpop.permute.xlu0 %3724 }
 0xca6   :  { %v3727_v48 = vunpack.i.h.bf16 %v3725_v8  ;;  %v3726_v5 = vunpack.i.l.bf16 %v3725_v8 }
 0xca8   :  { %v1939_v10 = vsel %vm547_vm9, %v3727_v48, %v4861_v29  ;;  %v1936_v15 = vsel %vm547_vm9, %v3726_v5, %v4859_v51 }
 0xca9   :  { %v3763_v17 = vpack.i.bf16 %v1939_v10, %v1936_v15 }
 0xcab   :  { %3764 = vrot.lane.b32.xlu0 %v3763_v17, %s3970_s3 }
 0xcad   :  { %v3730_v59 = vpop.permute.xlu1 %3729 }
 0xcae   :  { %v3732_v60 = vunpack.i.h.bf16 %v3730_v59  ;;  %v3731_v18 = vunpack.i.l.bf16 %v3730_v59 }
 0xcb0   :  { %v1945_v24 = vsel %vm547_vm9, %v3732_v60, %v4868_v40  ;;  %v1942_v56 = vsel %vm547_vm9, %v3731_v18, %v4866_v28 }
 0xcb1   :  { %v3768_v19 = vpack.i.bf16 %v1945_v24, %v1942_v56 }
 0xcb3   :  { %3769 = vrot.lane.b32.xlu1 %v3768_v19, %s3970_s3 }
 0xcb5   :  { %v3735_v32 = vpop.permute.xlu0 %3734 }
 0xcb6   :  { %v3737_v12 = vunpack.i.h.bf16 %v3735_v32  ;;  %v3736_v13 = vunpack.i.l.bf16 %v3735_v32  ;;  %v3936_v32 = vld [vmem:[%s5503_s10 + $0x4] ss:$12 sps:$4 sm:$0xff]  }
 0xcb7   :  { %2456 = vmatprep.mubr.bf16.mxu0 %v3936_v32  ;;  %v1369_v32 = vld [vmem:[%s5501_s9 + $0xd0] sm:$0xff] }
 0xcb8   :  { %v1951_v16 = vsel %vm547_vm9, %v3737_v12, %v4882_v44  ;;  %v1948_v58 = vsel %vm547_vm9, %v3736_v13, %v4880_v52 }
 0xcb9   :  { %v3773_v22 = vpack.i.bf16 %v1951_v16, %v1948_v58 }
 0xcbb   :  { %3774 = vrot.lane.b32.xlu0 %v3773_v22, %s3970_s3 }
 0xcf5   :  { %v3740_v23 = vpop.permute.xlu1 %3739 }
 0xcf6   :  { %v3742_v47 = vunpack.i.h.bf16 %v3740_v23  ;;  %v3741_v45 = vunpack.i.l.bf16 %v3740_v23 }
 0xcf8   :  { %v1985_v30 = vsel %vm547_vm9, %v3742_v47, %v4824_v3  ;;  %v1984_v46 = vsel %vm547_vm9, %v3741_v45, %v4822_v35  ;;  %v2200_v47 = vld [vmem:[%s5504_s11] sm:$0xff]  ;;  %v5029_v45 = vpop.f32.mrb[56].mxu1 }
 0xcf9   :  { %v3778_v25 = vpack.i.bf16 %v1985_v30, %v1984_v46  ;;  %v1359_v30 = vld [vmem:[%s5501_s9 + $0x80] sm:$0xff]  ;;  %v1827_v46 = vpop.f32.mrb[57].mxu1 }
 0xcfb   :  { %3779 = vrot.lane.b32.xlu1 %v3778_v25, %s3971_s29 }
 0xcfd   :  { %v3745_v49 = vpop.permute.xlu0 %3744 }
 0xcfe   :  { %v3747_v61 = vunpack.i.h.bf16 %v3745_v49  ;;  %v3746_v27 = vunpack.i.l.bf16 %v3745_v49  ;;  %v2202_v49 = vld [vmem:[%s5504_s11 + $0x10] sm:$0xff] }
 0xd00   :  { %v1987_v31 = vsel %vm547_vm9, %v3747_v61, %v4833_v62  ;;  %v1986_v50 = vsel %vm547_vm9, %v3746_v27, %v4831_v57  ;;  %v5041_v61 = vpop.f32.mrb[58].mxu1  ;;  %v1360_v27 = vld [vmem:[%s5501_s9 + $0x88] sm:$0xff] }
 0xd01   :  { %v3783_v33 = vpack.i.bf16 %v1987_v31, %v1986_v50  ;;  %v1361_v31 = vld [vmem:[%s5501_s9 + $0x90] sm:$0xff]  ;;  %v1830_v50 = vpop.f32.mrb[59].mxu1 }
 0xd03   :  { %3784 = vrot.lane.b32.xlu0 %v3783_v33, %s3971_s29 }
 0xd05   :  { %v3750_v34 = vpop.permute.xlu1 %3749 }
 0xd06   :  { %v3752_v3 = vunpack.i.h.bf16 %v3750_v34  ;;  %v3751_v36 = vunpack.i.l.bf16 %v3750_v34 }
 0xd08   :  { %v1989_v35 = vsel %vm547_vm9, %v3752_v3, %v4840_v14  ;;  %v1988_v37 = vsel %vm547_vm9, %v3751_v36, %v4838_v26  ;;  %v2203_v3 = vld [vmem:[%s5504_s11 + $0x18] sm:$0xff]  ;;  %v2204_v36 = vld [vmem:[%s5504_s11 + $0x20] sm:$0xff] }
 0xd09   :  { %v3788_v38 = vpack.i.bf16 %v1989_v35, %v1988_v37 }
 0xd0b   :  { %3789 = vrot.lane.b32.xlu1 %v3788_v38, %s3971_s29 }
 0xd0d   :  { %v3755_v7 = vpop.permute.xlu0 %3754 }
 0xd0e   :  { %v3757_v39 = vunpack.i.h.bf16 %v3755_v7  ;;  %v3756_v42 = vunpack.i.l.bf16 %v3755_v7  ;;  %v1363_v7 = vld [vmem:[%s5501_s9 + $0xa0] sm:$0xff] }
 0xd10   :  { %v1991_v53 = vsel %vm547_vm9, %v3757_v39, %v4847_v54  ;;  %v1990_v55 = vsel %vm547_vm9, %v3756_v42, %v4845_v43 }
 0xd11   :  { %v3793_v63 = vpack.i.bf16 %v1991_v53, %v1990_v55  ;;  %v2205_v53 = vld [vmem:[%s5504_s11 + $0x28] sm:$0xff]  ;;  %v2206_v55 = vld [vmem:[%s5504_s11 + $0x30] sm:$0xff] }
 0xd13   :  { %3794 = vrot.lane.b32.xlu0 %v3793_v63, %s3971_s29 }
 0xd15   :  { %v3760_v0 = vpop.permute.xlu1 %3759 }
 0xd16   :  { %v3762_v1 = vunpack.i.h.bf16 %v3760_v0  ;;  %v3761_v2 = vunpack.i.l.bf16 %v3760_v0 }
 0xd18   :  { %v1993_v41 = vsel %vm547_vm9, %v3762_v1, %v4854_v21  ;;  %v1992_v4 = vsel %vm547_vm9, %v3761_v2, %v4852_v20  ;;  %v1364_v1 = vld [vmem:[%s5501_s9 + $0xa8] sm:$0xff]  ;;  %v1365_v2 = vld [vmem:[%s5501_s9 + $0xb0] sm:$0xff] }
 0xd19   :  { %v3798_v8 = vpack.i.bf16 %v1993_v41, %v1992_v4 }
 0xd1b   :  { %3799 = vrot.lane.b32.xlu1 %v3798_v8, %s3971_s29 }
 0xd1d   :  { %v3765_v11 = vpop.permute.xlu0 %3764 }
 0xd1e   :  { %v3767_v48 = vunpack.i.h.bf16 %v3765_v11  ;;  %v3766_v5 = vunpack.i.l.bf16 %v3765_v11  ;;  %v2208_v11 = vld [vmem:[%s5504_s11 + $0x40] sm:$0xff] }
 0xd20   :  { %v1995_v10 = vsel %vm547_vm9, %v3767_v48, %v4861_v29  ;;  %v1994_v15 = vsel %vm547_vm9, %v3766_v5, %v4859_v51 }
 0xd21   :  { %v3803_v17 = vpack.i.bf16 %v1995_v10, %v1994_v15  ;;  %v1366_v10 = vld [vmem:[%s5501_s9 + $0xb8] sm:$0xff]  ;;  %v1367_v15 = vld [vmem:[%s5501_s9 + $0xc0] sm:$0xff] }
 0xd23   :  { %3804 = vrot.lane.b32.xlu0 %v3803_v17, %s3971_s29 }
 0xd25   :  { %v3770_v59 = vpop.permute.xlu1 %3769 }
 0xd26   :  { %v3772_v60 = vunpack.i.h.bf16 %v3770_v59  ;;  %v3771_v18 = vunpack.i.l.bf16 %v3770_v59 }
 0xd28   :  { %v1997_v24 = vsel %vm547_vm9, %v3772_v60, %v4868_v40  ;;  %v1996_v56 = vsel %vm547_vm9, %v3771_v18, %v4866_v28  ;;  %v2209_v60 = vld [vmem:[%s5504_s11 + $0x48] sm:$0xff]  ;;  %v2210_v18 = vld [vmem:[%s5504_s11 + $0x50] sm:$0xff] }
 0xd29   :  { %v3808_v19 = vpack.i.bf16 %v1997_v24, %v1996_v56 }
 0xd2b   :  { %3809 = vrot.lane.b32.xlu1 %v3808_v19, %s3971_s29 }
 0xd2d   :  { %v3775_v12 = vpop.permute.xlu0 %3774 }
 0xd2e   :  { %v3777_v13 = vunpack.i.h.bf16 %v3775_v12  ;;  %v3776_v16 = vunpack.i.l.bf16 %v3775_v12 }
 0xd2f   :  { %3819 = vrot.lane.b32.xlu1 %v3778_v25, %s3968_s15  ;;  %v2201_v25 = vld [vmem:[%s5504_s11 + $0x8] sm:$0xff] }
 0xd30   :  { %v1999_v58 = vsel %vm547_vm9, %v3777_v13, %v4882_v44  ;;  %v1998_v22 = vsel %vm547_vm9, %v3776_v16, %v4880_v52  ;;  %v2211_v16 = vld [vmem:[%s5504_s11 + $0x58] sm:$0xff] }
 0xd31   :  { %v3813_v23 = vpack.i.bf16 %v1999_v58, %v1998_v22  ;;  %v2212_v58 = vld [vmem:[%s5504_s11 + $0x60] sm:$0xff] }
 0xd33   :  { %3814 = vrot.lane.b32.xlu0 %v3813_v23, %s3971_s29  ;;  %3829 = vrot.lane.b32.xlu1 %v3788_v38, %s3968_s15  ;;  %v1362_v38 = vld [vmem:[%s5501_s9 + $0x98] sm:$0xff] }
 0xd37   :  { %3824 = vrot.lane.b32.xlu0 %v3783_v33, %s3968_s15  ;;  %3839 = vrot.lane.b32.xlu1 %v3798_v8, %s3968_s15  ;;  %v5049_v33 = vpop.f32.mrb[60].mxu1  ;;  %v2207_v8 = vld [vmem:[%s5504_s11 + $0x38] sm:$0xff] }
 0xd38   :  { %v1835_v34 = vpop.f32.mrb[61].mxu1 }
 0xd39   :  { %v5057_v35 = vpop.f32.mrb[62].mxu1 }
 0xd3a   :  { %v1838_v37 = vpop.f32.mrb[63].mxu1 }
 0xd3b   :  { %3834 = vrot.lane.b32.xlu0 %v3793_v63, %s3968_s15  ;;  %3849 = vrot.lane.b32.xlu1 %v3808_v19, %s3968_s15  ;;  %v5065_v39 = vpop.f32.mrb[64].mxu1  ;;  %v1368_v19 = vld [vmem:[%s5501_s9 + $0xc8] sm:$0xff] }
 0xd3c   :  { %v1843_v42 = vpop.f32.mrb[65].mxu1 }
 0xd3d   :  { %v5073_v63 = vpop.f32.mrb[66].mxu1 }
 0xd3e   :  { %v1846_v0 = vpop.f32.mrb[67].mxu1 }
 0xd3f   :  { %3844 = vrot.lane.b32.xlu0 %v3803_v17, %s3968_s15  ;;  %2218 = vperm.xlu1 %3457, %v2200_v47   ;;  %v5081_v41 = vpop.f32.mrb[68].mxu1  ;;  %v2154_v0 = vpack.c.bf16 %v4840_v14, %v4838_v26  ;;  %v1374_v26 = vld [vmem:[%s5501_s9 + $0xf8] sm:$0xff]  ;;  %v2155_v14 = vpack.c.bf16 %v4847_v54, %v4845_v43  ;;  %v2157_v54 = vpack.c.bf16 %v4861_v29, %v4859_v51 }
 0xd40   :  { %v1851_v4 = vpop.f32.mrb[69].mxu1  ;;  %v2159_v51 = vpack.c.bf16 %v4882_v44, %v4880_v52  ;;  %v3937_v44 = vld [vmem:[%s5503_s10 + $0x1c] ss:$12 sps:$4 sm:$0xff]  }
 0xd41   :  { %v5089_v48 = vpop.f32.mrb[70].mxu1  ;;  %v2215_v4 = vld [vmem:[%s5504_s11 + $0x78] sm:$0xff] }
 0xd42   :  { %v1854_v5 = vpop.f32.mrb[71].mxu1 }
 0xd43   :  { %3854 = vrot.lane.b32.xlu0 %v3813_v23, %s3968_s15  ;;  %1457 = vperm.xlu1 %3457, %v1359_v30   ;;  %v5097_v17 = vpop.f32.mrb[72].mxu1 }
 0xd44   :  { %v1859_v59 = vpop.f32.mrb[73].mxu1 }
 0xd45   :  { %v5105_v24 = vpop.f32.mrb[74].mxu1 }
 0xd46   :  { %v1862_v56 = vpop.f32.mrb[75].mxu1 }
 0xd47   :  { %2223 = vperm.xlu0 %3456, %v2201_v25   ;;  %2228 = vperm.xlu1 %3457, %v2202_v49   ;;  %v5113_v12 = vpop.f32.mrb[76].mxu1  ;;  %v1370_v49 = vld [vmem:[%s5501_s9 + $0xd8] sm:$0xff] }
 0xd48   :  { %v1867_v13 = vpop.f32.mrb[77].mxu1 }
 0xd49   :  { %v5121_v30 = vpop.f32.mrb[78].mxu1 }
 0xd4a   :  { %v1870_v46 = vpop.f32.mrb[79].mxu1 }
 0xd4b   :  { %1462 = vperm.xlu0 %3456, %v1360_v27   ;;  %1467 = vperm.xlu1 %3457, %v1361_v31   ;;  %v1371_v27 = vld [vmem:[%s5501_s9 + $0xe0] sm:$0xff]  ;;  %v2153_v31 = vpack.c.bf16 %v4833_v62, %v4831_v57  ;;  %v5133_v50 = vpop.f32.mrb[80].mxu1 }
 0xd4c   :  { %5515 = vst [vmem:[#allocation2_spill] sm:$0xff] %v5133_v50  ;;  %v1875_v34 = vpop.f32.mrb[81].mxu1 }
 0xd4d   :  { %v5141_v42 = vpop.f32.mrb[82].mxu1 }
 0xd4e   :  { %5516 = vst [vmem:[#allocation3_spill] sm:$0xff] %v5141_v42  ;;  %v1878_v57 = vpop.f32.mrb[83].mxu1 }
 0xd4f   :  { %2233 = vperm.xlu0 %3456, %v2203_v3   ;;  %2238 = vperm.xlu1 %3457, %v2204_v36   ;;  %v2213_v3 = vld [vmem:[%s5504_s11 + $0x68] sm:$0xff]  ;;  %v2214_v36 = vld [vmem:[%s5504_s11 + $0x70] sm:$0xff] }
 0xd53   :  { %1472 = vperm.xlu0 %3456, %v1362_v38   ;;  %1477 = vperm.xlu1 %3457, %v1363_v7  }
 0xd57   :  { %2243 = vperm.xlu0 %3456, %v2205_v53   ;;  %2248 = vperm.xlu1 %3457, %v2206_v55   ;;  %v1372_v53 = vld [vmem:[%s5501_s9 + $0xe8] sm:$0xff]  ;;  %v1373_v55 = vld [vmem:[%s5501_s9 + $0xf0] sm:$0xff] }
 0xd5b   :  { %1482 = vperm.xlu0 %3456, %v1364_v1   ;;  %1487 = vperm.xlu1 %3457, %v1365_v2   ;;  %v5153_v1 = vpop.f32.mrb[84].mxu1 }
 0xd5c   :  { %v1883_v2 = vpop.f32.mrb[85].mxu1 }
 0xd5f   :  { %2253 = vperm.xlu0 %3456, %v2207_v8   ;;  %2258 = vperm.xlu1 %3457, %v2208_v11  }
 0xd63   :  { %1492 = vperm.xlu0 %3456, %v1366_v10   ;;  %1497 = vperm.xlu1 %3457, %v1367_v15   ;;  %v5158_v10 = vpop.f32.mrb[86].mxu1 }
 0xd64   :  { %5517 = vst [vmem:[#allocation4_spill] sm:$0xff] %v5158_v10  ;;  %v1886_v15 = vpop.f32.mrb[87].mxu1 }
 0xd65   :  { %v3940_v15 = vld [vmem:[%s5503_s10 + $0x34] ss:$12 sps:$4 sm:$0xff]  }
 0xd67   :  { %2263 = vperm.xlu0 %3456, %v2209_v60   ;;  %2268 = vperm.xlu1 %3457, %v2210_v18  }
 0xd6b   :  { %1502 = vperm.xlu0 %3456, %v1368_v19   ;;  %1507 = vperm.xlu1 %3457, %v1369_v32   ;;  %v2156_v32 = vpack.c.bf16 %v4854_v21, %v4852_v20  ;;  %v2158_v20 = vpack.c.bf16 %v4868_v40, %v4866_v28 }
 0xd6d   :  { %v3780_v22 = vpop.permute.xlu1 %3779 }
 0xd6e   :  { %v3782_v23 = vunpack.i.h.bf16 %v3780_v22  ;;  %v3781_v47 = vunpack.i.l.bf16 %v3780_v22 }
 0xd6f   :  { %2273 = vperm.xlu0 %3456, %v2211_v16   ;;  %2278 = vperm.xlu1 %3457, %v2212_v58  }
 0xd70   :  { %v3112_v25 = vpack.c.bf16 %v3782_v23, %v3781_v47 }
 0xd72   :  { %3227 = vmatpush3.bf16.msk.msra.mxu0 %vm4372_vm12, %v3112_v25 }
 0xd73   :  { %1512 = vperm.xlu0 %3456, %v1370_v49   ;;  %1517 = vperm.xlu1 %3457, %v1371_v27  }
 0xd74   :  { %3228 = vmatprep.subr.bf16.mxu0 %v2153_v31 }
 0xd75   :  { %v3785_v37 = vpop.permute.xlu0 %3784 }
 0xd76   :  { %v3787_v38 = vunpack.i.h.bf16 %v3785_v37  ;;  %v3786_v7 = vunpack.i.l.bf16 %v3785_v37 }
 0xd77   :  { %2283 = vperm.xlu0 %3456, %v2213_v3   ;;  %2288 = vperm.xlu1 %3457, %v2214_v36  }
 0xd78   :  { %v3117_v62 = vpack.c.bf16 %v3787_v38, %v3786_v7  ;;  %v3934_v7 = vld [vmem:[%s5503_s10] ss:$12 sps:$4 sm:$0xff]  }
 0xd7a   :  { %3229 = vmatpush3.bf16.msk.msra.mxu0 %vm4372_vm12, %v3117_v62 }
 0xd7b   :  { %1522 = vperm.xlu0 %3456, %v1372_v53   ;;  %1527 = vperm.xlu1 %3457, %v1373_v55  }
 0xd7c   :  { %3230 = vmatprep.subr.bf16.mxu0 %v2154_v0 }
 0xd7d   :  { %v3790_v8 = vpop.permute.xlu1 %3789 }
 0xd7e   :  { %v3792_v11 = vunpack.i.h.bf16 %v3790_v8  ;;  %v3791_v5 = vunpack.i.l.bf16 %v3790_v8 }
 0xd7f   :  { %2293 = vperm.xlu0 %3456, %v2215_v4  }
 0xd80   :  { %v3122_v59 = vpack.c.bf16 %v3792_v11, %v3791_v5  ;;  %v3939_v11 = vld [vmem:[%s5503_s10 + $0x18] ss:$12 sps:$4 sm:$0xff]  }
 0xd82   :  { %3231 = vmatpush3.bf16.msk.msra.mxu0 %vm4372_vm12, %v3122_v59 }
 0xd83   :  { %1532 = vperm.xlu0 %3456, %v1374_v26   ;;  %3232 = vmatprep.subr.bf16.mxu0 %v2155_v14 }
 0xd85   :  { %v3795_v60 = vpop.permute.xlu0 %3794 }
 0xd86   :  { %v3797_v18 = vunpack.i.h.bf16 %v3795_v60  ;;  %v3796_v56 = vunpack.i.l.bf16 %v3795_v60 }
 0xd88   :  { %v3127_v19 = vpack.c.bf16 %v3797_v18, %v3796_v56 }
 0xd8a   :  { %3233 = vmatpush3.bf16.msk.msra.mxu0 %vm4372_vm12, %v3127_v19 }
 0xd8b   :  { %3234 = vmatprep.subr.bf16.mxu0 %v2156_v32  ;;  %v3942_v32 = vld [vmem:[%s5503_s10 + $0x30] ss:$12 sps:$4 sm:$0xff]  }
 0xd8d   :  { %v3800_v13 = vpop.permute.xlu1 %3799 }
 0xd8e   :  { %v3802_v16 = vunpack.i.h.bf16 %v3800_v13  ;;  %v3801_v58 = vunpack.i.l.bf16 %v3800_v13 }
 0xd90   :  { %v3132_v43 = vpack.c.bf16 %v3802_v16, %v3801_v58  ;;  %v3943_v16 = vld [vmem:[%s5503_s10 + $0x4c] ss:$12 sps:$4 sm:$0xff]  }
 0xd92   :  { %3235 = vmatpush3.bf16.msk.msra.mxu0 %vm4372_vm12, %v3132_v43 }
 0xd93   :  { %3236 = vmatprep.subr.bf16.mxu0 %v2157_v54 }
 0xd95   :  { %v3805_v22 = vpop.permute.xlu0 %3804 }
 0xd96   :  { %v3807_v23 = vunpack.i.h.bf16 %v3805_v22  ;;  %v3806_v47 = vunpack.i.l.bf16 %v3805_v22 }
 0xd98   :  { %v3137_v46 = vpack.c.bf16 %v3807_v23, %v3806_v47 }
 0xd9a   :  { %3237 = vmatpush3.bf16.msk.msra.mxu0 %vm4372_vm12, %v3137_v46 }
 0xd9b   :  { %3238 = vmatprep.subr.bf16.mxu0 %v2158_v20  ;;  %v3945_v20 = vld [vmem:[%s5503_s10 + $0x48] ss:$12 sps:$4 sm:$0xff]  }
 0xd9d   :  { %v3810_v21 = vpop.permute.xlu1 %3809 }
 0xd9e   :  { %v3812_v25 = vunpack.i.h.bf16 %v3810_v21  ;;  %v3811_v49 = vunpack.i.l.bf16 %v3810_v21  ;;  %v3946_v21 = vld [vmem:[%s5503_s10 + $0x64] ss:$12 sps:$4 sm:$0xff]  }
 0xda0   :  { %v3142_v27 = vpack.c.bf16 %v3812_v25, %v3811_v49  ;;  %v3948_v49 = vld [vmem:[%s5503_s10 + $0x60] ss:$12 sps:$4 sm:$0xff]  }
 0xda1   :  { %v3820_v29 = vpop.permute.xlu1 %3819 }
 0xda2   :  { %3239 = vmatpush3.bf16.msk.msra.mxu0 %vm4372_vm12, %v3142_v27  ;;  %v3822_v31 = vunpack.i.h.bf16 %v3820_v29  ;;  %v3821_v34 = vunpack.i.l.bf16 %v3820_v29  ;;  %v3949_v27 = vld [vmem:[%s5503_s10 + $0x7c] ss:$12 sps:$4 sm:$0xff]   ;;  %v3952_v29 = vld [vmem:[%s5503_s10 + $0x94] ss:$12 sps:$4 sm:$0xff]  }
 0xda3   :  { %3240 = vmatprep.subr.bf16.mxu0 %v2159_v51  ;;  %v3951_v51 = vld [vmem:[%s5503_s10 + $0x78] ss:$12 sps:$4 sm:$0xff]  }
 0xda4   :  { %v3152_v37 = vpack.c.bf16 %v3822_v31, %v3821_v34  ;;  %v3955_v31 = vld [vmem:[%s5503_s10 + $0xac] ss:$12 sps:$4 sm:$0xff]   ;;  %v3957_v34 = vld [vmem:[%s5503_s10 + $0xa8] ss:$12 sps:$4 sm:$0xff]  }
 0xda5   :  { %v3815_v3 = vpop.permute.xlu0 %3814  ;;  %v3830_v57 = vpop.permute.xlu1 %3829 }
 0xda6   :  { %v3817_v28 = vunpack.i.h.bf16 %v3815_v3  ;;  %v3816_v40 = vunpack.i.l.bf16 %v3815_v3  ;;  %v3832_v55 = vunpack.i.h.bf16 %v3830_v57  ;;  %v3831_v0 = vunpack.i.l.bf16 %v3830_v57  ;;  %v3958_v3 = vld [vmem:[%s5503_s10 + $0x8] ss:$12 sps:$4 sm:$0xff]   ;;  %v3965_v57 = vld [vmem:[%s5503_s10 + $0xb0] ss:$12 sps:$4 sm:$0xff]  }
 0xda8   :  { %v3147_v36 = vpack.c.bf16 %v3817_v28, %v3816_v40  ;;  %v3162_v6 = vpack.c.bf16 %v3832_v55, %v3831_v0  ;;  %v3959_v28 = vld [vmem:[%s5503_s10 + $0x20] ss:$12 sps:$4 sm:$0xff]   ;;  %v3960_v40 = vld [vmem:[%s5503_s10 + $0x38] ss:$12 sps:$4 sm:$0xff]  }
 0xda9   :  { %v3825_v38 = vpop.permute.xlu0 %3824  ;;  %v3840_v5 = vpop.permute.xlu1 %3839 }
 0xdaa   :  { %v3827_v62 = vunpack.i.h.bf16 %v3825_v38  ;;  %v3826_v52 = vunpack.i.l.bf16 %v3825_v38  ;;  %3241 = vmatpush3.bf16.msk.msra.mxu0 %vm4372_vm12, %v3147_v36  ;;  %v3842_v59 = vunpack.i.h.bf16 %v3840_v5  ;;  %v3841_v26 = vunpack.i.l.bf16 %v3840_v5  ;;  %v3961_v36 = vld [vmem:[%s5503_s10 + $0x50] ss:$12 sps:$4 sm:$0xff]   ;;  %v3963_v38 = vld [vmem:[%s5503_s10 + $0x80] ss:$12 sps:$4 sm:$0xff]  }
 0xdab   :  { %3358 = vmatprep.subr.msk.bf16.mxu0 %vm4403_vm14, %v3152_v37 }
 0xdac   :  { %v3157_v53 = vpack.c.bf16 %v3827_v62, %v3826_v52  ;;  %v3172_v18 = vpack.c.bf16 %v3842_v59, %v3841_v26  ;;  %v2650_v62 = vld [vmem:[%s5505_s12] sm:$0xff]  ;;  %v2651_v52 = vld [vmem:[%s5505_s12 + $0x8] sm:$0xff] }
 0xdad   :  { %2457 = vmatmul.mubr.bf16.vlgmr.msra.gmra.mrb[24].mxu0 %v3934_v7  ;;  %v3835_v2 = vpop.permute.xlu0 %3834  ;;  %v3850_v13 = vpop.permute.xlu1 %3849  ;;  %v3964_v7 = vld [vmem:[%s5503_s10 + $0x98] ss:$12 sps:$4 sm:$0xff]  }
 0xdae   :  { %3359 = vmatpush3.bf16.msk.msra.mxu0 %vm4403_vm14, %v3152_v37  ;;  %2464 = vmatprep.mubr.bf16.mxu0 %v3937_v44  ;;  %v3837_v4 = vunpack.i.h.bf16 %v3835_v2  ;;  %v3836_v8 = vunpack.i.l.bf16 %v3835_v2  ;;  %v3852_v58 = vunpack.i.h.bf16 %v3850_v13  ;;  %v3851_v43 = vunpack.i.l.bf16 %v3850_v13  ;;  %v3962_v37 = vld [vmem:[%s5503_s10 + $0x68] ss:$12 sps:$4 sm:$0xff]  }
 0xdaf   :  { %3360 = vmatprep.subr.msk.bf16.mxu0 %vm4403_vm14, %v3157_v53  ;;  %v3426_v44 = vpack.c.bf16 %v2651_v52, %v2650_v62 }
 0xdb0   :  { %v3167_v14 = vpack.c.bf16 %v3837_v4, %v3836_v8  ;;  %v3182_v23 = vpack.c.bf16 %v3852_v58, %v3851_v43 }
 0xdb1   :  { %v3845_v60 = vpop.permute.xlu0 %3844 }
 0xdb2   :  { %3361 = vmatpush3.bf16.msk.msra.mxu0 %vm4403_vm14, %v3157_v53  ;;  %v3847_v56 = vunpack.i.h.bf16 %v3845_v60  ;;  %v3846_v19 = vunpack.i.l.bf16 %v3845_v60 }
 0xdb3   :  { %3362 = vmatprep.subr.msk.bf16.mxu0 %vm4403_vm14, %v3162_v6 }
 0xdb4   :  { %v3177_v54 = vpack.c.bf16 %v3847_v56, %v3846_v19 }
 0xdb5   :  { %2465 = vmatmul.mubr.bf16.gmra.mrb[28].mxu0 %v3939_v11  ;;  %v3855_v22 = vpop.permute.xlu0 %3854 }
 0xdb6   :  { %3363 = vmatpush3.bf16.msk.msra.mxu0 %vm4403_vm14, %v3162_v6  ;;  %2472 = vmatprep.mubr.bf16.mxu0 %v3940_v15  ;;  %v3857_v47 = vunpack.i.h.bf16 %v3855_v22  ;;  %v3856_v46 = vunpack.i.l.bf16 %v3855_v22 }
 0xdb7   :  { %3364 = vmatprep.subr.msk.bf16.mxu0 %vm4403_vm14, %v3167_v14 }
 0xdb8   :  { %v3187_v25 = vpack.c.bf16 %v3857_v47, %v3856_v46 }
 0xdba   :  { %3365 = vmatpush3.bf16.msk.msra.mxu0 %vm4403_vm14, %v3167_v14 }
 0xdbb   :  { %3366 = vmatprep.subr.msk.bf16.mxu0 %vm4403_vm14, %v3172_v18 }
 0xdbd   :  { %2473 = vmatmul.mubr.bf16.gmra.mrb[32].mxu0 %v3942_v32 }
 0xdbe   :  { %3367 = vmatpush3.bf16.msk.msra.mxu0 %vm4403_vm14, %v3172_v18  ;;  %2480 = vmatprep.mubr.bf16.mxu0 %v3943_v16  ;;  %v5292_v53 = vpop.permute.xlu1 %2218 }
 0xdbf   :  { %3368 = vmatprep.subr.msk.bf16.mxu0 %vm4403_vm14, %v3177_v54 }
 0xdc2   :  { %3369 = vmatpush3.bf16.msk.msra.mxu0 %vm4403_vm14, %v3177_v54  ;;  %v5296_v6 = vpop.permute.xlu1 %1457 }
 0xdc3   :  { %3370 = vmatprep.subr.msk.bf16.mxu0 %vm4403_vm14, %v3182_v23 }
 0xdc5   :  { %2481 = vmatmul.mubr.bf16.gmra.mrb[36].mxu0 %v3945_v20 }
 0xdc6   :  { %3371 = vmatpush3.bf16.msk.msra.mxu0 %vm4403_vm14, %v3182_v23  ;;  %2488 = vmatprep.mubr.bf16.mxu0 %v3946_v21  ;;  %v5294_v55 = vpop.permute.xlu0 %2223  ;;  %v2229_v59 = vpop.permute.xlu1 %2228 }
 0xdc7   :  { %3372 = vmatprep.subr.msk.bf16.mxu0 %vm4403_vm14, %v3187_v25 }
 0xdca   :  { %3373 = vmatpush3.bf16.msk.msra.mxu0 %vm4403_vm14, %v3187_v25  ;;  %v5300_v5 = vpop.permute.xlu0 %1462  ;;  %v1468_v13 = vpop.permute.xlu1 %1467 }
 0xdcb   :  { %3427 = vmatprep.subr.bf16.mxu0 %v3426_v44 }
 0xdcd   :  { %2489 = vmatmul.mubr.bf16.gmra.mrb[40].mxu0 %v3948_v49 }
 0xdce   :  { %2496 = vmatprep.mubr.bf16.mxu0 %v3949_v27  ;;  %v5304_v60 = vpop.permute.xlu0 %2233  ;;  %v5310_v47 = vpop.permute.xlu1 %2238 }
 0xdd2   :  { %v5306_v16 = vpop.permute.xlu0 %1472  ;;  %v5316_v49 = vpop.permute.xlu1 %1477 }
 0xdd5   :  { %2497 = vmatmul.mubr.bf16.gmra.mrb[44].mxu0 %v3951_v51 }
 0xdd6   :  { %2504 = vmatprep.mubr.bf16.mxu0 %v3952_v29  ;;  %v5314_v20 = vpop.permute.xlu0 %2243 }
 0xddd   :  { %2505 = vmatmul.mubr.bf16.gmra.mrb[48].mxu0 %v3954_v9  ;;  %v5320_v9 = vpop.permute.xlu0 %1482 }
 0xdde   :  { %2512 = vmatprep.mubr.bf16.mxu0 %v3955_v31 }
 0xde5   :  { %2513 = vmatmul.mubr.bf16.gmra.mrb[52].mxu0 %v3957_v34  ;;  %v2249_v34 = vpop.permute.xlu1 %2248 }
 0xde6   :  { %3374 = vmatprep.mubr.bf16.mxu0 %v3958_v3 }
 0xded   :  { %3375 = vmatmul.mubr.bf16.vlgmr.msra.gmra.mrb[56].mxu0 %v3959_v28 }
 0xdee   :  { %3378 = vmatprep.mubr.bf16.mxu0 %v3960_v40  ;;  %3429 = vmatpush3.bf16.msra.mxu0 %v3426_v44  ;;  %v5324_v40 = vpop.permute.xlu0 %2253 }
 0xdf2   :  { %v5330_v62 = vpop.permute.xlu0 %1492 }
 0xdf5   :  { %3379 = vmatmul.mubr.bf16.gmra.mrb[60].mxu0 %v3961_v36 }
 0xdf6   :  { %3382 = vmatprep.mubr.bf16.mxu0 %v3962_v37 }
 0xdfd   :  { %3383 = vmatmul.mubr.bf16.gmra.mrb[64].mxu0 %v3963_v38 }
 0xdfe   :  { %3386 = vmatprep.mubr.bf16.mxu0 %v3964_v7 }
 0xe05   :  { %3387 = vmatmul.mubr.bf16.gmra.mrb[68].mxu0 %v3965_v57  ;;  %v1488_v57 = vpop.permute.xlu1 %1487 }
 0xe80   :  { %v3242_v0 = vpop.f32.mrb[24].mxu0 }
 0xe81   :  { %v3243_v2 = vpop.f32.mrb[25].mxu0 }
 0xe82   :  { %v5298_v4 = vadd.f32 %v3243_v2, %v3242_v0  ;;  %v3245_v8 = vpop.f32.mrb[26].mxu0 }
 0xe83   :  { %v3246_v11 = vpop.f32.mrb[27].mxu0 }
 0xe84   :  { %v5302_v15 = vadd.f32 %v3246_v11, %v3245_v8  ;;  %v5334_v11 = vpop.permute.xlu1 %2258 }
 0xe88   :  { %v3248_v26 = vpop.f32.mrb[28].mxu0 }
 0xe89   :  { %v3249_v14 = vpop.f32.mrb[29].mxu0 }
 0xe8a   :  { %v3250_v18 = vadd.f32 %v3249_v14, %v3248_v26  ;;  %v3251_v56 = vpop.f32.mrb[30].mxu0  ;;  %v5338_v14 = vpop.permute.xlu0 %2263 }
 0xe8b   :  { %v3252_v19 = vpop.f32.mrb[31].mxu0 }
 0xe8c   :  { %v3253_v32 = vadd.f32 %v3252_v19, %v3251_v56 }
 0xe90   :  { %v3254_v58 = vpop.f32.mrb[32].mxu0 }
 0xe91   :  { %v3255_v43 = vpop.f32.mrb[33].mxu0 }
 0xe92   :  { %v5308_v54 = vadd.f32 %v3255_v43, %v3254_v58  ;;  %v3257_v22 = vpop.f32.mrb[34].mxu0  ;;  %v5340_v58 = vpop.permute.xlu1 %1497 }
 0xe93   :  { %v3258_v23 = vpop.f32.mrb[35].mxu0 }
 0xe94   :  { %v5312_v46 = vadd.f32 %v3258_v23, %v3257_v22 }
 0xe98   :  { %v3260_v21 = vpop.f32.mrb[36].mxu0 }
 0xe99   :  { %v3261_v25 = vpop.f32.mrb[37].mxu0 }
 0xe9a   :  { %v5318_v27 = vadd.f32 %v3261_v25, %v3260_v21  ;;  %v3263_v51 = vpop.f32.mrb[38].mxu0  ;;  %v5344_v21 = vpop.permute.xlu0 %1502 }
 0xe9b   :  { %v3264_v29 = vpop.f32.mrb[39].mxu0 }
 0xe9c   :  { %v5322_v31 = vadd.f32 %v3264_v29, %v3263_v51  ;;  %v5348_v51 = vpop.permute.xlu1 %2268 }
 0xea0   :  { %v3266_v3 = vpop.f32.mrb[40].mxu0 }
 0xea1   :  { %v3267_v28 = vpop.f32.mrb[41].mxu0 }
 0xea2   :  { %v5326_v36 = vadd.f32 %v3267_v28, %v3266_v3  ;;  %v3269_v37 = vpop.f32.mrb[42].mxu0  ;;  %v5350_v28 = vpop.permute.xlu0 %2273 }
 0xea3   :  { %v3270_v38 = vpop.f32.mrb[43].mxu0 }
 0xea4   :  { %v5328_v7 = vadd.f32 %v3270_v38, %v3269_v37 }
 0xea8   :  { %v3272_v52 = vpop.f32.mrb[44].mxu0 }
 0xea9   :  { %v3273_v44 = vpop.f32.mrb[45].mxu0 }
 0xeaa   :  { %v5332_v0 = vadd.f32 %v3273_v44, %v3272_v52  ;;  %v3275_v2 = vpop.f32.mrb[46].mxu0 }
 0xeab   :  { %v3276_v8 = vpop.f32.mrb[47].mxu0 }
 0xeac   :  { %v5336_v26 = vadd.f32 %v3276_v8, %v3275_v2  ;;  %v1508_v2 = vpop.permute.xlu1 %1507  ;;  %v2467_v8 = vadd.f32 %v3250_v18, %v2229_v59  ;;  %v2462_v59 = vadd.f32 %v5302_v15, %v5294_v55  ;;  %v1837_v18 = vadd.f32 %v5057_v35, %v5306_v16 }
 0xead   :  { %v2483_v55 = vadd.f32 %v5318_v27, %v2249_v34 }
 0xeb0   :  { %v3278_v56 = vpop.f32.mrb[48].mxu0 }
 0xeb1   :  { %v3279_v19 = vpop.f32.mrb[49].mxu0 }
 0xeb2   :  { %v5342_v43 = vadd.f32 %v3279_v19, %v3278_v56  ;;  %v3281_v22 = vpop.f32.mrb[50].mxu0  ;;  %v5356_v56 = vpop.permute.xlu0 %1512 }
 0xeb3   :  { %v3282_v23 = vpop.f32.mrb[51].mxu0 }
 0xeb4   :  { %v5346_v25 = vadd.f32 %v3282_v23, %v3281_v22  ;;  %v2459_v22 = vadd.f32 %v5298_v4, %v5292_v53  ;;  %v1834_v23 = vadd.f32 %v5049_v33, %v1468_v13  ;;  %v1829_v33 = vadd.f32 %v5041_v61, %v5300_v5  ;;  %v5370_v4 = vpop.permute.xlu1 %2278 }
 0xeb5   :  { %v1850_v61 = vadd.f32 %v5081_v41, %v1488_v57  ;;  %v1853_v41 = vadd.f32 %v5089_v48, %v5330_v62  ;;  %v2499_v48 = vadd.f32 %v5332_v0, %v5348_v51 }
 0xeb6   :  { %5518 = vst [vmem:[#allocation5_spill] sm:$0xff] %v5346_v25  ;;  %v2470_v25 = vadd.f32 %v3253_v32, %v5304_v60 }
 0xeb8   :  { %v3284_v29 = vpop.f32.mrb[52].mxu0 }
 0xeb9   :  { %v3285_v3 = vpop.f32.mrb[53].mxu0 }
 0xeba   :  { %v5352_v37 = vadd.f32 %v3285_v3, %v3284_v29  ;;  %v3287_v38 = vpop.f32.mrb[54].mxu0  ;;  %v1826_v29 = vadd.f32 %v5029_v45, %v5296_v6  ;;  %v5372_v45 = vpop.permute.xlu0 %2283 }
 0xebb   :  { %v3288_v52 = vpop.f32.mrb[55].mxu0 }
 0xebc   :  { %v5354_v44 = vadd.f32 %v3288_v52, %v3287_v38 }
 0xec0   :  { %v3376_v19 = vpop.f32.mrb[56].mxu0 }
 0xec1   :  { %v2564_v42 = vadd.f32 %v3376_v19, %v2467_v8  ;;  %v2555_v10 = vpop.f32.mrb[57].mxu0  ;;  %v1842_v8 = vadd.f32 %v5065_v39, %v5316_v49  ;;  %v1518_v19 = vpop.permute.xlu1 %1517 }
 0xec2   :  { %v2556_v3 = vadd.f32 %v2555_v10, %v2459_v22  ;;  %v3377_v38 = vpop.f32.mrb[58].mxu0  ;;  %v2478_v22 = vadd.f32 %v5312_v46, %v5314_v20  ;;  %v1523_v39 = vpop.permute.xlu0 %1522 }
 0xec3   :  { %v2620_v52 = vadd.f32 %v2564_v42, %v1834_v23  ;;  %v2567_v50 = vadd.f32 %v3377_v38, %v2470_v25  ;;  %v2558_v53 = vpop.f32.mrb[59].mxu0  ;;  %v2475_v42 = vadd.f32 %v5308_v54, %v5310_v47 }
 0xec4   :  { %v2618_v60 = vadd.f32 %v2556_v3, %v1826_v29  ;;  %v2559_v32 = vadd.f32 %v2558_v53, %v2462_v59  ;;  %v2502_v53 = vadd.f32 %v5336_v26, %v5350_v28  ;;  %v1861_v26 = vadd.f32 %v5105_v24, %v5344_v21 }
 0xec5   :  { %v2621_v13 = vadd.f32 %v2567_v50, %v1837_v18  ;;  %v2636_v5 = vmax.f32 %v2620_v52, 0.0  ;;  %v2486_v50 = vadd.f32 %v5322_v31, %v5324_v40  ;;  %v1845_v31 = vadd.f32 %v5073_v63, %v5320_v9  ;;  %v2289_v46 = vpop.permute.xlu1 %2288 }
 0xec6   :  { %v2634_v10 = vmax.f32 %v2618_v60, 0.0  ;;  %v2619_v6 = vadd.f32 %v2559_v32, %v1829_v33  ;;  %v2491_v63 = vadd.f32 %v5326_v36, %v5334_v11  ;;  %v1866_v9 = vadd.f32 %v5113_v12, %v1508_v2  ;;  %v2294_v0 = vpop.permute.xlu0 %2293 }
 0xec7   :  { %v2637_v49 = vmax.f32 %v2621_v13, 0.0  ;;  %v1858_v33 = vadd.f32 %v5097_v17, %v5340_v58  ;;  %v2494_v32 = vadd.f32 %v5328_v7, %v5338_v14  ;;  %v1869_v12 = vadd.f32 %v5121_v30, %v5356_v56 }
 0xec8   :  { %v2635_v15 = vmax.f32 %v2619_v6, 0.0  ;;  %v3380_v35 = vpop.f32.mrb[60].mxu0  ;;  %3394 = vmatprep.mubr.msk.f32.mxu0 %vm2652_vm15, %v2634_v10  ;;  %v2515_v7 = vadd.f32 %v5352_v37, %v2289_v46  ;;  %v5520_v37 = vld [vmem:[#allocation5_spill] sm:$0xff] }
 0xec9   :  { %v2580_v16 = vadd.f32 %v3380_v35, %v2483_v55  ;;  %v2571_v25 = vpop.f32.mrb[61].mxu0  ;;  %v1528_v10 = vpop.permute.xlu1 %1527 }
 0xeca   :  { %v2572_v27 = vadd.f32 %v2571_v25, %v2475_v42  ;;  %v3381_v34 = vpop.f32.mrb[62].mxu0  ;;  %3395 = vmatmul.mubr.msk.f32.vlgmr.msra.gmra.mrb[72].mxu0 %vm2652_vm15, %v2635_v15  ;;  %v1533_v30 = vpop.permute.xlu0 %1532  ;;  %v2507_v15 = vadd.f32 %v5342_v43, %v5370_v4  ;;  %v1882_v24 = vadd.f32 %v5153_v1, %v1528_v10  ;;  %v5522_v1 = vld [vmem:[#allocation3_spill] sm:$0xff] }
 0xecb   :  { %v2624_v54 = vadd.f32 %v2580_v16, %v1850_v61  ;;  %v2583_v47 = vadd.f32 %v3381_v34, %v2486_v50  ;;  %v2574_v57 = vpop.f32.mrb[63].mxu0  ;;  %3397 = vmatprep.mubr.msk.f32.mxu0 %vm2652_vm15, %v2636_v5  ;;  %v2518_v61 = vadd.f32 %v5354_v44, %v2294_v0  ;;  %v5519_v5 = vld [vmem:[#allocation2_spill] sm:$0xff] }
 0xecc   :  { %v2622_v40 = vadd.f32 %v2572_v27, %v1842_v8  ;;  %v2575_v23 = vadd.f32 %v2574_v57, %v2478_v22  ;;  %v1874_v16 = vadd.f32 %v5519_v5, %v1518_v19  ;;  %v2510_v8 = vadd.f32 %v5520_v37, %v5372_v45  ;;  %v5521_v27 = vld [vmem:[#allocation4_spill] sm:$0xff] }
 0xecd   :  { %v2625_v29 = vadd.f32 %v2583_v47, %v1853_v41  ;;  %v2640_v59 = vmax.f32 %v2624_v54, 0.0  ;;  %v1885_v34 = vadd.f32 %v5521_v27, %v1533_v30  ;;  %v1877_v41 = vadd.f32 %v5522_v1, %v1523_v39 }
 0xece   :  { %v2638_v3 = vmax.f32 %v2622_v40, 0.0  ;;  %v2623_v38 = vadd.f32 %v2575_v23, %v1845_v31  ;;  %3398 = vmatmul.mubr.msk.f32.gmra.mrb[74].mxu0 %vm2652_vm15, %v2637_v49 }
 0xecf   :  { %v2641_v17 = vmax.f32 %v2625_v29, 0.0 }
 0xed0   :  { %v2639_v20 = vmax.f32 %v2623_v38, 0.0  ;;  %v3384_v62 = vpop.f32.mrb[64].mxu0  ;;  %3400 = vmatprep.mubr.msk.f32.mxu0 %vm2652_vm15, %v2638_v3 }
 0xed1   :  { %v2596_v18 = vadd.f32 %v3384_v62, %v2499_v48  ;;  %v2587_v52 = vpop.f32.mrb[65].mxu0 }
 0xed2   :  { %v2588_v51 = vadd.f32 %v2587_v52, %v2491_v63  ;;  %v3385_v60 = vpop.f32.mrb[66].mxu0  ;;  %3401 = vmatmul.mubr.msk.f32.gmra.mrb[76].mxu0 %vm2652_vm15, %v2639_v20 }
 0xed3   :  { %v2628_v36 = vadd.f32 %v2596_v18, %v1866_v9  ;;  %v2599_v11 = vadd.f32 %v3385_v60, %v2502_v53  ;;  %v2590_v2 = vpop.f32.mrb[67].mxu0  ;;  %3403 = vmatprep.mubr.msk.f32.mxu0 %vm2652_vm15, %v2640_v59 }
 0xed4   :  { %v2626_v58 = vadd.f32 %v2588_v51, %v1858_v33  ;;  %v2591_v28 = vadd.f32 %v2590_v2, %v2494_v32 }
 0xed5   :  { %v2629_v13 = vadd.f32 %v2599_v11, %v1869_v12  ;;  %v2644_v21 = vmax.f32 %v2628_v36, 0.0 }
 0xed6   :  { %v2642_v6 = vmax.f32 %v2626_v58, 0.0  ;;  %v2627_v55 = vadd.f32 %v2591_v28, %v1861_v26  ;;  %3404 = vmatmul.mubr.msk.f32.gmra.mrb[78].mxu0 %vm2652_vm15, %v2641_v17 }
 0xed7   :  { %v2645_v54 = vmax.f32 %v2629_v13, 0.0 }
 0xed8   :  { %v2643_v14 = vmax.f32 %v2627_v55, 0.0  ;;  %v3388_v56 = vpop.f32.mrb[68].mxu0  ;;  %3406 = vmatprep.mubr.msk.f32.mxu0 %vm2652_vm15, %v2642_v6 }
 0xed9   :  { %v2612_v35 = vadd.f32 %v3388_v56, %v2515_v7  ;;  %v2603_v42 = vpop.f32.mrb[69].mxu0 }
 0xeda   :  { %v2604_v25 = vadd.f32 %v2603_v42, %v2507_v15  ;;  %v3389_v50 = vpop.f32.mrb[70].mxu0  ;;  %3407 = vmatmul.mubr.msk.f32.gmra.mrb[80].mxu0 %vm2652_vm15, %v2643_v14 }
 0xedb   :  { %v2632_v22 = vadd.f32 %v2612_v35, %v1882_v24  ;;  %v2615_v43 = vadd.f32 %v3389_v50, %v2518_v61  ;;  %v2606_v4 = vpop.f32.mrb[71].mxu0  ;;  %3409 = vmatprep.mubr.msk.f32.mxu0 %vm2652_vm15, %v2644_v21 }
 0xedc   :  { %v2630_v44 = vadd.f32 %v2604_v25, %v1874_v16  ;;  %v2607_v47 = vadd.f32 %v2606_v4, %v2510_v8 }
 0xedd   :  { %v2633_v19 = vadd.f32 %v2615_v43, %v1885_v34  ;;  %v2648_v45 = vmax.f32 %v2632_v22, 0.0 }
 0xede   :  { %v2646_v57 = vmax.f32 %v2630_v44, 0.0  ;;  %v2631_v31 = vadd.f32 %v2607_v47, %v1877_v41  ;;  %3410 = vmatmul.mubr.msk.f32.gmra.mrb[82].mxu0 %vm2652_vm15, %v2645_v54 }
 0xedf   :  { %v2649_v40 = vmax.f32 %v2633_v19, 0.0 }
 0xee0   :  { %v2647_v49 = vmax.f32 %v2631_v31, 0.0  ;;  %3412 = vmatprep.mubr.msk.f32.mxu0 %vm2652_vm15, %v2646_v57 }
 0xee2   :  { %3413 = vmatmul.mubr.msk.f32.gmra.mrb[84].mxu0 %vm2652_vm15, %v2647_v49 }
 0xee3   :  { %3415 = vmatprep.mubr.msk.f32.mxu0 %vm2652_vm15, %v2648_v45 }
 0xee6   :  { %3416 = vmatmul.mubr.msk.f32.gmra.mrb[86].mxu0 %vm2652_vm15, %v2649_v40 }
 0xf9d   :  { %v3396_v39 = vpop.f32.mrb[72].mxu0 }
 0xf9e   :  { %2848 = vst.msk [vmem:[%s5506_s13 + $0x8] sm:$0xff] %vm2846_vm0, %v3396_v39  ;;  %v2767_v23 = vpop.f32.mrb[73].mxu0 }
 0xf9f   :  { %2847 = vst.msk [vmem:[%s5506_s13] sm:$0xff] %vm2846_vm0, %v2767_v23 }
 0xfa1   :  { %v3399_v29 = vpop.f32.mrb[74].mxu0 }
 0xfa2   :  { %2850 = vst.msk [vmem:[%s5506_s13 + $0x18] sm:$0xff] %vm2846_vm0, %v3399_v29  ;;  %v2777_v3 = vpop.f32.mrb[75].mxu0 }
 0xfa3   :  { %2849 = vst.msk [vmem:[%s5506_s13 + $0x10] sm:$0xff] %vm2846_vm0, %v2777_v3 }
 0xfa5   :  { %v3402_v38 = vpop.f32.mrb[76].mxu0 }
 0xfa6   :  { %2852 = vst.msk [vmem:[%s5506_s13 + $0x28] sm:$0xff] %vm2846_vm0, %v3402_v38  ;;  %v2787_v48 = vpop.f32.mrb[77].mxu0 }
 0xfa7   :  { %2851 = vst.msk [vmem:[%s5506_s13 + $0x20] sm:$0xff] %vm2846_vm0, %v2787_v48 }
 0xfa9   :  { %v3405_v46 = vpop.f32.mrb[78].mxu0 }
 0xfaa   :  { %2854 = vst.msk [vmem:[%s5506_s13 + $0x38] sm:$0xff] %vm2846_vm0, %v3405_v46  ;;  %v2797_v20 = vpop.f32.mrb[79].mxu0 }
 0xfab   :  { %2853 = vst.msk [vmem:[%s5506_s13 + $0x30] sm:$0xff] %vm2846_vm0, %v2797_v20 }
 0xfad   :  { %v3408_v62 = vpop.f32.mrb[80].mxu0 }
 0xfae   :  { %2856 = vst.msk [vmem:[%s5506_s13 + $0x48] sm:$0xff] %vm2846_vm0, %v3408_v62  ;;  %v2807_v63 = vpop.f32.mrb[81].mxu0 }
 0xfaf   :  { %2855 = vst.msk [vmem:[%s5506_s13 + $0x40] sm:$0xff] %vm2846_vm0, %v2807_v63 }
 0xfb1   :  { %v3411_v9 = vpop.f32.mrb[82].mxu0 }
 0xfb2   :  { %2858 = vst.msk [vmem:[%s5506_s13 + $0x58] sm:$0xff] %vm2846_vm0, %v3411_v9  ;;  %v2817_v59 = vpop.f32.mrb[83].mxu0 }
 0xfb3   :  { %2857 = vst.msk [vmem:[%s5506_s13 + $0x50] sm:$0xff] %vm2846_vm0, %v2817_v59 }
 0xfb5   :  { %v3414_v18 = vpop.f32.mrb[84].mxu0 }
 0xfb6   :  { %2860 = vst.msk [vmem:[%s5506_s13 + $0x68] sm:$0xff] %vm2846_vm0, %v3414_v18  ;;  %v2827_v52 = vpop.f32.mrb[85].mxu0 }
 0xfb7   :  { %2859 = vst.msk [vmem:[%s5506_s13 + $0x60] sm:$0xff] %vm2846_vm0, %v2827_v52 }
 0xfb9   :  { %v3417_v53 = vpop.f32.mrb[86].mxu0 }
 0xfba   :  { %2862 = vst.msk [vmem:[%s5506_s13 + $0x78] sm:$0xff] %vm2846_vm0, %v3417_v53  ;;  %v2837_v33 = vpop.f32.mrb[87].mxu0 }
 0xfbb   :  { %2861 = vst.msk [vmem:[%s5506_s13 + $0x70] sm:$0xff] %vm2846_vm0, %v2837_v33 }

</bundles_post_ra>
